<compile_context>
chip_gen: v6e
topology: v6e:2x2x1
jax: 0.10.0
libtpu: 0.0.40
codegen_flags: <defaults>
</compile_context>

<pallas_src>
import jax
import jax.numpy as jnp
from jax import lax
from jax.experimental import pallas as pl
from jax.experimental.pallas import tpu as pltpu

LANES = 128
BATCH_TILE = 16          # samples per grid step (must be a multiple of 8)


# ----------------------------------------------------------------------------
# Pallas kernel: whole Net.forward for one batch tile of B samples.
# ----------------------------------------------------------------------------
def net_kernel(x_ref,                                    # (32, B, 128) bf16
               w1e_ref, w1o_ref, b1_ref,                 # (5,128,128) bf16, (1,128) f32
               w2e_ref, w2o_ref, b2_ref,
               w1f_ref, b1f_ref, w2f_ref, b2f_ref, w3f_ref, b3f_ref,
               o_ref,                                    # (B, 128) f32
               a1_ref, a2_ref):                          # VMEM scratch, bf16
    f32 = jnp.float32
    bf16 = jnp.bfloat16
    B = BATCH_TILE

    # ---- conv1 (3->6, k5) + ReLU + 2x2 maxpool ------------------------------
    # Row-Toeplitz matmuls, one per kernel row and output-column parity.
    ye = jnp.zeros((28 * B, LANES), f32)
    yo = jnp.zeros((28 * B, LANES), f32)
    for kh in range(5):
        # (28, B, 128) window; B % 8 == 0 so the reshape is layout-free.
        xs = x_ref[kh:kh + 28, :, :].reshape(28 * B, LANES)
        ye += jnp.dot(xs, w1e_ref[kh], preferred_element_type=f32)
        yo += jnp.dot(xs, w1o_ref[kh], preferred_element_type=f32)
    # column pool = max over parities; row pool = max of tile-aligned halves.
    z = jnp.maximum(ye, yo).reshape(14, 2 * B, LANES)
    a1 = jnp.maximum(z[:, :B, :], z[:, B:, :])           # (14, B, 128)
    a1 = jnp.maximum(a1 + b1_ref[...][None], 0.0)        # bias+ReLU hoisted
    a1_ref[...] = a1.astype(bf16)                        # lanes: wh*6 + c

    # ---- conv2 (6->16, k5) + ReLU + 2x2 maxpool -----------------------------
    ye = jnp.zeros((10 * B, LANES), f32)
    yo = jnp.zeros((10 * B, LANES), f32)
    for kh in range(5):
        s = a1_ref[kh:kh + 10, :, :].reshape(10 * B, LANES)
        ye += jnp.dot(s, w2e_ref[kh], preferred_element_type=f32)
        yo += jnp.dot(s, w2o_ref[kh], preferred_element_type=f32)
    z = jnp.maximum(ye, yo).reshape(5, 2 * B, LANES)
    a2 = jnp.maximum(z[:, :B, :], z[:, B:, :])           # (5, B, 128)
    a2 = jnp.maximum(a2 + b2_ref[...][None], 0.0)
    a2_ref[...] = a2.astype(bf16)                        # lanes: w*16 + c

    # ---- fc1 (400->120): contraction over (row, lane) via 5 matmuls ---------
    h1 = jnp.zeros((B, LANES), f32)
    for h in range(5):
        h1 += jnp.dot(a2_ref[h], w1f_ref[h], preferred_element_type=f32)
    h1 = jnp.maximum(h1 + b1f_ref[...], 0.0)

    # ---- fc2 (120->84) + ReLU, fc3 (84->10) ---------------------------------
    h2 = jnp.dot(h1.astype(bf16), w2f_ref[...], preferred_element_type=f32)
    h2 = jnp.maximum(h2 + b2f_ref[...], 0.0)
    out = jnp.dot(h2.astype(bf16), w3f_ref[...], preferred_element_type=f32)
    o_ref[...] = out + b3f_ref[...]                      # (B, 128) dense store


# ----------------------------------------------------------------------------
# Weight repacking (one-time, outside the hot path)
# ----------------------------------------------------------------------------
def pack_params(params):
    """Repack PyTorch-layout weights into lane-dense row-Toeplitz matmul
    operands (padded to 128 lanes, padding exactly zero), matmul operands in
    bf16, biases in f32."""
    c1w, c1b, c2w, c2b, ((w1, b1), (w2, b2), (w3, b3)) = params
    f32, bf16 = jnp.float32, jnp.bfloat16

    def conv_row_weights(w, in_stride, out_stride, wh_count, parity):
        # w: (O, C, K, K); result (K, 128, 128) with
        # W[kh, (2*wh+parity+kw)*in_stride + c, wh*out_stride + o] = w[o,c,kh,kw]
        O, C, K, _ = w.shape
        kh_i, kw_i, c_i, wh_i, o_i = jnp.meshgrid(
            jnp.arange(K), jnp.arange(K), jnp.arange(C),
            jnp.arange(wh_count), jnp.arange(O), indexing="ij")
        j_i = (2 * wh_i + parity + kw_i) * in_stride + c_i
        n_i = wh_i * out_stride + o_i
        vals = w.astype(f32)[o_i, c_i, kh_i, kw_i]
        return jnp.zeros((K, LANES, LANES), f32).at[kh_i, j_i, n_i].set(vals)

    def tiled_bias(b, reps):
        O = b.shape[0]
        idx = (jnp.arange(reps)[:, None] * O + jnp.arange(O)[None, :]).reshape(-1)
        return jnp.zeros((1, LANES), f32).at[0, idx].set(jnp.tile(b.astype(f32), reps))

    # conv1: input lanes are w*4 + c, output lanes n = wh*6 + o (wh = pooled col)
    w1e = conv_row_weights(c1w, 4, 6, 14, 0)
    w1o = conv_row_weights(c1w, 4, 6, 14, 1)
    b1r = tiled_bias(c1b, 14)
    # conv2: input lanes are wh*6 + c, output lanes n = w*16 + o
    w2e = conv_row_weights(c2w, 6, 16, 5, 0)
    w2o = conv_row_weights(c2w, 6, 16, 5, 1)
    b2r = tiled_bias(c2b, 5)

    # fc1: absorb torch's x.view(-1, 16*5*5) (C,H,W) flatten permutation.
    h_i, w_i, c_i, n_i = jnp.meshgrid(
        jnp.arange(5), jnp.arange(5), jnp.arange(16), jnp.arange(120),
        indexing="ij")
    w1f = jnp.zeros((5, LANES, LANES), f32).at[h_i, w_i * 16 + c_i, n_i].set(
        w1.astype(f32)[n_i, c_i * 25 + h_i * 5 + w_i])
    b1f = jnp.zeros((1, LANES), f32).at[0, :120].set(b1.astype(f32))

    w2f = jnp.zeros((LANES, LANES), f32).at[:120, :84].set(w2.astype(f32).T)
    b2f = jnp.zeros((1, LANES), f32).at[0, :84].set(b2.astype(f32))
    w3f = jnp.zeros((LANES, LANES), f32).at[:84, :10].set(w3.astype(f32).T)
    b3f = jnp.zeros((1, LANES), f32).at[0, :10].set(b3.astype(f32))

    return (w1e.astype(bf16), w1o.astype(bf16), b1r,
            w2e.astype(bf16), w2o.astype(bf16), b2r,
            w1f.astype(bf16), b1f,
            w2f.astype(bf16), b2f,
            w3f.astype(bf16), b3f)


# ----------------------------------------------------------------------------
# Forward wrapper
# ----------------------------------------------------------------------------
@jax.jit
def net_forward(x_nchw, packed):
    """Pallas implementation of Net.forward. x_nchw: (N, 3, 32, 32) float32."""
    (w1e, w1o, b1r, w2e, w2o, b2r, w1f, b1f, w2f, b2f, w3f, b3f) = packed
    N = x_nchw.shape[0]
    B = BATCH_TILE
    Npad = ((N + B - 1) // B) * B

    # Repack input to (H, N, W*4) lane-dense rows; channels padded 3 -> 4.
    xp = jnp.transpose(x_nchw, (2, 0, 3, 1))                 # (H, N, W, C)
    xp = jnp.pad(xp, ((0, 0), (0, Npad - N), (0, 0), (0, 1)))
    xp = xp.reshape(32, Npad, LANES).astype(jnp.bfloat16)

    def full(shape):
        return pl.BlockSpec(shape, lambda i, _n=len(shape): (0,) * _n)

    out = pl.pallas_call(
        net_kernel,
        out_shape=jax.ShapeDtypeStruct((Npad, LANES), jnp.float32),
        grid=(Npad // B,),
        in_specs=[
            pl.BlockSpec((32, B, LANES), lambda i: (0, i, 0)),   # batch tile
            full((5, LANES, LANES)), full((5, LANES, LANES)), full((1, LANES)),
            full((5, LANES, LANES)), full((5, LANES, LANES)), full((1, LANES)),
            full((5, LANES, LANES)), full((1, LANES)),
            full((LANES, LANES)), full((1, LANES)),
            full((LANES, LANES)), full((1, LANES)),
        ],
        out_specs=pl.BlockSpec((B, LANES), lambda i: (i, 0)),
        scratch_shapes=[pltpu.VMEM((14, B, LANES), jnp.bfloat16),
                        pltpu.VMEM((5, B, LANES), jnp.bfloat16)],
        compiler_params=pltpu.CompilerParams(
            dimension_semantics=("parallel",)),
    )(xp, w1e, w1o, b1r, w2e, w2o, b2r, w1f, b1f, w2f, b2f, w3f, b3f)

    return out[:N, :10]


# ----------------------------------------------------------------------------
# Pure-JAX reference (correctness check only)
# ----------------------------------------------------------------------------
def net_reference(x, params):
    c1w, c1b, c2w, c2b, ((w1, b1), (w2, b2), (w3, b3)) = params
    dn = ('NCHW', 'OIHW', 'NCHW')
    y = lax.conv_general_dilated(x, c1w, (1, 1), 'VALID', dimension_numbers=dn)
    y = jnp.maximum(y + c1b[None, :, None, None], 0.0)
    y = lax.reduce_window(y, -jnp.inf, lax.max, (1, 1, 2, 2), (1, 1, 2, 2), 'VALID')
    y = lax.conv_general_dilated(y, c2w, (1, 1), 'VALID', dimension_numbers=dn)
    y = jnp.maximum(y + c2b[None, :, None, None], 0.0)
    y = lax.reduce_window(y, -jnp.inf, lax.max, (1, 1, 2, 2), (1, 1, 2, 2), 'VALID')
    y = y.reshape(y.shape[0], -1)
    y = jnp.maximum(y @ w1.T + b1, 0.0)
    y = jnp.maximum(y @ w2.T + b2, 0.0)
    return y @ w3.T + b3


def quantize_params_for_check(params):
    """bf16-round the matmul weights (as the kernel does); biases stay f32."""
    q = lambda t: t.astype(jnp.bfloat16).astype(jnp.float32)
    c1w, c1b, c2w, c2b, ((w1, b1), (w2, b2), (w3, b3)) = params
    return (q(c1w), c1b, q(c2w), c2b,
            ((q(w1), b1), (q(w2), b2), (q(w3), b3)))


# ----------------------------------------------------------------------------
# Main
# ----------------------------------------------------------------------------
def init_params(key):
    ks = jax.random.split(key, 10)
    s = 0.1
    c1w = s * jax.random.normal(ks[0], (6, 3, 5, 5), jnp.float32)
    c1b = s * jax.random.normal(ks[1], (6,), jnp.float32)
    c2w = s * jax.random.normal(ks[2], (16, 6, 5, 5), jnp.float32)
    c2b = s * jax.random.normal(ks[3], (16,), jnp.float32)
    w1 = s * jax.random.normal(ks[4], (120, 400), jnp.float32)
    b1 = s * jax.random.normal(ks[5], (120,), jnp.float32)
    w2 = s * jax.random.normal(ks[6], (84, 120), jnp.float32)
    b2 = s * jax.random.normal(ks[7], (84,), jnp.float32)
    w3 = s * jax.random.normal(ks[8], (10, 84), jnp.float32)
    b3 = s * jax.random.normal(ks[9], (10,), jnp.float32)
    return (c1w, c1b, c2w, c2b, ((w1, b1), (w2, b2), (w3, b3)))


if __name__ == "__main__":
    key = jax.random.PRNGKey(0)
    pkey, xkey = jax.random.split(key)
    params = init_params(pkey)
    # CIFAR-sized input (32x32x3 is implied by the 16*5*5 flatten).
    # N = 2 batch tiles of 16 so the grid length is even (v7x megacore parity).
    x = jax.random.normal(xkey, (32, 3, 32, 32), jnp.float32)

    packed = pack_params(params)          # one-time weight repack (bf16)

    out = jax.block_until_ready(net_forward(x, packed))
    assert out.shape == (32, 10), out.shape

    # Reference: same bf16-rounded weights/input, f32 math (kernel accumulates
    # in f32; remaining delta is inter-layer bf16 activation rounding).
    xq = x.astype(jnp.bfloat16).astype(jnp.float32)
    ref = jax.block_until_ready(net_reference(xq, quantize_params_for_check(params)))
    err = float(jnp.max(jnp.abs(out - ref)))
    assert jnp.allclose(out, ref, atol=5e-2, rtol=5e-2), f"max abs err = {err}"

    print("KERNEL_OK")
</pallas_src>

<mosaic_0001>
module attributes {stable_mosaic.version = 11 : i64} {
  func.func @net_kernel(%arg0: i32, %arg1: memref<32x16x128xbf16, #tpu.memory_space<vmem>>, %arg2: memref<5x128x128xbf16, #tpu.memory_space<vmem>>, %arg3: memref<5x128x128xbf16, #tpu.memory_space<vmem>>, %arg4: memref<1x128xf32, #tpu.memory_space<vmem>>, %arg5: memref<5x128x128xbf16, #tpu.memory_space<vmem>>, %arg6: memref<5x128x128xbf16, #tpu.memory_space<vmem>>, %arg7: memref<1x128xf32, #tpu.memory_space<vmem>>, %arg8: memref<5x128x128xbf16, #tpu.memory_space<vmem>>, %arg9: memref<1x128xf32, #tpu.memory_space<vmem>>, %arg10: memref<128x128xbf16, #tpu.memory_space<vmem>>, %arg11: memref<1x128xf32, #tpu.memory_space<vmem>>, %arg12: memref<128x128xbf16, #tpu.memory_space<vmem>>, %arg13: memref<1x128xf32, #tpu.memory_space<vmem>>, %arg14: memref<16x128xf32, #tpu.memory_space<vmem>>, %arg15: memref<14x16x128xbf16, #tpu.memory_space<vmem>>, %arg16: memref<5x16x128xbf16, #tpu.memory_space<vmem>>) attributes {dimension_semantics = [#tpu.dimension_semantics<parallel>], iteration_bounds = array<i64: 2>, scalar_prefetch = 0 : i64, scratch_operands = 2 : i64, tpu.core_type = #tpu.core_type<tc>, window_params = [{transform_indices = @transform_0, window_bounds = array<i64: 32, 16, 128>}, {pipeline_mode = #tpu.pipeline_mode<synchronous>, transform_indices = @transform_1, window_bounds = array<i64: 5, 128, 128>}, {pipeline_mode = #tpu.pipeline_mode<synchronous>, transform_indices = @transform_2, window_bounds = array<i64: 5, 128, 128>}, {pipeline_mode = #tpu.pipeline_mode<synchronous>, transform_indices = @transform_3, window_bounds = array<i64: 1, 128>}, {pipeline_mode = #tpu.pipeline_mode<synchronous>, transform_indices = @transform_4, window_bounds = array<i64: 5, 128, 128>}, {pipeline_mode = #tpu.pipeline_mode<synchronous>, transform_indices = @transform_5, window_bounds = array<i64: 5, 128, 128>}, {pipeline_mode = #tpu.pipeline_mode<synchronous>, transform_indices = @transform_6, window_bounds = array<i64: 1, 128>}, {pipeline_mode = #tpu.pipeline_mode<synchronous>, transform_indices = @transform_7, window_bounds = array<i64: 5, 128, 128>}, {pipeline_mode = #tpu.pipeline_mode<synchronous>, transform_indices = @transform_8, window_bounds = array<i64: 1, 128>}, {pipeline_mode = #tpu.pipeline_mode<synchronous>, transform_indices = @transform_9, window_bounds = array<i64: 128, 128>}, {pipeline_mode = #tpu.pipeline_mode<synchronous>, transform_indices = @transform_10, window_bounds = array<i64: 1, 128>}, {pipeline_mode = #tpu.pipeline_mode<synchronous>, transform_indices = @transform_11, window_bounds = array<i64: 128, 128>}, {pipeline_mode = #tpu.pipeline_mode<synchronous>, transform_indices = @transform_12, window_bounds = array<i64: 1, 128>}, {transform_indices = @transform_13, window_bounds = array<i64: 16, 128>}]} {
    %cst = arith.constant 0.000000e+00 : f32
    %0 = vector.broadcast %cst : f32 to vector<448x128xf32>
    %cst_0 = arith.constant 0.000000e+00 : f32
    %1 = vector.broadcast %cst_0 : f32 to vector<448x128xf32>
    %c0 = arith.constant 0 : index
    %c0_1 = arith.constant 0 : index
    %c0_2 = arith.constant 0 : index
    %2 = vector.load %arg1[%c0, %c0_1, %c0_2] : memref<32x16x128xbf16, #tpu.memory_space<vmem>>, vector<28x16x128xbf16>
    %3 = vector.shape_cast %2 : vector<28x16x128xbf16> to vector<448x128xbf16>
    %c0_3 = arith.constant 0 : index
    %c0_4 = arith.constant 0 : index
    %c0_5 = arith.constant 0 : index
    %4 = vector.load %arg2[%c0_3, %c0_4, %c0_5] : memref<5x128x128xbf16, #tpu.memory_space<vmem>>, vector<1x128x128xbf16>
    %5 = vector.shape_cast %4 : vector<1x128x128xbf16> to vector<128x128xbf16>
    %cst_6 = arith.constant dense<0.000000e+00> : vector<448x128xf32>
    %6 = tpu.matmul %3, %5, %cst_6 {dimension_numbers = #tpu.dot_dimension_numbers<[1], [0], [0], [1], [0, 0, 1, 1], [], []>} : vector<448x128xbf16>, vector<128x128xbf16>, vector<448x128xf32> -> vector<448x128xf32>
    %7 = arith.addf %0, %6 : vector<448x128xf32>
    %c0_7 = arith.constant 0 : index
    %c0_8 = arith.constant 0 : index
    %c0_9 = arith.constant 0 : index
    %8 = vector.load %arg3[%c0_7, %c0_8, %c0_9] : memref<5x128x128xbf16, #tpu.memory_space<vmem>>, vector<1x128x128xbf16>
    %9 = vector.shape_cast %8 : vector<1x128x128xbf16> to vector<128x128xbf16>
    %cst_10 = arith.constant dense<0.000000e+00> : vector<448x128xf32>
    %10 = tpu.matmul %3, %9, %cst_10 {dimension_numbers = #tpu.dot_dimension_numbers<[1], [0], [0], [1], [0, 0, 1, 1], [], []>} : vector<448x128xbf16>, vector<128x128xbf16>, vector<448x128xf32> -> vector<448x128xf32>
    %11 = arith.addf %1, %10 : vector<448x128xf32>
    %c1 = arith.constant 1 : index
    %c0_11 = arith.constant 0 : index
    %c0_12 = arith.constant 0 : index
    %12 = vector.load %arg1[%c1, %c0_11, %c0_12] : memref<32x16x128xbf16, #tpu.memory_space<vmem>>, vector<28x16x128xbf16>
    %13 = vector.shape_cast %12 : vector<28x16x128xbf16> to vector<448x128xbf16>
    %c1_13 = arith.constant 1 : index
    %c0_14 = arith.constant 0 : index
    %c0_15 = arith.constant 0 : index
    %14 = vector.load %arg2[%c1_13, %c0_14, %c0_15] : memref<5x128x128xbf16, #tpu.memory_space<vmem>>, vector<1x128x128xbf16>
    %15 = vector.shape_cast %14 : vector<1x128x128xbf16> to vector<128x128xbf16>
    %cst_16 = arith.constant dense<0.000000e+00> : vector<448x128xf32>
    %16 = tpu.matmul %13, %15, %cst_16 {dimension_numbers = #tpu.dot_dimension_numbers<[1], [0], [0], [1], [0, 0, 1, 1], [], []>} : vector<448x128xbf16>, vector<128x128xbf16>, vector<448x128xf32> -> vector<448x128xf32>
    %17 = arith.addf %7, %16 : vector<448x128xf32>
    %c1_17 = arith.constant 1 : index
    %c0_18 = arith.constant 0 : index
    %c0_19 = arith.constant 0 : index
    %18 = vector.load %arg3[%c1_17, %c0_18, %c0_19] : memref<5x128x128xbf16, #tpu.memory_space<vmem>>, vector<1x128x128xbf16>
    %19 = vector.shape_cast %18 : vector<1x128x128xbf16> to vector<128x128xbf16>
    %cst_20 = arith.constant dense<0.000000e+00> : vector<448x128xf32>
    %20 = tpu.matmul %13, %19, %cst_20 {dimension_numbers = #tpu.dot_dimension_numbers<[1], [0], [0], [1], [0, 0, 1, 1], [], []>} : vector<448x128xbf16>, vector<128x128xbf16>, vector<448x128xf32> -> vector<448x128xf32>
    %21 = arith.addf %11, %20 : vector<448x128xf32>
    %c2 = arith.constant 2 : index
    %c0_21 = arith.constant 0 : index
    %c0_22 = arith.constant 0 : index
    %22 = vector.load %arg1[%c2, %c0_21, %c0_22] : memref<32x16x128xbf16, #tpu.memory_space<vmem>>, vector<28x16x128xbf16>
    %23 = vector.shape_cast %22 : vector<28x16x128xbf16> to vector<448x128xbf16>
    %c2_23 = arith.constant 2 : index
    %c0_24 = arith.constant 0 : index
    %c0_25 = arith.constant 0 : index
    %24 = vector.load %arg2[%c2_23, %c0_24, %c0_25] : memref<5x128x128xbf16, #tpu.memory_space<vmem>>, vector<1x128x128xbf16>
    %25 = vector.shape_cast %24 : vector<1x128x128xbf16> to vector<128x128xbf16>
    %cst_26 = arith.constant dense<0.000000e+00> : vector<448x128xf32>
    %26 = tpu.matmul %23, %25, %cst_26 {dimension_numbers = #tpu.dot_dimension_numbers<[1], [0], [0], [1], [0, 0, 1, 1], [], []>} : vector<448x128xbf16>, vector<128x128xbf16>, vector<448x128xf32> -> vector<448x128xf32>
    %27 = arith.addf %17, %26 : vector<448x128xf32>
    %c2_27 = arith.constant 2 : index
    %c0_28 = arith.constant 0 : index
    %c0_29 = arith.constant 0 : index
    %28 = vector.load %arg3[%c2_27, %c0_28, %c0_29] : memref<5x128x128xbf16, #tpu.memory_space<vmem>>, vector<1x128x128xbf16>
    %29 = vector.shape_cast %28 : vector<1x128x128xbf16> to vector<128x128xbf16>
    %cst_30 = arith.constant dense<0.000000e+00> : vector<448x128xf32>
    %30 = tpu.matmul %23, %29, %cst_30 {dimension_numbers = #tpu.dot_dimension_numbers<[1], [0], [0], [1], [0, 0, 1, 1], [], []>} : vector<448x128xbf16>, vector<128x128xbf16>, vector<448x128xf32> -> vector<448x128xf32>
    %31 = arith.addf %21, %30 : vector<448x128xf32>
    %c3 = arith.constant 3 : index
    %c0_31 = arith.constant 0 : index
    %c0_32 = arith.constant 0 : index
    %32 = vector.load %arg1[%c3, %c0_31, %c0_32] : memref<32x16x128xbf16, #tpu.memory_space<vmem>>, vector<28x16x128xbf16>
    %33 = vector.shape_cast %32 : vector<28x16x128xbf16> to vector<448x128xbf16>
    %c3_33 = arith.constant 3 : index
    %c0_34 = arith.constant 0 : index
    %c0_35 = arith.constant 0 : index
    %34 = vector.load %arg2[%c3_33, %c0_34, %c0_35] : memref<5x128x128xbf16, #tpu.memory_space<vmem>>, vector<1x128x128xbf16>
    %35 = vector.shape_cast %34 : vector<1x128x128xbf16> to vector<128x128xbf16>
    %cst_36 = arith.constant dense<0.000000e+00> : vector<448x128xf32>
    %36 = tpu.matmul %33, %35, %cst_36 {dimension_numbers = #tpu.dot_dimension_numbers<[1], [0], [0], [1], [0, 0, 1, 1], [], []>} : vector<448x128xbf16>, vector<128x128xbf16>, vector<448x128xf32> -> vector<448x128xf32>
    %37 = arith.addf %27, %36 : vector<448x128xf32>
    %c3_37 = arith.constant 3 : index
    %c0_38 = arith.constant 0 : index
    %c0_39 = arith.constant 0 : index
    %38 = vector.load %arg3[%c3_37, %c0_38, %c0_39] : memref<5x128x128xbf16, #tpu.memory_space<vmem>>, vector<1x128x128xbf16>
    %39 = vector.shape_cast %38 : vector<1x128x128xbf16> to vector<128x128xbf16>
    %cst_40 = arith.constant dense<0.000000e+00> : vector<448x128xf32>
    %40 = tpu.matmul %33, %39, %cst_40 {dimension_numbers = #tpu.dot_dimension_numbers<[1], [0], [0], [1], [0, 0, 1, 1], [], []>} : vector<448x128xbf16>, vector<128x128xbf16>, vector<448x128xf32> -> vector<448x128xf32>
    %41 = arith.addf %31, %40 : vector<448x128xf32>
    %c4 = arith.constant 4 : index
    %c0_41 = arith.constant 0 : index
    %c0_42 = arith.constant 0 : index
    %42 = vector.load %arg1[%c4, %c0_41, %c0_42] : memref<32x16x128xbf16, #tpu.memory_space<vmem>>, vector<28x16x128xbf16>
    %43 = vector.shape_cast %42 : vector<28x16x128xbf16> to vector<448x128xbf16>
    %c4_43 = arith.constant 4 : index
    %c0_44 = arith.constant 0 : index
    %c0_45 = arith.constant 0 : index
    %44 = vector.load %arg2[%c4_43, %c0_44, %c0_45] : memref<5x128x128xbf16, #tpu.memory_space<vmem>>, vector<1x128x128xbf16>
    %45 = vector.shape_cast %44 : vector<1x128x128xbf16> to vector<128x128xbf16>
    %cst_46 = arith.constant dense<0.000000e+00> : vector<448x128xf32>
    %46 = tpu.matmul %43, %45, %cst_46 {dimension_numbers = #tpu.dot_dimension_numbers<[1], [0], [0], [1], [0, 0, 1, 1], [], []>} : vector<448x128xbf16>, vector<128x128xbf16>, vector<448x128xf32> -> vector<448x128xf32>
    %47 = arith.addf %37, %46 : vector<448x128xf32>
    %c4_47 = arith.constant 4 : index
    %c0_48 = arith.constant 0 : index
    %c0_49 = arith.constant 0 : index
    %48 = vector.load %arg3[%c4_47, %c0_48, %c0_49] : memref<5x128x128xbf16, #tpu.memory_space<vmem>>, vector<1x128x128xbf16>
    %49 = vector.shape_cast %48 : vector<1x128x128xbf16> to vector<128x128xbf16>
    %cst_50 = arith.constant dense<0.000000e+00> : vector<448x128xf32>
    %50 = tpu.matmul %43, %49, %cst_50 {dimension_numbers = #tpu.dot_dimension_numbers<[1], [0], [0], [1], [0, 0, 1, 1], [], []>} : vector<448x128xbf16>, vector<128x128xbf16>, vector<448x128xf32> -> vector<448x128xf32>
    %51 = arith.addf %41, %50 : vector<448x128xf32>
    %52 = arith.maximumf %47, %51 : vector<448x128xf32>
    %53 = vector.shape_cast %52 : vector<448x128xf32> to vector<14x32x128xf32>
    %54 = vector.extract_strided_slice %53 {offsets = [0, 0, 0], sizes = [14, 16, 128], strides = [1, 1, 1]} : vector<14x32x128xf32> to vector<14x16x128xf32>
    %55 = vector.extract_strided_slice %53 {offsets = [0, 16, 0], sizes = [14, 16, 128], strides = [1, 1, 1]} : vector<14x32x128xf32> to vector<14x16x128xf32>
    %56 = arith.maximumf %54, %55 : vector<14x16x128xf32>
    %c0_51 = arith.constant 0 : index
    %c0_52 = arith.constant 0 : index
    %57 = vector.load %arg4[%c0_51, %c0_52] : memref<1x128xf32, #tpu.memory_space<vmem>>, vector<1x128xf32>
    %58 = vector.shape_cast %57 : vector<1x128xf32> to vector<1x1x128xf32>
    %59 = vector.broadcast %58 : vector<1x1x128xf32> to vector<14x16x128xf32>
    %60 = arith.addf %56, %59 : vector<14x16x128xf32>
    %cst_53 = arith.constant 0.000000e+00 : f32
    %61 = vector.broadcast %cst_53 : f32 to vector<14x16x128xf32>
    %62 = arith.maximumf %60, %61 : vector<14x16x128xf32>
    %63 = arith.truncf %62 : vector<14x16x128xf32> to vector<14x16x128xbf16>
    %c0_54 = arith.constant 0 : index
    %c0_55 = arith.constant 0 : index
    %c0_56 = arith.constant 0 : index
    %64 = vector.load %arg15[%c0_54, %c0_55, %c0_56] : memref<14x16x128xbf16, #tpu.memory_space<vmem>>, vector<14x16x128xbf16>
    tpu.vector_store %arg15[%c0_54, %c0_55, %c0_56], %63 {strides = array<i32>} : memref<14x16x128xbf16, #tpu.memory_space<vmem>>, vector<14x16x128xbf16>,
    %cst_57 = arith.constant 0.000000e+00 : f32
    %65 = vector.broadcast %cst_57 : f32 to vector<160x128xf32>
    %cst_58 = arith.constant 0.000000e+00 : f32
    %66 = vector.broadcast %cst_58 : f32 to vector<160x128xf32>
    %c0_59 = arith.constant 0 : index
    %c0_60 = arith.constant 0 : index
    %c0_61 = arith.constant 0 : index
    %67 = vector.load %arg15[%c0_59, %c0_60, %c0_61] : memref<14x16x128xbf16, #tpu.memory_space<vmem>>, vector<10x16x128xbf16>
    %68 = vector.shape_cast %67 : vector<10x16x128xbf16> to vector<160x128xbf16>
    %c0_62 = arith.constant 0 : index
    %c0_63 = arith.constant 0 : index
    %c0_64 = arith.constant 0 : index
    %69 = vector.load %arg5[%c0_62, %c0_63, %c0_64] : memref<5x128x128xbf16, #tpu.memory_space<vmem>>, vector<1x128x128xbf16>
    %70 = vector.shape_cast %69 : vector<1x128x128xbf16> to vector<128x128xbf16>
    %cst_65 = arith.constant dense<0.000000e+00> : vector<160x128xf32>
    %71 = tpu.matmul %68, %70, %cst_65 {dimension_numbers = #tpu.dot_dimension_numbers<[1], [0], [0], [1], [0, 0, 1, 1], [], []>} : vector<160x128xbf16>, vector<128x128xbf16>, vector<160x128xf32> -> vector<160x128xf32>
    %72 = arith.addf %65, %71 : vector<160x128xf32>
    %c0_66 = arith.constant 0 : index
    %c0_67 = arith.constant 0 : index
    %c0_68 = arith.constant 0 : index
    %73 = vector.load %arg6[%c0_66, %c0_67, %c0_68] : memref<5x128x128xbf16, #tpu.memory_space<vmem>>, vector<1x128x128xbf16>
    %74 = vector.shape_cast %73 : vector<1x128x128xbf16> to vector<128x128xbf16>
    %cst_69 = arith.constant dense<0.000000e+00> : vector<160x128xf32>
    %75 = tpu.matmul %68, %74, %cst_69 {dimension_numbers = #tpu.dot_dimension_numbers<[1], [0], [0], [1], [0, 0, 1, 1], [], []>} : vector<160x128xbf16>, vector<128x128xbf16>, vector<160x128xf32> -> vector<160x128xf32>
    %76 = arith.addf %66, %75 : vector<160x128xf32>
    %c1_70 = arith.constant 1 : index
    %c0_71 = arith.constant 0 : index
    %c0_72 = arith.constant 0 : index
    %77 = vector.load %arg15[%c1_70, %c0_71, %c0_72] : memref<14x16x128xbf16, #tpu.memory_space<vmem>>, vector<10x16x128xbf16>
    %78 = vector.shape_cast %77 : vector<10x16x128xbf16> to vector<160x128xbf16>
    %c1_73 = arith.constant 1 : index
    %c0_74 = arith.constant 0 : index
    %c0_75 = arith.constant 0 : index
    %79 = vector.load %arg5[%c1_73, %c0_74, %c0_75] : memref<5x128x128xbf16, #tpu.memory_space<vmem>>, vector<1x128x128xbf16>
    %80 = vector.shape_cast %79 : vector<1x128x128xbf16> to vector<128x128xbf16>
    %cst_76 = arith.constant dense<0.000000e+00> : vector<160x128xf32>
    %81 = tpu.matmul %78, %80, %cst_76 {dimension_numbers = #tpu.dot_dimension_numbers<[1], [0], [0], [1], [0, 0, 1, 1], [], []>} : vector<160x128xbf16>, vector<128x128xbf16>, vector<160x128xf32> -> vector<160x128xf32>
    %82 = arith.addf %72, %81 : vector<160x128xf32>
    %c1_77 = arith.constant 1 : index
    %c0_78 = arith.constant 0 : index
    %c0_79 = arith.constant 0 : index
    %83 = vector.load %arg6[%c1_77, %c0_78, %c0_79] : memref<5x128x128xbf16, #tpu.memory_space<vmem>>, vector<1x128x128xbf16>
    %84 = vector.shape_cast %83 : vector<1x128x128xbf16> to vector<128x128xbf16>
    %cst_80 = arith.constant dense<0.000000e+00> : vector<160x128xf32>
    %85 = tpu.matmul %78, %84, %cst_80 {dimension_numbers = #tpu.dot_dimension_numbers<[1], [0], [0], [1], [0, 0, 1, 1], [], []>} : vector<160x128xbf16>, vector<128x128xbf16>, vector<160x128xf32> -> vector<160x128xf32>
    %86 = arith.addf %76, %85 : vector<160x128xf32>
    %c2_81 = arith.constant 2 : index
    %c0_82 = arith.constant 0 : index
    %c0_83 = arith.constant 0 : index
    %87 = vector.load %arg15[%c2_81, %c0_82, %c0_83] : memref<14x16x128xbf16, #tpu.memory_space<vmem>>, vector<10x16x128xbf16>
    %88 = vector.shape_cast %87 : vector<10x16x128xbf16> to vector<160x128xbf16>
    %c2_84 = arith.constant 2 : index
    %c0_85 = arith.constant 0 : index
    %c0_86 = arith.constant 0 : index
    %89 = vector.load %arg5[%c2_84, %c0_85, %c0_86] : memref<5x128x128xbf16, #tpu.memory_space<vmem>>, vector<1x128x128xbf16>
    %90 = vector.shape_cast %89 : vector<1x128x128xbf16> to vector<128x128xbf16>
    %cst_87 = arith.constant dense<0.000000e+00> : vector<160x128xf32>
    %91 = tpu.matmul %88, %90, %cst_87 {dimension_numbers = #tpu.dot_dimension_numbers<[1], [0], [0], [1], [0, 0, 1, 1], [], []>} : vector<160x128xbf16>, vector<128x128xbf16>, vector<160x128xf32> -> vector<160x128xf32>
    %92 = arith.addf %82, %91 : vector<160x128xf32>
    %c2_88 = arith.constant 2 : index
    %c0_89 = arith.constant 0 : index
    %c0_90 = arith.constant 0 : index
    %93 = vector.load %arg6[%c2_88, %c0_89, %c0_90] : memref<5x128x128xbf16, #tpu.memory_space<vmem>>, vector<1x128x128xbf16>
    %94 = vector.shape_cast %93 : vector<1x128x128xbf16> to vector<128x128xbf16>
    %cst_91 = arith.constant dense<0.000000e+00> : vector<160x128xf32>
    %95 = tpu.matmul %88, %94, %cst_91 {dimension_numbers = #tpu.dot_dimension_numbers<[1], [0], [0], [1], [0, 0, 1, 1], [], []>} : vector<160x128xbf16>, vector<128x128xbf16>, vector<160x128xf32> -> vector<160x128xf32>
    %96 = arith.addf %86, %95 : vector<160x128xf32>
    %c3_92 = arith.constant 3 : index
    %c0_93 = arith.constant 0 : index
    %c0_94 = arith.constant 0 : index
    %97 = vector.load %arg15[%c3_92, %c0_93, %c0_94] : memref<14x16x128xbf16, #tpu.memory_space<vmem>>, vector<10x16x128xbf16>
    %98 = vector.shape_cast %97 : vector<10x16x128xbf16> to vector<160x128xbf16>
    %c3_95 = arith.constant 3 : index
    %c0_96 = arith.constant 0 : index
    %c0_97 = arith.constant 0 : index
    %99 = vector.load %arg5[%c3_95, %c0_96, %c0_97] : memref<5x128x128xbf16, #tpu.memory_space<vmem>>, vector<1x128x128xbf16>
    %100 = vector.shape_cast %99 : vector<1x128x128xbf16> to vector<128x128xbf16>
    %cst_98 = arith.constant dense<0.000000e+00> : vector<160x128xf32>
    %101 = tpu.matmul %98, %100, %cst_98 {dimension_numbers = #tpu.dot_dimension_numbers<[1], [0], [0], [1], [0, 0, 1, 1], [], []>} : vector<160x128xbf16>, vector<128x128xbf16>, vector<160x128xf32> -> vector<160x128xf32>
    %102 = arith.addf %92, %101 : vector<160x128xf32>
    %c3_99 = arith.constant 3 : index
    %c0_100 = arith.constant 0 : index
    %c0_101 = arith.constant 0 : index
    %103 = vector.load %arg6[%c3_99, %c0_100, %c0_101] : memref<5x128x128xbf16, #tpu.memory_space<vmem>>, vector<1x128x128xbf16>
    %104 = vector.shape_cast %103 : vector<1x128x128xbf16> to vector<128x128xbf16>
    %cst_102 = arith.constant dense<0.000000e+00> : vector<160x128xf32>
    %105 = tpu.matmul %98, %104, %cst_102 {dimension_numbers = #tpu.dot_dimension_numbers<[1], [0], [0], [1], [0, 0, 1, 1], [], []>} : vector<160x128xbf16>, vector<128x128xbf16>, vector<160x128xf32> -> vector<160x128xf32>
    %106 = arith.addf %96, %105 : vector<160x128xf32>
    %c4_103 = arith.constant 4 : index
    %c0_104 = arith.constant 0 : index
    %c0_105 = arith.constant 0 : index
    %107 = vector.load %arg15[%c4_103, %c0_104, %c0_105] : memref<14x16x128xbf16, #tpu.memory_space<vmem>>, vector<10x16x128xbf16>
    %108 = vector.shape_cast %107 : vector<10x16x128xbf16> to vector<160x128xbf16>
    %c4_106 = arith.constant 4 : index
    %c0_107 = arith.constant 0 : index
    %c0_108 = arith.constant 0 : index
    %109 = vector.load %arg5[%c4_106, %c0_107, %c0_108] : memref<5x128x128xbf16, #tpu.memory_space<vmem>>, vector<1x128x128xbf16>
    %110 = vector.shape_cast %109 : vector<1x128x128xbf16> to vector<128x128xbf16>
    %cst_109 = arith.constant dense<0.000000e+00> : vector<160x128xf32>
    %111 = tpu.matmul %108, %110, %cst_109 {dimension_numbers = #tpu.dot_dimension_numbers<[1], [0], [0], [1], [0, 0, 1, 1], [], []>} : vector<160x128xbf16>, vector<128x128xbf16>, vector<160x128xf32> -> vector<160x128xf32>
    %112 = arith.addf %102, %111 : vector<160x128xf32>
    %c4_110 = arith.constant 4 : index
    %c0_111 = arith.constant 0 : index
    %c0_112 = arith.constant 0 : index
    %113 = vector.load %arg6[%c4_110, %c0_111, %c0_112] : memref<5x128x128xbf16, #tpu.memory_space<vmem>>, vector<1x128x128xbf16>
    %114 = vector.shape_cast %113 : vector<1x128x128xbf16> to vector<128x128xbf16>
    %cst_113 = arith.constant dense<0.000000e+00> : vector<160x128xf32>
    %115 = tpu.matmul %108, %114, %cst_113 {dimension_numbers = #tpu.dot_dimension_numbers<[1], [0], [0], [1], [0, 0, 1, 1], [], []>} : vector<160x128xbf16>, vector<128x128xbf16>, vector<160x128xf32> -> vector<160x128xf32>
    %116 = arith.addf %106, %115 : vector<160x128xf32>
    %117 = arith.maximumf %112, %116 : vector<160x128xf32>
    %118 = vector.shape_cast %117 : vector<160x128xf32> to vector<5x32x128xf32>
    %119 = vector.extract_strided_slice %118 {offsets = [0, 0, 0], sizes = [5, 16, 128], strides = [1, 1, 1]} : vector<5x32x128xf32> to vector<5x16x128xf32>
    %120 = vector.extract_strided_slice %118 {offsets = [0, 16, 0], sizes = [5, 16, 128], strides = [1, 1, 1]} : vector<5x32x128xf32> to vector<5x16x128xf32>
    %121 = arith.maximumf %119, %120 : vector<5x16x128xf32>
    %c0_114 = arith.constant 0 : index
    %c0_115 = arith.constant 0 : index
    %122 = vector.load %arg7[%c0_114, %c0_115] : memref<1x128xf32, #tpu.memory_space<vmem>>, vector<1x128xf32>
    %123 = vector.shape_cast %122 : vector<1x128xf32> to vector<1x1x128xf32>
    %124 = vector.broadcast %123 : vector<1x1x128xf32> to vector<5x16x128xf32>
    %125 = arith.addf %121, %124 : vector<5x16x128xf32>
    %cst_116 = arith.constant 0.000000e+00 : f32
    %126 = vector.broadcast %cst_116 : f32 to vector<5x16x128xf32>
    %127 = arith.maximumf %125, %126 : vector<5x16x128xf32>
    %128 = arith.truncf %127 : vector<5x16x128xf32> to vector<5x16x128xbf16>
    %c0_117 = arith.constant 0 : index
    %c0_118 = arith.constant 0 : index
    %c0_119 = arith.constant 0 : index
    %129 = vector.load %arg16[%c0_117, %c0_118, %c0_119] : memref<5x16x128xbf16, #tpu.memory_space<vmem>>, vector<5x16x128xbf16>
    tpu.vector_store %arg16[%c0_117, %c0_118, %c0_119], %128 {strides = array<i32>} : memref<5x16x128xbf16, #tpu.memory_space<vmem>>, vector<5x16x128xbf16>,
    %cst_120 = arith.constant 0.000000e+00 : f32
    %130 = vector.broadcast %cst_120 : f32 to vector<16x128xf32>
    %c0_121 = arith.constant 0 : index
    %c0_122 = arith.constant 0 : index
    %c0_123 = arith.constant 0 : index
    %131 = vector.load %arg16[%c0_121, %c0_122, %c0_123] : memref<5x16x128xbf16, #tpu.memory_space<vmem>>, vector<1x16x128xbf16>
    %132 = vector.shape_cast %131 : vector<1x16x128xbf16> to vector<16x128xbf16>
    %c0_124 = arith.constant 0 : index
    %c0_125 = arith.constant 0 : index
    %c0_126 = arith.constant 0 : index
    %133 = vector.load %arg8[%c0_124, %c0_125, %c0_126] : memref<5x128x128xbf16, #tpu.memory_space<vmem>>, vector<1x128x128xbf16>
    %134 = vector.shape_cast %133 : vector<1x128x128xbf16> to vector<128x128xbf16>
    %cst_127 = arith.constant dense<0.000000e+00> : vector<16x128xf32>
    %135 = tpu.matmul %132, %134, %cst_127 {dimension_numbers = #tpu.dot_dimension_numbers<[1], [0], [0], [1], [0, 0, 1, 1], [], []>} : vector<16x128xbf16>, vector<128x128xbf16>, vector<16x128xf32> -> vector<16x128xf32>
    %136 = arith.addf %130, %135 : vector<16x128xf32>
    %c1_128 = arith.constant 1 : index
    %c0_129 = arith.constant 0 : index
    %c0_130 = arith.constant 0 : index
    %137 = vector.load %arg16[%c1_128, %c0_129, %c0_130] : memref<5x16x128xbf16, #tpu.memory_space<vmem>>, vector<1x16x128xbf16>
    %138 = vector.shape_cast %137 : vector<1x16x128xbf16> to vector<16x128xbf16>
    %c1_131 = arith.constant 1 : index
    %c0_132 = arith.constant 0 : index
    %c0_133 = arith.constant 0 : index
    %139 = vector.load %arg8[%c1_131, %c0_132, %c0_133] : memref<5x128x128xbf16, #tpu.memory_space<vmem>>, vector<1x128x128xbf16>
    %140 = vector.shape_cast %139 : vector<1x128x128xbf16> to vector<128x128xbf16>
    %cst_134 = arith.constant dense<0.000000e+00> : vector<16x128xf32>
    %141 = tpu.matmul %138, %140, %cst_134 {dimension_numbers = #tpu.dot_dimension_numbers<[1], [0], [0], [1], [0, 0, 1, 1], [], []>} : vector<16x128xbf16>, vector<128x128xbf16>, vector<16x128xf32> -> vector<16x128xf32>
    %142 = arith.addf %136, %141 : vector<16x128xf32>
    %c2_135 = arith.constant 2 : index
    %c0_136 = arith.constant 0 : index
    %c0_137 = arith.constant 0 : index
    %143 = vector.load %arg16[%c2_135, %c0_136, %c0_137] : memref<5x16x128xbf16, #tpu.memory_space<vmem>>, vector<1x16x128xbf16>
    %144 = vector.shape_cast %143 : vector<1x16x128xbf16> to vector<16x128xbf16>
    %c2_138 = arith.constant 2 : index
    %c0_139 = arith.constant 0 : index
    %c0_140 = arith.constant 0 : index
    %145 = vector.load %arg8[%c2_138, %c0_139, %c0_140] : memref<5x128x128xbf16, #tpu.memory_space<vmem>>, vector<1x128x128xbf16>
    %146 = vector.shape_cast %145 : vector<1x128x128xbf16> to vector<128x128xbf16>
    %cst_141 = arith.constant dense<0.000000e+00> : vector<16x128xf32>
    %147 = tpu.matmul %144, %146, %cst_141 {dimension_numbers = #tpu.dot_dimension_numbers<[1], [0], [0], [1], [0, 0, 1, 1], [], []>} : vector<16x128xbf16>, vector<128x128xbf16>, vector<16x128xf32> -> vector<16x128xf32>
    %148 = arith.addf %142, %147 : vector<16x128xf32>
    %c3_142 = arith.constant 3 : index
    %c0_143 = arith.constant 0 : index
    %c0_144 = arith.constant 0 : index
    %149 = vector.load %arg16[%c3_142, %c0_143, %c0_144] : memref<5x16x128xbf16, #tpu.memory_space<vmem>>, vector<1x16x128xbf16>
    %150 = vector.shape_cast %149 : vector<1x16x128xbf16> to vector<16x128xbf16>
    %c3_145 = arith.constant 3 : index
    %c0_146 = arith.constant 0 : index
    %c0_147 = arith.constant 0 : index
    %151 = vector.load %arg8[%c3_145, %c0_146, %c0_147] : memref<5x128x128xbf16, #tpu.memory_space<vmem>>, vector<1x128x128xbf16>
    %152 = vector.shape_cast %151 : vector<1x128x128xbf16> to vector<128x128xbf16>
    %cst_148 = arith.constant dense<0.000000e+00> : vector<16x128xf32>
    %153 = tpu.matmul %150, %152, %cst_148 {dimension_numbers = #tpu.dot_dimension_numbers<[1], [0], [0], [1], [0, 0, 1, 1], [], []>} : vector<16x128xbf16>, vector<128x128xbf16>, vector<16x128xf32> -> vector<16x128xf32>
    %154 = arith.addf %148, %153 : vector<16x128xf32>
    %c4_149 = arith.constant 4 : index
    %c0_150 = arith.constant 0 : index
    %c0_151 = arith.constant 0 : index
    %155 = vector.load %arg16[%c4_149, %c0_150, %c0_151] : memref<5x16x128xbf16, #tpu.memory_space<vmem>>, vector<1x16x128xbf16>
    %156 = vector.shape_cast %155 : vector<1x16x128xbf16> to vector<16x128xbf16>
    %c4_152 = arith.constant 4 : index
    %c0_153 = arith.constant 0 : index
    %c0_154 = arith.constant 0 : index
    %157 = vector.load %arg8[%c4_152, %c0_153, %c0_154] : memref<5x128x128xbf16, #tpu.memory_space<vmem>>, vector<1x128x128xbf16>
    %158 = vector.shape_cast %157 : vector<1x128x128xbf16> to vector<128x128xbf16>
    %cst_155 = arith.constant dense<0.000000e+00> : vector<16x128xf32>
    %159 = tpu.matmul %156, %158, %cst_155 {dimension_numbers = #tpu.dot_dimension_numbers<[1], [0], [0], [1], [0, 0, 1, 1], [], []>} : vector<16x128xbf16>, vector<128x128xbf16>, vector<16x128xf32> -> vector<16x128xf32>
    %160 = arith.addf %154, %159 : vector<16x128xf32>
    %c0_156 = arith.constant 0 : index
    %c0_157 = arith.constant 0 : index
    %161 = vector.load %arg9[%c0_156, %c0_157] : memref<1x128xf32, #tpu.memory_space<vmem>>, vector<1x128xf32>
    %162 = vector.broadcast %161 : vector<1x128xf32> to vector<16x128xf32>
    %163 = arith.addf %160, %162 : vector<16x128xf32>
    %cst_158 = arith.constant 0.000000e+00 : f32
    %164 = vector.broadcast %cst_158 : f32 to vector<16x128xf32>
    %165 = arith.maximumf %163, %164 : vector<16x128xf32>
    %166 = arith.truncf %165 : vector<16x128xf32> to vector<16x128xbf16>
    %c0_159 = arith.constant 0 : index
    %c0_160 = arith.constant 0 : index
    %167 = vector.load %arg10[%c0_159, %c0_160] : memref<128x128xbf16, #tpu.memory_space<vmem>>, vector<128x128xbf16>
    %cst_161 = arith.constant dense<0.000000e+00> : vector<16x128xf32>
    %168 = tpu.matmul %166, %167, %cst_161 {dimension_numbers = #tpu.dot_dimension_numbers<[1], [0], [0], [1], [0, 0, 1, 1], [], []>} : vector<16x128xbf16>, vector<128x128xbf16>, vector<16x128xf32> -> vector<16x128xf32>
    %c0_162 = arith.constant 0 : index
    %c0_163 = arith.constant 0 : index
    %169 = vector.load %arg11[%c0_162, %c0_163] : memref<1x128xf32, #tpu.memory_space<vmem>>, vector<1x128xf32>
    %170 = vector.broadcast %169 : vector<1x128xf32> to vector<16x128xf32>
    %171 = arith.addf %168, %170 : vector<16x128xf32>
    %cst_164 = arith.constant 0.000000e+00 : f32
    %172 = vector.broadcast %cst_164 : f32 to vector<16x128xf32>
    %173 = arith.maximumf %171, %172 : vector<16x128xf32>
    %174 = arith.truncf %173 : vector<16x128xf32> to vector<16x128xbf16>
    %c0_165 = arith.constant 0 : index
    %c0_166 = arith.constant 0 : index
    %175 = vector.load %arg12[%c0_165, %c0_166] : memref<128x128xbf16, #tpu.memory_space<vmem>>, vector<128x128xbf16>
    %cst_167 = arith.constant dense<0.000000e+00> : vector<16x128xf32>
    %176 = tpu.matmul %174, %175, %cst_167 {dimension_numbers = #tpu.dot_dimension_numbers<[1], [0], [0], [1], [0, 0, 1, 1], [], []>} : vector<16x128xbf16>, vector<128x128xbf16>, vector<16x128xf32> -> vector<16x128xf32>
    %c0_168 = arith.constant 0 : index
    %c0_169 = arith.constant 0 : index
    %177 = vector.load %arg13[%c0_168, %c0_169] : memref<1x128xf32, #tpu.memory_space<vmem>>, vector<1x128xf32>
    %178 = vector.broadcast %177 : vector<1x128xf32> to vector<16x128xf32>
    %179 = arith.addf %176, %178 : vector<16x128xf32>
    %c0_170 = arith.constant 0 : index
    %c0_171 = arith.constant 0 : index
    %180 = vector.load %arg14[%c0_170, %c0_171] : memref<16x128xf32, #tpu.memory_space<vmem>>, vector<16x128xf32>
    tpu.vector_store %arg14[%c0_170, %c0_171], %179 {strides = array<i32>} : memref<16x128xf32, #tpu.memory_space<vmem>>, vector<16x128xf32>,
    return
  }
  func.func @transform_0(%arg0: i32) -> (i32, i32, i32) {
    %c0_i32 = arith.constant 0 : i32
    %c0_i32_0 = arith.constant 0 : i32
    %c0_i32_1 = arith.constant 0 : i32
    return %c0_i32, %arg0, %c0_i32_0 : i32, i32, i32
  }
  func.func @transform_1(%arg0: i32) -> (i32, i32, i32) {
    %c0_i32 = arith.constant 0 : i32
    %c0_i32_0 = arith.constant 0 : i32
    %c0_i32_1 = arith.constant 0 : i32
    %c0_i32_2 = arith.constant 0 : i32
    return %c0_i32, %c0_i32_0, %c0_i32_1 : i32, i32, i32
  }
  func.func @transform_2(%arg0: i32) -> (i32, i32, i32) {
    %c0_i32 = arith.constant 0 : i32
    %c0_i32_0 = arith.constant 0 : i32
    %c0_i32_1 = arith.constant 0 : i32
    %c0_i32_2 = arith.constant 0 : i32
    return %c0_i32, %c0_i32_0, %c0_i32_1 : i32, i32, i32
  }
  func.func @transform_3(%arg0: i32) -> (i32, i32) {
    %c0_i32 = arith.constant 0 : i32
    %c0_i32_0 = arith.constant 0 : i32
    %c0_i32_1 = arith.constant 0 : i32
    return %c0_i32, %c0_i32_0 : i32, i32
  }
  func.func @transform_4(%arg0: i32) -> (i32, i32, i32) {
    %c0_i32 = arith.constant 0 : i32
    %c0_i32_0 = arith.constant 0 : i32
    %c0_i32_1 = arith.constant 0 : i32
    %c0_i32_2 = arith.constant 0 : i32
    return %c0_i32, %c0_i32_0, %c0_i32_1 : i32, i32, i32
  }
  func.func @transform_5(%arg0: i32) -> (i32, i32, i32) {
    %c0_i32 = arith.constant 0 : i32
    %c0_i32_0 = arith.constant 0 : i32
    %c0_i32_1 = arith.constant 0 : i32
    %c0_i32_2 = arith.constant 0 : i32
    return %c0_i32, %c0_i32_0, %c0_i32_1 : i32, i32, i32
  }
  func.func @transform_6(%arg0: i32) -> (i32, i32) {
    %c0_i32 = arith.constant 0 : i32
    %c0_i32_0 = arith.constant 0 : i32
    %c0_i32_1 = arith.constant 0 : i32
    return %c0_i32, %c0_i32_0 : i32, i32
  }
  func.func @transform_7(%arg0: i32) -> (i32, i32, i32) {
    %c0_i32 = arith.constant 0 : i32
    %c0_i32_0 = arith.constant 0 : i32
    %c0_i32_1 = arith.constant 0 : i32
    %c0_i32_2 = arith.constant 0 : i32
    return %c0_i32, %c0_i32_0, %c0_i32_1 : i32, i32, i32
  }
  func.func @transform_8(%arg0: i32) -> (i32, i32) {
    %c0_i32 = arith.constant 0 : i32
    %c0_i32_0 = arith.constant 0 : i32
    %c0_i32_1 = arith.constant 0 : i32
    return %c0_i32, %c0_i32_0 : i32, i32
  }
  func.func @transform_9(%arg0: i32) -> (i32, i32) {
    %c0_i32 = arith.constant 0 : i32
    %c0_i32_0 = arith.constant 0 : i32
    %c0_i32_1 = arith.constant 0 : i32
    return %c0_i32, %c0_i32_0 : i32, i32
  }
  func.func @transform_10(%arg0: i32) -> (i32, i32) {
    %c0_i32 = arith.constant 0 : i32
    %c0_i32_0 = arith.constant 0 : i32
    %c0_i32_1 = arith.constant 0 : i32
    return %c0_i32, %c0_i32_0 : i32, i32
  }
  func.func @transform_11(%arg0: i32) -> (i32, i32) {
    %c0_i32 = arith.constant 0 : i32
    %c0_i32_0 = arith.constant 0 : i32
    %c0_i32_1 = arith.constant 0 : i32
    return %c0_i32, %c0_i32_0 : i32, i32
  }
  func.func @transform_12(%arg0: i32) -> (i32, i32) {
    %c0_i32 = arith.constant 0 : i32
    %c0_i32_0 = arith.constant 0 : i32
    %c0_i32_1 = arith.constant 0 : i32
    return %c0_i32, %c0_i32_0 : i32, i32
  }
  func.func @transform_13(%arg0: i32) -> (i32, i32) {
    %c0_i32 = arith.constant 0 : i32
    %c0_i32_0 = arith.constant 0 : i32
    return %arg0, %c0_i32 : i32, i32
  }
}

</mosaic_0001>

<bundles_post_ra>
// kernel: net_forward.1
= control target key start
LH: loop header
LB: loop body
LE: loop exit
PB: predicated region body
PF: predicated region fallthrough
CT: control target
= control target key end

     0   :  { %s12515_s25 = smov 0   ;;  %s12517_s26 = smov 0   ;;  %s15228_s0 = inlined_call_operand.vmem [shape: bf16[32,32,128], index: 0, kind: input, shape index: {}]   ;;  %s15229_s1 = inlined_call_operand.vmem [shape: bf16[5,128,128], index: 1, kind: input, shape index: {}]   ;;  %s15230_s2 = inlined_call_operand.vmem [shape: bf16[5,128,128], index: 2, kind: input, shape index: {}]   ;;  %s15231_s3 = inlined_call_operand.vmem [shape: f32[1,128], index: 3, kind: input, shape index: {}]   ;;  %s15232_s4 = inlined_call_operand.vmem [shape: bf16[5,128,128], index: 4, kind: input, shape index: {}]   ;;  %s15233_s5 = inlined_call_operand.vmem [shape: bf16[5,128,128], index: 5, kind: input, shape index: {}]   ;;  %s15234_s6 = inlined_call_operand.vmem [shape: f32[1,128], index: 6, kind: input, shape index: {}]   ;;  %s15235_s7 = inlined_call_operand.vmem [shape: bf16[5,128,128], index: 7, kind: input, shape index: {}]   ;;  %s15236_s8 = inlined_call_operand.vmem [shape: f32[1,128], index: 8, kind: input, shape index: {}]   ;;  %s15237_s9 = inlined_call_operand.vmem [shape: bf16[128,128], index: 9, kind: input, shape index: {}]   ;;  %s15238_s10 = inlined_call_operand.vmem [shape: f32[1,128], index: 10, kind: input, shape index: {}]   ;;  %s15239_s11 = inlined_call_operand.vmem [shape: bf16[128,128], index: 11, kind: input, shape index: {}]   ;;  %s15240_s12 = inlined_call_operand.vmem [shape: f32[1,128], index: 12, kind: input, shape index: {}]   ;;  %s15241_s13 = inlined_call_operand.vmem [shape: f32[32,128], index: 13, kind: output, shape index: {}]  }
   0x1   :  { %s12519_s27 = smov 0  }
   0x2 LB: > { %s8996_s28 = sadd.s32 4294967295, %s12441_s27   ;;  %s12532_s29 = sadd.s32 1, %s12441_s27   ;;  %s12441_s27 = sphi %s12519_s27, %s15692_s27   ;;  %s12437_s26 = sphi %s12517_s26, %s15691_s26   ;;  %s12433_s25 = sphi %s12515_s25, %s15690_s25  }
   0x3   : > { %s27_s30 = ssub.s32 %s12441_s27, %s12532_s29  ;;  %s30_s14 = sadd.s32 1, %s12437_s26 }
   0x4   : > { %p28_p0 = scmp.eq.s32.totalorder %s27_s30, 0  ;;  %p37_p1 = scmp.ne.s32.totalorder %s12437_s26, %s12433_s25 }
   0x5   : > { %p38_p2 = scmp.eq.s32.totalorder %s12441_s27, 0  ;;  %p8999_p4 = scmp.ge.s32.totalorder %s12441_s27, 2 }
   0x6   : > { %s12541_s15 = scalar_select %p28_p0, %s12437_s26, %s30_s14  }
   0x7   : > { %p39_p3 = por %p38_p2, %p37_p1  ;;  %377 = sbr.rel (%p8999_p4) target bundleno = 32 (0x20), region = 64 }
   0xc   : > { %380 = sbr.rel (!%p39_p3) target bundleno = 32 (0x20), region = 68  ;;  %s382_s16 = sand.u32 (%p39_p3), 1, %s12437_s26  }
   0xd   : > { %s10007_s17 = sshll.u32 (%p39_p3), %s12441_s27, 3  ;;  %s9000_s18 = sshll.u32 (%p39_p3), %s382_s16, 8 }
   0xe   : > { %s12549_s21 = scalar_lea.vmem (%p39_p3), %s15228_s0, %s10007_s17  ;;  %s12554_s22 = scalar_lea.vmem (%p39_p3), [#allocation4], %s9000_s18 }
   0xf   : > { %v404_v0 = vld [vmem:[%s12549_s21] sm:$0xff] (%p39_p3)   ;;  %v408_v1 = vld [vmem:[%s12549_s21 + $0x10] sm:$0xff] (%p39_p3)  }
  0x10   : > { %v412_v2 = vld [vmem:[%s12549_s21 + $0x20] sm:$0xff] (%p39_p3)   ;;  %405 = vst [vmem:[%s12554_s22] sm:$0xff] (%p39_p3), %v404_v0   ;;  %409 = vst [vmem:[%s12554_s22 + $0x8] sm:$0xff] (%p39_p3), %v408_v1   ;;  %v416_v3 = vld [vmem:[%s12549_s21 + $0x30] sm:$0xff] (%p39_p3)  }
  0x11   : > { %413 = vst [vmem:[%s12554_s22 + $0x10] sm:$0xff] %v412_v2   ;;  %v420_v4 = vld [vmem:[%s12549_s21 + $0x40] sm:$0xff]   ;;  %v424_v5 = vld [vmem:[%s12549_s21 + $0x50] sm:$0xff]   ;;  %417 = vst [vmem:[%s12554_s22 + $0x18] sm:$0xff] %v416_v3  }
  0x12   : > { %421 = vst [vmem:[%s12554_s22 + $0x20] sm:$0xff] %v420_v4   ;;  %425 = vst [vmem:[%s12554_s22 + $0x28] sm:$0xff] %v424_v5   ;;  %v428_v6 = vld [vmem:[%s12549_s21 + $0x60] sm:$0xff]   ;;  %v432_v7 = vld [vmem:[%s12549_s21 + $0x70] sm:$0xff]  }
  0x13   : > { %v436_v8 = vld [vmem:[%s12549_s21 + $0x80] sm:$0xff]   ;;  %429 = vst [vmem:[%s12554_s22 + $0x30] sm:$0xff] %v428_v6   ;;  %433 = vst [vmem:[%s12554_s22 + $0x38] sm:$0xff] %v432_v7   ;;  %v440_v9 = vld [vmem:[%s12549_s21 + $0x90] sm:$0xff]  }
  0x14   : > { %437 = vst [vmem:[%s12554_s22 + $0x40] sm:$0xff] %v436_v8   ;;  %v444_v10 = vld [vmem:[%s12549_s21 + $0xa0] sm:$0xff]   ;;  %v448_v11 = vld [vmem:[%s12549_s21 + $0xb0] sm:$0xff]   ;;  %441 = vst [vmem:[%s12554_s22 + $0x48] sm:$0xff] %v440_v9  }
  0x15   : > { %445 = vst [vmem:[%s12554_s22 + $0x50] sm:$0xff] %v444_v10   ;;  %449 = vst [vmem:[%s12554_s22 + $0x58] sm:$0xff] %v448_v11   ;;  %v452_v12 = vld [vmem:[%s12549_s21 + $0xc0] sm:$0xff]   ;;  %v456_v13 = vld [vmem:[%s12549_s21 + $0xd0] sm:$0xff]  }
  0x16   : > { %v460_v14 = vld [vmem:[%s12549_s21 + $0xe0] sm:$0xff]   ;;  %453 = vst [vmem:[%s12554_s22 + $0x60] sm:$0xff] %v452_v12   ;;  %457 = vst [vmem:[%s12554_s22 + $0x68] sm:$0xff] %v456_v13   ;;  %v464_v15 = vld [vmem:[%s12549_s21 + $0xf0] sm:$0xff]  }
  0x17   : > { %461 = vst [vmem:[%s12554_s22 + $0x70] sm:$0xff] %v460_v14   ;;  %v468_v16 = vld [vmem:[%s12549_s21 + $0x100] sm:$0xff]   ;;  %v472_v17 = vld [vmem:[%s12549_s21 + $0x110] sm:$0xff]   ;;  %465 = vst [vmem:[%s12554_s22 + $0x78] sm:$0xff] %v464_v15  }
  0x18   : > { %469 = vst [vmem:[%s12554_s22 + $0x80] sm:$0xff] %v468_v16   ;;  %473 = vst [vmem:[%s12554_s22 + $0x88] sm:$0xff] %v472_v17   ;;  %v476_v18 = vld [vmem:[%s12549_s21 + $0x120] sm:$0xff]   ;;  %v480_v19 = vld [vmem:[%s12549_s21 + $0x130] sm:$0xff]  }
  0x19   : > { %v484_v20 = vld [vmem:[%s12549_s21 + $0x140] sm:$0xff]   ;;  %477 = vst [vmem:[%s12554_s22 + $0x90] sm:$0xff] %v476_v18   ;;  %481 = vst [vmem:[%s12554_s22 + $0x98] sm:$0xff] %v480_v19   ;;  %v488_v21 = vld [vmem:[%s12549_s21 + $0x150] sm:$0xff]  }
  0x1a   : > { %485 = vst [vmem:[%s12554_s22 + $0xa0] sm:$0xff] %v484_v20   ;;  %v492_v22 = vld [vmem:[%s12549_s21 + $0x160] sm:$0xff]   ;;  %v496_v23 = vld [vmem:[%s12549_s21 + $0x170] sm:$0xff]   ;;  %489 = vst [vmem:[%s12554_s22 + $0xa8] sm:$0xff] %v488_v21  }
  0x1b   : > { %493 = vst [vmem:[%s12554_s22 + $0xb0] sm:$0xff] %v492_v22   ;;  %497 = vst [vmem:[%s12554_s22 + $0xb8] sm:$0xff] %v496_v23   ;;  %v500_v24 = vld [vmem:[%s12549_s21 + $0x180] sm:$0xff]   ;;  %v504_v25 = vld [vmem:[%s12549_s21 + $0x190] sm:$0xff]  }
  0x1c   : > { %v508_v26 = vld [vmem:[%s12549_s21 + $0x1a0] sm:$0xff]   ;;  %501 = vst [vmem:[%s12554_s22 + $0xc0] sm:$0xff] %v500_v24   ;;  %505 = vst [vmem:[%s12554_s22 + $0xc8] sm:$0xff] %v504_v25   ;;  %v512_v27 = vld [vmem:[%s12549_s21 + $0x1b0] sm:$0xff]  }
  0x1d   : > { %509 = vst [vmem:[%s12554_s22 + $0xd0] sm:$0xff] %v508_v26   ;;  %v516_v28 = vld [vmem:[%s12549_s21 + $0x1c0] sm:$0xff]   ;;  %v520_v29 = vld [vmem:[%s12549_s21 + $0x1d0] sm:$0xff]   ;;  %513 = vst [vmem:[%s12554_s22 + $0xd8] sm:$0xff] %v512_v27  }
  0x1e   : > { %517 = vst [vmem:[%s12554_s22 + $0xe0] sm:$0xff] %v516_v28   ;;  %521 = vst [vmem:[%s12554_s22 + $0xe8] sm:$0xff] %v520_v29   ;;  %v524_v30 = vld [vmem:[%s12549_s21 + $0x1e0] sm:$0xff]   ;;  %v528_v31 = vld [vmem:[%s12549_s21 + $0x1f0] sm:$0xff]  }
  0x1f   : > { %525 = vst [vmem:[%s12554_s22 + $0xf0] sm:$0xff] %v524_v30   ;;  %529 = vst [vmem:[%s12554_s22 + $0xf8] sm:$0xff] %v528_v31  }
  0x20 PF: > { %p9003_p5 = scmp.ge.s32.totalorder %s12441_s27, 1  ;;  %p682_p6 = scmp.lt.s32.totalorder %s12441_s27, 3 }
  0x22   : > { %p683_p7 = pnand %p9003_p5, %p682_p6 }
  0x24   : > { %686 = sbr.rel (%p683_p7) target bundleno = 1849 (0x739), region = 109 }
  0x29   : > { %v12007_v32 = vld [vmem:[%s15229_s1 + $0x78] sm:$0xff]   ;;  %v12009_v34 = vld [vmem:[%s15229_s1 + $0x70] sm:$0xff]   ;;  %v12011_v36 = vld [vmem:[%s15229_s1 + $0x68] sm:$0xff]   ;;  %s689_s24 = sand.u32 1, %s12433_s25   ;;  %vm12444_vm0 = vmmov 0   ;;  %s9005_s17 = sshll.u32 %s8996_s28, 1 }
  0x2a   : > { %v12008_v33 = vld [vmem:[%s15229_s1 + $0x38] sm:$0xff]   ;;  %10761 = vmatprep.subr.bf16.mxu0 %v12007_v32  ;;  %v12010_v35 = vld [vmem:[%s15229_s1 + $0x30] sm:$0xff]   ;;  %v12012_v37 = vld [vmem:[%s15229_s1 + $0x28] sm:$0xff]   ;;  %s9004_s18 = sshll.u32 %s689_s24, 8  ;;  %p734_p8 = scmp.lt.s32.totalorder %s9005_s17, 3 }
  0x2b   : > { %10833 = vmatprep.subr.bf16.mxu1 %v12008_v33  ;;  %10762 = vmatpush3.bf16.msra.mxu0 %v12007_v32  ;;  %v12013_v38 = vld [vmem:[%s15229_s1 + $0x60] sm:$0xff]   ;;  %v12015_v40 = vld [vmem:[%s15229_s1 + $0x58] sm:$0xff]   ;;  %v12017_v42 = vld [vmem:[%s15229_s1 + $0x50] sm:$0xff]   ;;  %s12656_s24 = scalar_lea.vmem [#allocation4], %s9004_s18 }
  0x2c   : > { %10834 = vmatpush3.bf16.msra.mxu1 %v12008_v33  ;;  %10763 = vmatprep.subr.bf16.mxu0 %v12009_v34  ;;  %v12014_v39 = vld [vmem:[%s15229_s1 + $0x20] sm:$0xff]   ;;  %v12016_v41 = vld [vmem:[%s15229_s1 + $0x18] sm:$0xff]   ;;  %v12018_v43 = vld [vmem:[%s15229_s1 + $0x10] sm:$0xff]   ;;  %s15694_s17 = smov (!%p734_p8, %s9005_s17), 3 }
  0x2d   : > { %10835 = vmatprep.subr.bf16.mxu1 %v12010_v35  ;;  %v12659_v44 = vld [vmem:[%s12656_s24 + $0x8] sm:$0xff]   ;;  %v12662_v45 = vld [vmem:[%s12656_s24] sm:$0xff]   ;;  %v12019_v46 = vld [vmem:[%s15229_s1 + $0x48] sm:$0xff]   ;;  %s9006_s18 = sshll.u32 %s15694_s17, 3 }
  0x2e   : > { %10777 = vmatprep.mubr.bf16.mxu0 %v12659_v44  ;;  %10849 = vmatprep.mubr.bf16.mxu1 %v12662_v45  ;;  %v12020_v47 = vld [vmem:[%s15229_s1 + $0x8] sm:$0xff]   ;;  %v12021_v48 = vld [vmem:[%s15229_s1 + $0x40] sm:$0xff]   ;;  %v12027_v51 = vld [vmem:[%s15230_s2 + $0x78] sm:$0xff]   ;;  %s737_s21 = scalar_lea.vmem %s15241_s13, %s9006_s18 }
  0x2f   : > { %10764 = vmatpush3.bf16.msra.mxu0 %v12009_v34  ;;  %v12022_v49 = vld [vmem:[%s15229_s1] sm:$0xff]   ;;  %v12679_v50 = vld [vmem:[%s12656_s24 + $0x10] sm:$0xff]   ;;  %v12028_v52 = vld [vmem:[%s15230_s2 + $0x38] sm:$0xff]  }
  0x30   : > { %10836 = vmatpush3.bf16.msra.mxu1 %v12010_v35  ;;  %10765 = vmatprep.subr.bf16.mxu0 %v12011_v36  ;;  %v12688_v53 = vld [vmem:[%s12656_s24 + $0x8] sm:$0xff]   ;;  %v12691_v54 = vld [vmem:[%s12656_s24 + $0x18] sm:$0xff]   ;;  %v12694_v55 = vld [vmem:[%s12656_s24 + $0x10] sm:$0xff]  }
  0x31   : > { %10837 = vmatprep.subr.bf16.mxu1 %v12012_v37  ;;  %v12033_v56 = vld [vmem:[%s15230_s2 + $0x70] sm:$0xff]   ;;  %v12706_v58 = vld [vmem:[%s12656_s24 + $0x20] sm:$0xff]   ;;  %v12043_v59 = vld [vmem:[%s15230_s2 + $0x68] sm:$0xff]  }
  0x32   : > { %v12034_v57 = vld [vmem:[%s15230_s2 + $0x30] sm:$0xff]   ;;  %v12044_v60 = vld [vmem:[%s15230_s2 + $0x28] sm:$0xff]   ;;  %v12719_v62 = vld [vmem:[%s12656_s24 + $0x28] sm:$0xff]  }
  0x33   : > { %10766 = vmatpush3.bf16.msra.mxu0 %v12011_v36  ;;  %v12716_v61 = vld [vmem:[%s12656_s24 + $0x18] sm:$0xff]   ;;  %v12722_v63 = vld [vmem:[%s12656_s24 + $0x20] sm:$0xff]   ;;  %v12729_v0 = vld [vmem:[%s12656_s24 + $0x30] sm:$0xff]  }
  0x34   : > { %10838 = vmatpush3.bf16.msra.mxu1 %v12012_v37  ;;  %10767 = vmatprep.subr.bf16.mxu0 %v12013_v38  ;;  %v12732_v1 = vld [vmem:[%s12656_s24 + $0x28] sm:$0xff]   ;;  %v12735_v2 = vld [vmem:[%s12656_s24 + $0x38] sm:$0xff]   ;;  %v12744_v5 = vld [vmem:[%s12656_s24 + $0x30] sm:$0xff]  }
  0x35   : > { %10839 = vmatprep.subr.bf16.mxu1 %v12014_v39  ;;  %v12053_v3 = vld [vmem:[%s15230_s2 + $0x60] sm:$0xff]   ;;  %v12751_v6 = vld [vmem:[%s12656_s24 + $0x40] sm:$0xff]   ;;  %v12754_v7 = vld [vmem:[%s12656_s24 + $0x38] sm:$0xff]  }
  0x36   : > { %v12054_v4 = vld [vmem:[%s15230_s2 + $0x20] sm:$0xff]   ;;  %v12760_v9 = vld [vmem:[%s12656_s24 + $0x40] sm:$0xff]   ;;  %v12773_v12 = vld [vmem:[%s12656_s24 + $0x50] sm:$0xff]  }
  0x37   : > { %10768 = vmatpush3.bf16.msra.mxu0 %v12013_v38  ;;  %v12757_v8 = vld [vmem:[%s12656_s24 + $0x48] sm:$0xff]   ;;  %v12063_v10 = vld [vmem:[%s15230_s2 + $0x58] sm:$0xff]   ;;  %v12779_v14 = vld [vmem:[%s12656_s24 + $0x58] sm:$0xff]  }
  0x38   : > { %10840 = vmatpush3.bf16.msra.mxu1 %v12014_v39  ;;  %10769 = vmatprep.subr.bf16.mxu0 %v12015_v40  ;;  %v12064_v11 = vld [vmem:[%s15230_s2 + $0x18] sm:$0xff]   ;;  %v12776_v13 = vld [vmem:[%s12656_s24 + $0x48] sm:$0xff]   ;;  %v12069_v15 = vld [vmem:[%s15230_s2 + $0x50] sm:$0xff]  }
  0x39   : > { %10841 = vmatprep.subr.bf16.mxu1 %v12016_v41  ;;  %v12070_v16 = vld [vmem:[%s15230_s2 + $0x10] sm:$0xff]   ;;  %v12788_v17 = vld [vmem:[%s12656_s24 + $0x50] sm:$0xff]   ;;  %v12795_v18 = vld [vmem:[%s12656_s24 + $0x60] sm:$0xff]  }
  0x3a   : > { %v12798_v19 = vld [vmem:[%s12656_s24 + $0x58] sm:$0xff]   ;;  %v12801_v20 = vld [vmem:[%s12656_s24 + $0x68] sm:$0xff]   ;;  %v12804_v21 = vld [vmem:[%s12656_s24 + $0x60] sm:$0xff]  }
  0x3b   : > { %10770 = vmatpush3.bf16.msra.mxu0 %v12015_v40  ;;  %v12079_v22 = vld [vmem:[%s15230_s2 + $0x48] sm:$0xff]   ;;  %v12820_v25 = vld [vmem:[%s12656_s24 + $0x68] sm:$0xff]   ;;  %v12823_v26 = vld [vmem:[%s12656_s24 + $0x78] sm:$0xff]  }
  0x3c   : > { %10842 = vmatpush3.bf16.msra.mxu1 %v12016_v41  ;;  %10771 = vmatprep.subr.bf16.mxu0 %v12017_v42  ;;  %v12080_v23 = vld [vmem:[%s15230_s2 + $0x8] sm:$0xff]   ;;  %v12089_v28 = vld [vmem:[%s15230_s2 + $0x40] sm:$0xff]   ;;  %v12839_v30 = vld [vmem:[%s12656_s24 + $0x80] sm:$0xff]  }
  0x3d   : > { %10843 = vmatprep.subr.bf16.mxu1 %v12018_v43  ;;  %v12817_v24 = vld [vmem:[%s12656_s24 + $0x70] sm:$0xff]   ;;  %v12090_v29 = vld [vmem:[%s15230_s2] sm:$0xff]   ;;  %v12842_v31 = vld [vmem:[%s12656_s24 + $0x78] sm:$0xff]  }
  0x3e   : > { %v12826_v27 = vld [vmem:[%s12656_s24 + $0x70] sm:$0xff]   ;;  %v12845_v32 = vld [vmem:[%s12656_s24 + $0x88] sm:$0xff]   ;;  %v12848_v33 = vld [vmem:[%s12656_s24 + $0x80] sm:$0xff]  }
  0x3f   : > { %10772 = vmatpush3.bf16.msra.mxu0 %v12017_v42  ;;  %v12095_v34 = vld [vmem:[%s15229_s1 + $0xb8] sm:$0xff]   ;;  %v12861_v36 = vld [vmem:[%s12656_s24 + $0x90] sm:$0xff]   ;;  %v12864_v37 = vld [vmem:[%s12656_s24 + $0x88] sm:$0xff]  }
  0x40   : > { %10844 = vmatpush3.bf16.msra.mxu1 %v12018_v43  ;;  %10773 = vmatprep.subr.bf16.mxu0 %v12019_v46  ;;  %v12096_v35 = vld [vmem:[%s15230_s2 + $0xb8] sm:$0xff]   ;;  %v12867_v38 = vld [vmem:[%s12656_s24 + $0x98] sm:$0xff]   ;;  %v12870_v39 = vld [vmem:[%s12656_s24 + $0x90] sm:$0xff]  }
  0x41   : > { %10845 = vmatprep.subr.bf16.mxu1 %v12020_v47  ;;  %v12877_v40 = vld [vmem:[%s12656_s24 + $0xa0] sm:$0xff]   ;;  %v12880_v41 = vld [vmem:[%s12656_s24 + $0x98] sm:$0xff]   ;;  %v12883_v42 = vld [vmem:[%s12656_s24 + $0xa8] sm:$0xff]  }
  0x42   : > { %v12886_v43 = vld [vmem:[%s12656_s24 + $0xa0] sm:$0xff]  }
  0x43   : > { %10774 = vmatpush3.bf16.msra.mxu0 %v12019_v46  ;;  %v12893_v46 = vld [vmem:[%s12656_s24 + $0xb0] sm:$0xff]  }
  0x44   : > { %10846 = vmatpush3.bf16.msra.mxu1 %v12020_v47  ;;  %10775 = vmatprep.subr.bf16.mxu0 %v12021_v48  ;;  %v12896_v47 = vld [vmem:[%s12656_s24 + $0xa8] sm:$0xff]  }
  0x45   : > { %10847 = vmatprep.subr.bf16.mxu1 %v12022_v49 }
  0x47   : > { %10776 = vmatpush3.bf16.msra.mxu0 %v12021_v48  ;;  %v12899_v48 = vld [vmem:[%s12656_s24 + $0xb8] sm:$0xff]  }
  0x48   : > { %10848 = vmatpush3.bf16.msra.mxu1 %v12022_v49  ;;  %10905 = vmatprep.subr.bf16.mxu0 %v12027_v51  ;;  %v12902_v49 = vld [vmem:[%s12656_s24 + $0xb0] sm:$0xff]  }
  0x49   : > { %10977 = vmatprep.subr.bf16.mxu1 %v12028_v52 }
  0x4a   : > { %10778 = vmatmul.mubr.bf16.vlgmr.msra.gmra.mxu0 %v12679_v50 }
  0x4b   : > { %10850 = vmatmul.mubr.bf16.vlgmr.msra.gmra.mxu1 %v12688_v53  ;;  %10906 = vmatpush3.bf16.msra.mxu0 %v12027_v51  ;;  %v12909_v51 = vld [vmem:[%s12656_s24 + $0xc0] sm:$0xff]  }
  0x4c   : > { %10978 = vmatpush3.bf16.msra.mxu1 %v12028_v52  ;;  %10781 = vmatprep.mubr.bf16.mxu0 %v12691_v54  ;;  %v12912_v52 = vld [vmem:[%s12656_s24 + $0xb8] sm:$0xff]  }
  0x4d   : > { %10853 = vmatprep.mubr.bf16.mxu1 %v12694_v55  ;;  %10907 = vmatprep.subr.bf16.mxu0 %v12033_v56 }
  0x4e   : > { %10979 = vmatprep.subr.bf16.mxu1 %v12034_v57 }
  0x4f   : > { %10908 = vmatpush3.bf16.msra.mxu0 %v12033_v56  ;;  %v12915_v56 = vld [vmem:[%s12656_s24 + $0xc8] sm:$0xff]  }
  0x50   : > { %10980 = vmatpush3.bf16.msra.mxu1 %v12034_v57  ;;  %10909 = vmatprep.subr.bf16.mxu0 %v12043_v59  ;;  %v12918_v57 = vld [vmem:[%s12656_s24 + $0xc0] sm:$0xff]  }
  0x51   : > { %10981 = vmatprep.subr.bf16.mxu1 %v12044_v60 }
  0x52   : > { %10782 = vmatmul.mubr.bf16.gmra.mxu0 %v12706_v58 }
  0x53   : > { %10854 = vmatmul.mubr.bf16.gmra.mxu1 %v12716_v61  ;;  %10785 = vmatprep.mubr.bf16.mxu0 %v12719_v62 }
  0x54   : > { %10857 = vmatprep.mubr.bf16.mxu1 %v12722_v63  ;;  %10910 = vmatpush3.bf16.msra.mxu0 %v12043_v59  ;;  %v12925_v59 = vld [vmem:[%s12656_s24 + $0xd0] sm:$0xff]  }
  0x55   : > { %10982 = vmatpush3.bf16.msra.mxu1 %v12044_v60  ;;  %10911 = vmatprep.subr.bf16.mxu0 %v12053_v3  ;;  %v12928_v60 = vld [vmem:[%s12656_s24 + $0xc8] sm:$0xff]  }
  0x56   : > { %10983 = vmatprep.subr.bf16.mxu1 %v12054_v4 }
  0x58   : > { %10912 = vmatpush3.bf16.msra.mxu0 %v12053_v3  ;;  %v12931_v3 = vld [vmem:[%s12656_s24 + $0xd8] sm:$0xff]  }
  0x59   : > { %10984 = vmatpush3.bf16.msra.mxu1 %v12054_v4  ;;  %10913 = vmatprep.subr.bf16.mxu0 %v12063_v10  ;;  %v12934_v4 = vld [vmem:[%s12656_s24 + $0xd0] sm:$0xff]  }
  0x5a   : > { %10786 = vmatmul.mubr.bf16.gmra.mxu0 %v12729_v0  ;;  %10985 = vmatprep.subr.bf16.mxu1 %v12064_v11 }
  0x5b   : > { %10858 = vmatmul.mubr.bf16.gmra.mxu1 %v12732_v1  ;;  %10789 = vmatprep.mubr.bf16.mxu0 %v12735_v2 }
  0x5c   : > { %10861 = vmatprep.mubr.bf16.mxu1 %v12744_v5  ;;  %10914 = vmatpush3.bf16.msra.mxu0 %v12063_v10  ;;  %v12941_v10 = vld [vmem:[%s12656_s24 + $0xe0] sm:$0xff]  }
  0x5d   : > { %10986 = vmatpush3.bf16.msra.mxu1 %v12064_v11  ;;  %10915 = vmatprep.subr.bf16.mxu0 %v12069_v15  ;;  %v12944_v11 = vld [vmem:[%s12656_s24 + $0xd8] sm:$0xff]  }
  0x5e   : > { %10987 = vmatprep.subr.bf16.mxu1 %v12070_v16 }
  0x60   : > { %10916 = vmatpush3.bf16.msra.mxu0 %v12069_v15  ;;  %v12097_v15 = vld [vmem:[%s15229_s1 + $0xb0] sm:$0xff]  }
  0x61   : > { %10988 = vmatpush3.bf16.msra.mxu1 %v12070_v16  ;;  %10917 = vmatprep.subr.bf16.mxu0 %v12079_v22  ;;  %v12098_v16 = vld [vmem:[%s15230_s2 + $0xb0] sm:$0xff]  }
  0x62   : > { %10790 = vmatmul.mubr.bf16.gmra.mxu0 %v12751_v6  ;;  %10989 = vmatprep.subr.bf16.mxu1 %v12080_v23 }
  0x63   : > { %10862 = vmatmul.mubr.bf16.gmra.mxu1 %v12754_v7  ;;  %10793 = vmatprep.mubr.bf16.mxu0 %v12757_v8 }
  0x64   : > { %10865 = vmatprep.mubr.bf16.mxu1 %v12760_v9  ;;  %10918 = vmatpush3.bf16.msra.mxu0 %v12079_v22  ;;  %v12099_v22 = vld [vmem:[%s15229_s1 + $0xa8] sm:$0xff]  }
  0x65   : > { %10990 = vmatpush3.bf16.msra.mxu1 %v12080_v23  ;;  %10919 = vmatprep.subr.bf16.mxu0 %v12089_v28 }
  0x66   : > { %10991 = vmatprep.subr.bf16.mxu1 %v12090_v29 }
  0x68   : > { %10920 = vmatpush3.bf16.msra.mxu0 %v12089_v28 }
  0x69   : > { %10992 = vmatpush3.bf16.msra.mxu1 %v12090_v29  ;;  %11049 = vmatprep.subr.bf16.mxu0 %v12095_v34 }
  0x6a   : > { %10794 = vmatmul.mubr.bf16.gmra.mxu0 %v12773_v12  ;;  %11121 = vmatprep.subr.bf16.mxu1 %v12096_v35 }
  0x6b   : > { %10866 = vmatmul.mubr.bf16.gmra.mxu1 %v12776_v13  ;;  %10797 = vmatprep.mubr.bf16.mxu0 %v12779_v14 }
  0x6c   : > { %10869 = vmatprep.mubr.bf16.mxu1 %v12788_v17 }
  0x72   : > { %10798 = vmatmul.mubr.bf16.gmra.mxu0 %v12795_v18 }
  0x73   : > { %10870 = vmatmul.mubr.bf16.gmra.mxu1 %v12798_v19  ;;  %10801 = vmatprep.mubr.bf16.mxu0 %v12801_v20 }
  0x74   : > { %10873 = vmatprep.mubr.bf16.mxu1 %v12804_v21 }
  0x7a   : > { %10802 = vmatmul.mubr.bf16.gmra.mxu0 %v12817_v24 }
  0x7b   : > { %10874 = vmatmul.mubr.bf16.gmra.mxu1 %v12820_v25  ;;  %10805 = vmatprep.mubr.bf16.mxu0 %v12823_v26 }
  0x7c   : > { %10877 = vmatprep.mubr.bf16.mxu1 %v12826_v27 }
  0x82   : > { %10806 = vmatmul.mubr.bf16.gmra.mxu0 %v12839_v30 }
  0x83   : > { %10878 = vmatmul.mubr.bf16.gmra.mxu1 %v12842_v31  ;;  %10809 = vmatprep.mubr.bf16.mxu0 %v12845_v32 }
  0x84   : > { %10881 = vmatprep.mubr.bf16.mxu1 %v12848_v33 }
  0x8a   : > { %10810 = vmatmul.mubr.bf16.gmra.mxu0 %v12861_v36 }
  0x8b   : > { %10882 = vmatmul.mubr.bf16.gmra.mxu1 %v12864_v37  ;;  %10813 = vmatprep.mubr.bf16.mxu0 %v12867_v38 }
  0x8c   : > { %10885 = vmatprep.mubr.bf16.mxu1 %v12870_v39 }
  0x92   : > { %10814 = vmatmul.mubr.bf16.gmra.mxu0 %v12877_v40 }
  0x93   : > { %10886 = vmatmul.mubr.bf16.gmra.mxu1 %v12880_v41  ;;  %10817 = vmatprep.mubr.bf16.mxu0 %v12883_v42 }
  0x94   : > { %10889 = vmatprep.mubr.bf16.mxu1 %v12886_v43 }
  0x9a   : > { %10818 = vmatmul.mubr.bf16.gmra.mxu0 %v12893_v46 }
  0x9b   : > { %10890 = vmatmul.mubr.bf16.gmra.mxu1 %v12896_v47  ;;  %10821 = vmatprep.mubr.bf16.mxu0 %v12899_v48 }
  0x9c   : > { %10893 = vmatprep.mubr.bf16.mxu1 %v12902_v49 }
  0xa2   : > { %10822 = vmatmul.mubr.bf16.gmra.mxu0 %v12909_v51 }
  0xa3   : > { %10894 = vmatmul.mubr.bf16.gmra.mxu1 %v12912_v52  ;;  %10825 = vmatprep.mubr.bf16.mxu0 %v12915_v56 }
  0xa4   : > { %10897 = vmatprep.mubr.bf16.mxu1 %v12918_v57 }
  0xaa   : > { %10826 = vmatmul.mubr.bf16.gmra.mxu0 %v12925_v59 }
  0xab   : > { %10898 = vmatmul.mubr.bf16.gmra.mxu1 %v12928_v60  ;;  %10829 = vmatprep.mubr.bf16.mxu0 %v12931_v3 }
  0xac   : > { %10901 = vmatprep.mubr.bf16.mxu1 %v12934_v4 }
  0xb2   : > { %10830 = vmatmul.mubr.bf16.gmra.mxu0 %v12941_v10 }
  0xb3   : > { %10902 = vmatmul.mubr.bf16.gmra.mxu1 %v12944_v11  ;;  %10921 = vmatprep.mubr.bf16.mxu0 %v12659_v44  ;;  %v12100_v44 = vld [vmem:[%s15230_s2 + $0xa8] sm:$0xff]  }
  0xb4   : > { %10993 = vmatprep.mubr.bf16.mxu1 %v12662_v45  ;;  %v12101_v45 = vld [vmem:[%s15229_s1 + $0xa0] sm:$0xff]  }
  0xba   : > { %10922 = vmatmul.mubr.bf16.vlgmr.msra.gmra.mxu0 %v12679_v50  ;;  %v12102_v50 = vld [vmem:[%s15230_s2 + $0xa0] sm:$0xff]  }
  0xbb   : > { %10994 = vmatmul.mubr.bf16.vlgmr.msra.gmra.mxu1 %v12688_v53  ;;  %11050 = vmatpush3.bf16.msra.mxu0 %v12095_v34  ;;  %v12103_v53 = vld [vmem:[%s15229_s1 + $0x98] sm:$0xff]  }
  0xbc   : > { %11122 = vmatpush3.bf16.msra.mxu1 %v12096_v35  ;;  %10925 = vmatprep.mubr.bf16.mxu0 %v12691_v54  ;;  %v12104_v54 = vld [vmem:[%s15230_s2 + $0x98] sm:$0xff]  }
  0xbd   : > { %10997 = vmatprep.mubr.bf16.mxu1 %v12694_v55  ;;  %11051 = vmatprep.subr.bf16.mxu0 %v12097_v15  ;;  %v12105_v55 = vld [vmem:[%s15229_s1 + $0x90] sm:$0xff]  }
  0xbe   : > { %11123 = vmatprep.subr.bf16.mxu1 %v12098_v16 }
  0xbf   : > { %11052 = vmatpush3.bf16.msra.mxu0 %v12097_v15 }
  0xc0   : > { %11124 = vmatpush3.bf16.msra.mxu1 %v12098_v16  ;;  %11053 = vmatprep.subr.bf16.mxu0 %v12099_v22 }
  0xc1   : > { %11125 = vmatprep.subr.bf16.mxu1 %v12100_v44 }
  0xc2   : > { %10926 = vmatmul.mubr.bf16.gmra.mxu0 %v12706_v58  ;;  %v12106_v58 = vld [vmem:[%s15230_s2 + $0x90] sm:$0xff]  }
  0xc3   : > { %10998 = vmatmul.mubr.bf16.gmra.mxu1 %v12716_v61  ;;  %10929 = vmatprep.mubr.bf16.mxu0 %v12719_v62  ;;  %v12107_v61 = vld [vmem:[%s15229_s1 + $0x88] sm:$0xff]  }
  0xc4   : > { %11001 = vmatprep.mubr.bf16.mxu1 %v12722_v63  ;;  %11054 = vmatpush3.bf16.msra.mxu0 %v12099_v22  ;;  %v12108_v62 = vld [vmem:[%s15230_s2 + $0x88] sm:$0xff]   ;;  %v12109_v63 = vld [vmem:[%s15229_s1 + $0x80] sm:$0xff]   ;;  %v12115_v22 = vld [vmem:[%s12656_s24 + $0x20] sm:$0xff]  }
  0xc5   : > { %11126 = vmatpush3.bf16.msra.mxu1 %v12100_v44  ;;  %11055 = vmatprep.subr.bf16.mxu0 %v12101_v45 }
  0xc6   : > { %11127 = vmatprep.subr.bf16.mxu1 %v12102_v50 }
  0xc8   : > { %11056 = vmatpush3.bf16.msra.mxu0 %v12101_v45 }
  0xc9   : > { %11128 = vmatpush3.bf16.msra.mxu1 %v12102_v50  ;;  %11057 = vmatprep.subr.bf16.mxu0 %v12103_v53  ;;  %v12118_v50 = vld [vmem:[%s15230_s2 + $0xf0] sm:$0xff]  }
  0xca   : > { %10930 = vmatmul.mubr.bf16.gmra.mxu0 %v12729_v0  ;;  %11129 = vmatprep.subr.bf16.mxu1 %v12104_v54  ;;  %v12110_v0 = vld [vmem:[%s15230_s2 + $0x80] sm:$0xff]  }
  0xcb   : > { %11002 = vmatmul.mubr.bf16.gmra.mxu1 %v12732_v1  ;;  %10933 = vmatprep.mubr.bf16.mxu0 %v12735_v2  ;;  %v13010_v1 = vld [vmem:[%s15229_s1 + $0xf8] sm:$0xff]  }
  0xcc   : > { %11005 = vmatprep.mubr.bf16.mxu1 %v12744_v5  ;;  %11058 = vmatpush3.bf16.msra.mxu0 %v12103_v53  ;;  %v13016_v2 = vld [vmem:[%s15230_s2 + $0xf8] sm:$0xff]   ;;  %v12123_v53 = vld [vmem:[%s15229_s1 + $0xe8] sm:$0xff]  }
  0xcd   : > { %11130 = vmatpush3.bf16.msra.mxu1 %v12104_v54  ;;  %11059 = vmatprep.subr.bf16.mxu0 %v12105_v55 }
  0xce   : > { %11131 = vmatprep.subr.bf16.mxu1 %v12106_v58 }
  0xd0   : > { %11060 = vmatpush3.bf16.msra.mxu0 %v12105_v55  ;;  %v12124_v55 = vld [vmem:[%s15230_s2 + $0xe8] sm:$0xff]  }
  0xd1   : > { %11132 = vmatpush3.bf16.msra.mxu1 %v12106_v58  ;;  %11061 = vmatprep.subr.bf16.mxu0 %v12107_v61 }
  0xd2   : > { %10934 = vmatmul.mubr.bf16.gmra.mxu0 %v12751_v6  ;;  %11133 = vmatprep.subr.bf16.mxu1 %v12108_v62 }
  0xd3   : > { %11006 = vmatmul.mubr.bf16.gmra.mxu1 %v12754_v7  ;;  %10937 = vmatprep.mubr.bf16.mxu0 %v12757_v8 }
  0xd4   : > { %11009 = vmatprep.mubr.bf16.mxu1 %v12760_v9  ;;  %11062 = vmatpush3.bf16.msra.mxu0 %v12107_v61 }
  0xd5   : > { %11134 = vmatpush3.bf16.msra.mxu1 %v12108_v62  ;;  %11063 = vmatprep.subr.bf16.mxu0 %v12109_v63  ;;  %v12116_v62 = vld [vmem:[%s12656_s24 + $0x28] sm:$0xff]  }
  0xd6   : > { %11135 = vmatprep.subr.bf16.mxu1 %v12110_v0 }
  0xd8   : > { %11064 = vmatpush3.bf16.msra.mxu0 %v12109_v63 }
  0xd9   : > { %11136 = vmatpush3.bf16.msra.mxu1 %v12110_v0  ;;  %11193 = vmatprep.subr.bf16.mxu0 %v13010_v1  ;;  %v12119_v0 = vld [vmem:[%s12656_s24 + $0x30] sm:$0xff]  }
  0xda   : > { %10938 = vmatmul.mubr.bf16.gmra.mxu0 %v12773_v12  ;;  %11265 = vmatprep.subr.bf16.mxu1 %v13016_v2 }
  0xdb   : > { %11010 = vmatmul.mubr.bf16.gmra.mxu1 %v12776_v13  ;;  %10941 = vmatprep.mubr.bf16.mxu0 %v12779_v14 }
  0xdc   : > { %11013 = vmatprep.mubr.bf16.mxu1 %v12788_v17 }
  0xe2   : > { %10942 = vmatmul.mubr.bf16.gmra.mxu0 %v12795_v18 }
  0xe3   : > { %11014 = vmatmul.mubr.bf16.gmra.mxu1 %v12798_v19  ;;  %10945 = vmatprep.mubr.bf16.mxu0 %v12801_v20 }
  0xe4   : > { %11017 = vmatprep.mubr.bf16.mxu1 %v12804_v21 }
  0xea   : > { %10946 = vmatmul.mubr.bf16.gmra.mxu0 %v12817_v24 }
  0xeb   : > { %11018 = vmatmul.mubr.bf16.gmra.mxu1 %v12820_v25  ;;  %10949 = vmatprep.mubr.bf16.mxu0 %v12823_v26 }
  0xec   : > { %11021 = vmatprep.mubr.bf16.mxu1 %v12826_v27 }
  0xf2   : > { %10950 = vmatmul.mubr.bf16.gmra.mxu0 %v12839_v30 }
  0xf3   : > { %11022 = vmatmul.mubr.bf16.gmra.mxu1 %v12842_v31  ;;  %10953 = vmatprep.mubr.bf16.mxu0 %v12845_v32 }
  0xf4   : > { %11025 = vmatprep.mubr.bf16.mxu1 %v12848_v33 }
  0xfa   : > { %10954 = vmatmul.mubr.bf16.gmra.mxu0 %v12861_v36 }
  0xfb   : > { %11026 = vmatmul.mubr.bf16.gmra.mxu1 %v12864_v37  ;;  %10957 = vmatprep.mubr.bf16.mxu0 %v12867_v38 }
  0xfc   : > { %11029 = vmatprep.mubr.bf16.mxu1 %v12870_v39  ;;  %v12111_v39 = vld [vmem:[%s12656_s24 + $0x10] sm:$0xff]  }
 0x102   : > { %10958 = vmatmul.mubr.bf16.gmra.mxu0 %v12877_v40 }
 0x103   : > { %11030 = vmatmul.mubr.bf16.gmra.mxu1 %v12880_v41  ;;  %10961 = vmatprep.mubr.bf16.mxu0 %v12883_v42 }
 0x104   : > { %11033 = vmatprep.mubr.bf16.mxu1 %v12886_v43 }
 0x10a   : > { %v10779_v5 = vpop.f32.mrf.mxu0  ;;  %10962 = vmatmul.mubr.bf16.gmra.mxu0 %v12893_v46 }
 0x10b   : > { %v10851_v6 = vpop.f32.mrf.mxu1  ;;  %11034 = vmatmul.mubr.bf16.gmra.mxu1 %v12896_v47  ;;  %10965 = vmatprep.mubr.bf16.mxu0 %v12899_v48 }
 0x10c   : > { %v13047_v7 = vadd.f32 %v10851_v6, %v10779_v5  ;;  %v1152_v8 = vpop.f32.mrf.mxu0  ;;  %11037 = vmatprep.mubr.bf16.mxu1 %v12902_v49 }
 0x10d   : > { %v1625_v9 = vpop.f32.mrf.mxu1 }
 0x10e   : > { %v13050_v12 = vadd.f32 %v1625_v9, %v1152_v8  ;;  %v10780_v13 = vpop.f32.mrf.mxu0 }
 0x10f   : > { %v10852_v14 = vpop.f32.mrf.mxu1 }
 0x110   : > { %v13052_v17 = vadd.f32 %v10852_v14, %v10780_v13  ;;  %v1155_v18 = vpop.f32.mrf.mxu0  ;;  %v12130_v14 = vld [vmem:[%s15230_s2 + $0xe0] sm:$0xff]  }
 0x111   : > { %v1628_v19 = vpop.f32.mrf.mxu1 }
 0x112   : > { %v13054_v20 = vadd.f32 %v1628_v19, %v1155_v18  ;;  %v10783_v21 = vpop.f32.mrf.mxu0  ;;  %10966 = vmatmul.mubr.bf16.gmra.mxu0 %v12909_v51 }
 0x113   : > { %v10855_v23 = vpop.f32.mrf.mxu1  ;;  %11038 = vmatmul.mubr.bf16.gmra.mxu1 %v12912_v52  ;;  %10969 = vmatprep.mubr.bf16.mxu0 %v12915_v56 }
 0x114   : > { %v13059_v24 = vadd.f32 %v10855_v23, %v10783_v21  ;;  %v1168_v25 = vpop.f32.mrf.mxu0  ;;  %11041 = vmatprep.mubr.bf16.mxu1 %v12918_v57  ;;  %v12112_v57 = vld [vmem:[%s12656_s24 + $0x18] sm:$0xff]   ;;  %v12135_v23 = vld [vmem:[%s15229_s1 + $0xd8] sm:$0xff]  }
 0x115   : > { %v1641_v26 = vpop.f32.mrf.mxu1 }
 0x116   : > { %v13062_v27 = vadd.f32 %v1641_v26, %v1168_v25  ;;  %v10784_v28 = vpop.f32.mrf.mxu0 }
 0x117   : > { %v10856_v29 = vpop.f32.mrf.mxu1 }
 0x118   : > { %v13064_v30 = vadd.f32 %v10856_v29, %v10784_v28  ;;  %v1171_v31 = vpop.f32.mrf.mxu0  ;;  %v12120_v28 = vld [vmem:[%s12656_s24 + $0x38] sm:$0xff]   ;;  %v12136_v29 = vld [vmem:[%s15230_s2 + $0xd8] sm:$0xff]  }
 0x119   : > { %v1644_v32 = vpop.f32.mrf.mxu1 }
 0x11a   : > { %v13066_v33 = vadd.f32 %v1644_v32, %v1171_v31  ;;  %v10787_v34 = vpop.f32.mrf.mxu0  ;;  %10970 = vmatmul.mubr.bf16.gmra.mxu0 %v12925_v59  ;;  %v12121_v32 = vld [vmem:[%s12656_s24 + $0x40] sm:$0xff]  }
 0x11b   : > { %v10859_v35 = vpop.f32.mrf.mxu1  ;;  %11042 = vmatmul.mubr.bf16.gmra.mxu1 %v12928_v60  ;;  %10973 = vmatprep.mubr.bf16.mxu0 %v12931_v3 }
 0x11c   : > { %v13071_v36 = vadd.f32 %v10859_v35, %v10787_v34  ;;  %v1184_v37 = vpop.f32.mrf.mxu0  ;;  %11045 = vmatprep.mubr.bf16.mxu1 %v12934_v4 }
 0x11d   : > { %v1657_v38 = vpop.f32.mrf.mxu1 }
 0x11e   : > { %v13075_v40 = vadd.f32 %v1657_v38, %v1184_v37  ;;  %v10788_v41 = vpop.f32.mrf.mxu0 }
 0x11f   : > { %v10860_v42 = vpop.f32.mrf.mxu1 }
 0x120   : > { %v13077_v43 = vadd.f32 %v10860_v42, %v10788_v41  ;;  %v1187_v46 = vpop.f32.mrf.mxu0  ;;  %v12139_v41 = vld [vmem:[%s15229_s1 + $0xd0] sm:$0xff]  }
 0x121   : > { %v1660_v47 = vpop.f32.mrf.mxu1 }
 0x122   : > { %v13079_v48 = vadd.f32 %v1660_v47, %v1187_v46  ;;  %v10791_v49 = vpop.f32.mrf.mxu0  ;;  %10974 = vmatmul.mubr.bf16.gmra.mxu0 %v12941_v10  ;;  %v12140_v46 = vld [vmem:[%s15230_s2 + $0xd0] sm:$0xff]  }
 0x123   : > { %v10863_v51 = vpop.f32.mrf.mxu1  ;;  %11046 = vmatmul.mubr.bf16.gmra.mxu1 %v12944_v11  ;;  %11065 = vmatprep.mubr.bf16.mxu0 %v12111_v39  ;;  %v12117_v11 = vld [vmem:[%s15229_s1 + $0xf0] sm:$0xff]  }
 0x124   : > { %v13083_v52 = vadd.f32 %v10863_v51, %v10791_v49  ;;  %v1200_v56 = vpop.f32.mrf.mxu0  ;;  %11137 = vmatprep.mubr.bf16.mxu1 %v12111_v39 }
 0x125   : > { %v1673_v59 = vpop.f32.mrf.mxu1 }
 0x126   : > { %v13086_v60 = vadd.f32 %v1673_v59, %v1200_v56  ;;  %v10792_v3 = vpop.f32.mrf.mxu0  ;;  %v12145_v56 = vld [vmem:[%s15229_s1 + $0xc8] sm:$0xff]  }
 0x127   : > { %v10864_v4 = vpop.f32.mrf.mxu1 }
 0x128   : > { %v13088_v15 = vadd.f32 %v10864_v4, %v10792_v3  ;;  %v1203_v16 = vpop.f32.mrf.mxu0  ;;  %v12122_v3 = vld [vmem:[%s12656_s24 + $0x48] sm:$0xff]   ;;  %v12146_v4 = vld [vmem:[%s15230_s2 + $0xc8] sm:$0xff]  }
 0x129   : > { %v1676_v10 = vpop.f32.mrf.mxu1 }
 0x12a   : > { %v13094_v44 = vadd.f32 %v1676_v10, %v1203_v16  ;;  %v10795_v45 = vpop.f32.mrf.mxu0  ;;  %11066 = vmatmul.mubr.bf16.vlgmr.msra.gmra.mxu0 %v12112_v57 }
 0x12b   : > { %v10867_v54 = vpop.f32.mrf.mxu1  ;;  %11138 = vmatmul.mubr.bf16.vlgmr.msra.gmra.mxu1 %v12112_v57  ;;  %11194 = vmatpush3.bf16.msra.mxu0 %v13010_v1 }
 0x12c   : > { %v13106_v58 = vadd.f32 %v10867_v54, %v10795_v45  ;;  %11266 = vmatpush3.bf16.msra.mxu1 %v13016_v2  ;;  %v1216_v61 = vpop.f32.mrf.mxu0  ;;  %11069 = vmatprep.mubr.bf16.mxu0 %v12115_v22  ;;  %v12129_v2 = vld [vmem:[%s15229_s1 + $0xe0] sm:$0xff]  }
 0x12d   : > { %v1689_v63 = vpop.f32.mrf.mxu1  ;;  %11141 = vmatprep.mubr.bf16.mxu1 %v12115_v22  ;;  %11195 = vmatprep.subr.bf16.mxu0 %v12117_v11  ;;  %v12125_v22 = vld [vmem:[%s12656_s24 + $0x50] sm:$0xff]   ;;  %v12151_v54 = vld [vmem:[%s15229_s1 + $0xc0] sm:$0xff]  }
 0x12e   : > { %v13111_v5 = vadd.f32 %v1689_v63, %v1216_v61  ;;  %v10796_v6 = vpop.f32.mrf.mxu0  ;;  %11267 = vmatprep.subr.bf16.mxu1 %v12118_v50  ;;  %v12152_v61 = vld [vmem:[%s15230_s2 + $0xc0] sm:$0xff]  }
 0x12f   : > { %v10868_v1 = vpop.f32.mrf.mxu1  ;;  %11196 = vmatpush3.bf16.msra.mxu0 %v12117_v11 }
 0x130   : > { %v13113_v8 = vadd.f32 %v10868_v1, %v10796_v6  ;;  %v1219_v9 = vpop.f32.mrf.mxu0  ;;  %11268 = vmatpush3.bf16.msra.mxu1 %v12118_v50  ;;  %11197 = vmatprep.subr.bf16.mxu0 %v12123_v53  ;;  %v13170_v6 = vld [vmem:[%s15229_s1 + $0x138] sm:$0xff]  }
 0x131   : > { %v1692_v13 = vpop.f32.mrf.mxu1  ;;  %11269 = vmatprep.subr.bf16.mxu1 %v12124_v55 }
 0x132   : > { %v13121_v18 = vadd.f32 %v1692_v13, %v1219_v9  ;;  %v10799_v19 = vpop.f32.mrf.mxu0  ;;  %11070 = vmatmul.mubr.bf16.gmra.mxu0 %v12116_v62 }
 0x133   : > { %v10871_v21 = vpop.f32.mrf.mxu1  ;;  %11142 = vmatmul.mubr.bf16.gmra.mxu1 %v12116_v62  ;;  %11073 = vmatprep.mubr.bf16.mxu0 %v12119_v0 }
 0x134   : > { %v13126_v25 = vadd.f32 %v10871_v21, %v10799_v19  ;;  %v1232_v26 = vpop.f32.mrf.mxu0  ;;  %11145 = vmatprep.mubr.bf16.mxu1 %v12119_v0  ;;  %11198 = vmatpush3.bf16.msra.mxu0 %v12123_v53  ;;  %v12127_v21 = vld [vmem:[%s12656_s24 + $0x60] sm:$0xff]  }
 0x135   : > { %v1705_v31 = vpop.f32.mrf.mxu1  ;;  %11270 = vmatpush3.bf16.msra.mxu1 %v12124_v55  ;;  %11199 = vmatprep.subr.bf16.mxu0 %v12129_v2 }
 0x136   : > { %v13133_v34 = vadd.f32 %v1705_v31, %v1232_v26  ;;  %v10800_v35 = vpop.f32.mrf.mxu0  ;;  %11271 = vmatprep.subr.bf16.mxu1 %v12130_v14 }
 0x137   : > { %v10872_v37 = vpop.f32.mrf.mxu1 }
 0x138   : > { %v13135_v38 = vadd.f32 %v10872_v37, %v10800_v35  ;;  %v1235_v39 = vpop.f32.mrf.mxu0  ;;  %11200 = vmatpush3.bf16.msra.mxu0 %v12129_v2  ;;  %v12126_v2 = vld [vmem:[%s12656_s24 + $0x58] sm:$0xff]  }
 0x139   : > { %v1708_v42 = vpop.f32.mrf.mxu1  ;;  %11272 = vmatpush3.bf16.msra.mxu1 %v12130_v14  ;;  %11201 = vmatprep.subr.bf16.mxu0 %v12135_v23 }
 0x13a   : > { %v13143_v47 = vadd.f32 %v1708_v42, %v1235_v39  ;;  %v10803_v49 = vpop.f32.mrf.mxu0  ;;  %11074 = vmatmul.mubr.bf16.gmra.mxu0 %v12120_v28  ;;  %11273 = vmatprep.subr.bf16.mxu1 %v12136_v29 }
 0x13b   : > { %v10875_v51 = vpop.f32.mrf.mxu1  ;;  %11146 = vmatmul.mubr.bf16.gmra.mxu1 %v12120_v28  ;;  %11077 = vmatprep.mubr.bf16.mxu0 %v12121_v32 }
 0x13c   : > { %15245 = vst [vmem:[#allocation5_spill] sm:$0xff] %v13143_v47  ;;  %v13148_v57 = vadd.f32 %v10875_v51, %v10803_v49  ;;  %v1248_v59 = vpop.f32.mrf.mxu0  ;;  %11149 = vmatprep.mubr.bf16.mxu1 %v12121_v32  ;;  %11202 = vmatpush3.bf16.msra.mxu0 %v12135_v23  ;;  %v13181_v23 = vld [vmem:[%s15230_s2 + $0x138] sm:$0xff]   ;;  %v12128_v51 = vld [vmem:[%s12656_s24 + $0x68] sm:$0xff]  }
 0x13d   : > { %v1721_v16 = vpop.f32.mrf.mxu1  ;;  %11274 = vmatpush3.bf16.msra.mxu1 %v12136_v29  ;;  %11203 = vmatprep.subr.bf16.mxu0 %v12139_v41 }
 0x13e   : > { %15246 = vst [vmem:[#allocation6_spill] sm:$0xff] %v13148_v57  ;;  %v13155_v10 = vadd.f32 %v1721_v16, %v1248_v59  ;;  %v10804_v11 = vpop.f32.mrf.mxu0  ;;  %11275 = vmatprep.subr.bf16.mxu1 %v12140_v46  ;;  %v12131_v59 = vld [vmem:[%s12656_s24 + $0x70] sm:$0xff]   ;;  %v12171_v57 = vld [vmem:[%s12656_s24 + $0x68] sm:$0xff]  }
 0x13f   : > { %v10876_v45 = vpop.f32.mrf.mxu1 }
 0x140   : > { %15247 = vst [vmem:[#allocation7_spill] sm:$0xff] %v13155_v10  ;;  %v13157_v50 = vadd.f32 %v10876_v45, %v10804_v11  ;;  %v1251_v53 = vpop.f32.mrf.mxu0  ;;  %11204 = vmatpush3.bf16.msra.mxu0 %v12139_v41  ;;  %v12166_v10 = vld [vmem:[%s12656_s24 + $0x50] sm:$0xff]  }
 0x141   : > { %v1724_v55 = vpop.f32.mrf.mxu1  ;;  %11276 = vmatpush3.bf16.msra.mxu1 %v12140_v46  ;;  %11205 = vmatprep.subr.bf16.mxu0 %v12145_v56 }
 0x142   : > { %15248 = vst [vmem:[#allocation8_spill] sm:$0xff] %v13157_v50  ;;  %v13165_v62 = vadd.f32 %v1724_v55, %v1251_v53  ;;  %v10807_v63 = vpop.f32.mrf.mxu0  ;;  %11078 = vmatmul.mubr.bf16.gmra.mxu0 %v12122_v3  ;;  %11277 = vmatprep.subr.bf16.mxu1 %v12146_v4 }
 0x143   : > { %v10879_v0 = vpop.f32.mrf.mxu1  ;;  %11150 = vmatmul.mubr.bf16.gmra.mxu1 %v12122_v3  ;;  %11081 = vmatprep.mubr.bf16.mxu0 %v12125_v22 }
 0x144   : > { %15249 = vst [vmem:[#allocation9_spill] sm:$0xff] %v13165_v62  ;;  %v13172_v1 = vadd.f32 %v10879_v0, %v10807_v63  ;;  %v1264_v9 = vpop.f32.mrf.mxu0  ;;  %11153 = vmatprep.mubr.bf16.mxu1 %v12125_v22  ;;  %11206 = vmatpush3.bf16.msra.mxu0 %v12145_v56  ;;  %v12132_v0 = vld [vmem:[%s12656_s24 + $0x78] sm:$0xff]  }
 0x145   : > { %v1737_v13 = vpop.f32.mrf.mxu1  ;;  %11278 = vmatpush3.bf16.msra.mxu1 %v12146_v4  ;;  %11207 = vmatprep.subr.bf16.mxu0 %v12151_v54 }
 0x146   : > { %15250 = vst [vmem:[#allocation10_spill] sm:$0xff] %v13172_v1  ;;  %v13175_v14 = vadd.f32 %v1737_v13, %v1264_v9  ;;  %v10808_v19 = vpop.f32.mrf.mxu0  ;;  %11279 = vmatprep.subr.bf16.mxu1 %v12152_v61 }
 0x147   : > { %v10880_v26 = vpop.f32.mrf.mxu1 }
 0x148   : > { %15251 = vst [vmem:[#allocation11_spill] sm:$0xff] %v13175_v14  ;;  %v13183_v28 = vadd.f32 %v10880_v26, %v10808_v19  ;;  %v1267_v29 = vpop.f32.mrf.mxu0  ;;  %11208 = vmatpush3.bf16.msra.mxu0 %v12151_v54  ;;  %v12164_v14 = vld [vmem:[%s12656_s24 + $0x40] sm:$0xff]  }
 0x149   : > { %v1740_v31 = vpop.f32.mrf.mxu1  ;;  %11280 = vmatpush3.bf16.msra.mxu1 %v12152_v61  ;;  %11337 = vmatprep.subr.bf16.mxu0 %v13170_v6 }
 0x14a   : > { %15252 = vst [vmem:[#allocation12_spill] sm:$0xff] %v13183_v28  ;;  %v13186_v32 = vadd.f32 %v1740_v31, %v1267_v29  ;;  %v10811_v35 = vpop.f32.mrf.mxu0  ;;  %11082 = vmatmul.mubr.bf16.gmra.mxu0 %v12126_v2  ;;  %11409 = vmatprep.subr.bf16.mxu1 %v13181_v23 }
 0x14b   : > { %v10883_v37 = vpop.f32.mrf.mxu1  ;;  %11154 = vmatmul.mubr.bf16.gmra.mxu1 %v12126_v2  ;;  %11085 = vmatprep.mubr.bf16.mxu0 %v12127_v21  ;;  %v12133_v2 = vld [vmem:[%s12656_s24 + $0x80] sm:$0xff]  }
 0x14c   : > { %15253 = vst [vmem:[#allocation13_spill] sm:$0xff] %v13186_v32  ;;  %v13189_v39 = vadd.f32 %v10883_v37, %v10811_v35  ;;  %v1280_v41 = vpop.f32.mrf.mxu0  ;;  %11157 = vmatprep.mubr.bf16.mxu1 %v12127_v21 }
 0x14d   : > { %v1753_v42 = vpop.f32.mrf.mxu1 }
 0x14e   : > { %15254 = vst [vmem:[#allocation14_spill] sm:$0xff] %v13189_v39  ;;  %v13191_v46 = vadd.f32 %v1753_v42, %v1280_v41  ;;  %v10812_v49 = vpop.f32.mrf.mxu0 }
 0x14f   : > { %v10884_v56 = vpop.f32.mrf.mxu1 }
 0x150   : > { %15255 = vst [vmem:[#allocation15_spill] sm:$0xff] %v13191_v46  ;;  %v13195_v3 = vadd.f32 %v10884_v56, %v10812_v49  ;;  %v1283_v4 = vpop.f32.mrf.mxu0 }
 0x151   : > { %v1756_v16 = vpop.f32.mrf.mxu1 }
 0x152   : > { %15256 = vst [vmem:[#allocation16_spill] sm:$0xff] %v13195_v3  ;;  %v13197_v22 = vadd.f32 %v1756_v16, %v1283_v4  ;;  %v10815_v11 = vpop.f32.mrf.mxu0  ;;  %11086 = vmatmul.mubr.bf16.gmra.mxu0 %v12128_v51 }
 0x153   : > { %v10887_v45 = vpop.f32.mrf.mxu1  ;;  %11158 = vmatmul.mubr.bf16.gmra.mxu1 %v12128_v51  ;;  %11089 = vmatprep.mubr.bf16.mxu0 %v12131_v59  ;;  %v12134_v51 = vld [vmem:[%s12656_s24 + $0x88] sm:$0xff]  }
 0x154   : > { %15257 = vst [vmem:[#allocation17_spill] sm:$0xff] %v13197_v22  ;;  %v13199_v53 = vadd.f32 %v10887_v45, %v10815_v11  ;;  %v1296_v54 = vpop.f32.mrf.mxu0  ;;  %11161 = vmatprep.mubr.bf16.mxu1 %v12131_v59  ;;  %v12137_v59 = vld [vmem:[%s12656_s24 + $0x90] sm:$0xff]  }
 0x155   : > { %v1769_v55 = vpop.f32.mrf.mxu1 }
 0x156   : > { %15258 = vst [vmem:[#allocation18_spill] sm:$0xff] %v13199_v53  ;;  %v13201_v61 = vadd.f32 %v1769_v55, %v1296_v54  ;;  %v10816_v63 = vpop.f32.mrf.mxu0 }
 0x157   : > { %v10888_v9 = vpop.f32.mrf.mxu1 }
 0x158   : > { %15259 = vst [vmem:[#allocation19_spill] sm:$0xff] %v13201_v61  ;;  %v13205_v13 = vadd.f32 %v10888_v9, %v10816_v63  ;;  %v1299_v19 = vpop.f32.mrf.mxu0 }
 0x159   : > { %v1772_v21 = vpop.f32.mrf.mxu1 }
 0x15a   : > { %15260 = vst [vmem:[#allocation20_spill] sm:$0xff] %v13205_v13  ;;  %v13207_v26 = vadd.f32 %v1772_v21, %v1299_v19  ;;  %v10819_v29 = vpop.f32.mrf.mxu0  ;;  %11090 = vmatmul.mubr.bf16.gmra.mxu0 %v12132_v0  ;;  %v12138_v21 = vld [vmem:[%s12656_s24 + $0x98] sm:$0xff]  }
 0x15b   : > { %v10891_v31 = vpop.f32.mrf.mxu1  ;;  %11162 = vmatmul.mubr.bf16.gmra.mxu1 %v12132_v0  ;;  %11093 = vmatprep.mubr.bf16.mxu0 %v12133_v2 }
 0x15c   : > { %15261 = vst [vmem:[#allocation21_spill] sm:$0xff] %v13207_v26  ;;  %v13209_v35 = vadd.f32 %v10891_v31, %v10819_v29  ;;  %v1312_v37 = vpop.f32.mrf.mxu0  ;;  %11165 = vmatprep.mubr.bf16.mxu1 %v12133_v2  ;;  %v12141_v31 = vld [vmem:[%s12656_s24 + $0xa0] sm:$0xff]  }
 0x15d   : > { %v1785_v41 = vpop.f32.mrf.mxu1 }
 0x15e   : > { %15262 = vst [vmem:[#allocation22_spill] sm:$0xff] %v13209_v35  ;;  %v13211_v42 = vadd.f32 %v1785_v41, %v1312_v37  ;;  %v10820_v49 = vpop.f32.mrf.mxu0  ;;  %v12155_v35 = vld [vmem:[%s12656_s24 + $0x18] sm:$0xff]  }
 0x15f   : > { %v10892_v56 = vpop.f32.mrf.mxu1 }
 0x160   : > { %15263 = vst [vmem:[#allocation23_spill] sm:$0xff] %v13211_v42  ;;  %v13215_v4 = vadd.f32 %v10892_v56, %v10820_v49  ;;  %v1315_v16 = vpop.f32.mrf.mxu0 }
 0x161   : > { %v1788_v11 = vpop.f32.mrf.mxu1 }
 0x162   : > { %15264 = vst [vmem:[#allocation24_spill] sm:$0xff] %v13215_v4  ;;  %v13217_v45 = vadd.f32 %v1788_v11, %v1315_v16  ;;  %v10823_v54 = vpop.f32.mrf.mxu0  ;;  %11094 = vmatmul.mubr.bf16.gmra.mxu0 %v12134_v51 }
 0x163   : > { %v10895_v55 = vpop.f32.mrf.mxu1  ;;  %11166 = vmatmul.mubr.bf16.gmra.mxu1 %v12134_v51  ;;  %11097 = vmatprep.mubr.bf16.mxu0 %v12137_v59 }
 0x164   : > { %15265 = vst [vmem:[#allocation25_spill] sm:$0xff] %v13217_v45  ;;  %v13219_v63 = vadd.f32 %v10895_v55, %v10823_v54  ;;  %v1328_v0 = vpop.f32.mrf.mxu0  ;;  %11169 = vmatprep.mubr.bf16.mxu1 %v12137_v59 }
 0x165   : > { %v1801_v9 = vpop.f32.mrf.mxu1 }
 0x166   : > { %15266 = vst [vmem:[#allocation26_spill] sm:$0xff] %v13219_v63  ;;  %v13221_v2 = vadd.f32 %v1801_v9, %v1328_v0  ;;  %v10824_v19 = vpop.f32.mrf.mxu0  ;;  %v12142_v9 = vld [vmem:[%s12656_s24 + $0xa8] sm:$0xff]   ;;  %v12153_v63 = vld [vmem:[%s12656_s24 + $0xe0] sm:$0xff]  }
 0x167   : > { %v10896_v29 = vpop.f32.mrf.mxu1 }
 0x168   : > { %15267 = vst [vmem:[#allocation27_spill] sm:$0xff] %v13221_v2  ;;  %v13225_v37 = vadd.f32 %v10896_v29, %v10824_v19  ;;  %v1331_v41 = vpop.f32.mrf.mxu0  ;;  %v12143_v29 = vld [vmem:[%s12656_s24 + $0xb0] sm:$0xff]  }
 0x169   : > { %v1804_v49 = vpop.f32.mrf.mxu1 }
 0x16a   : > { %15268 = vst [vmem:[#allocation28_spill] sm:$0xff] %v13225_v37  ;;  %v13227_v56 = vadd.f32 %v1804_v49, %v1331_v41  ;;  %v10827_v51 = vpop.f32.mrf.mxu0  ;;  %11098 = vmatmul.mubr.bf16.gmra.mxu0 %v12138_v21 }
 0x16b   : > { %v10899_v16 = vpop.f32.mrf.mxu1  ;;  %11170 = vmatmul.mubr.bf16.gmra.mxu1 %v12138_v21  ;;  %11101 = vmatprep.mubr.bf16.mxu0 %v12141_v31 }
 0x16c   : > { %15269 = vst [vmem:[#allocation29_spill] sm:$0xff] %v13227_v56  ;;  %v13229_v59 = vadd.f32 %v10899_v16, %v10827_v51  ;;  %v1344_v11 = vpop.f32.mrf.mxu0  ;;  %11173 = vmatprep.mubr.bf16.mxu1 %v12141_v31 }
 0x16d   : > { %v1817_v54 = vpop.f32.mrf.mxu1 }
 0x16e   : > { %15270 = vst [vmem:[#allocation30_spill] sm:$0xff] %v13229_v59  ;;  %v13231_v55 = vadd.f32 %v1817_v54, %v1344_v11  ;;  %v10828_v0 = vpop.f32.mrf.mxu0 }
 0x16f   : > { %v10900_v19 = vpop.f32.mrf.mxu1 }
 0x170   : > { %15271 = vst [vmem:[#allocation31_spill] sm:$0xff] %v13231_v55  ;;  %v13235_v37 = vadd.f32 %v10900_v19, %v10828_v0  ;;  %v1347_v41 = vpop.f32.mrf.mxu0  ;;  %v12144_v0 = vld [vmem:[%s12656_s24 + $0xb8] sm:$0xff]  }
 0x171   : > { %v1820_v49 = vpop.f32.mrf.mxu1 }
 0x172   : > { %15272 = vst [vmem:[#allocation32_spill] sm:$0xff] %v13235_v37  ;;  %v13237_v56 = vadd.f32 %v1820_v49, %v1347_v41  ;;  %v10831_v21 = vpop.f32.mrf.mxu0  ;;  %11102 = vmatmul.mubr.bf16.gmra.mxu0 %v12142_v9  ;;  %v12147_v37 = vld [vmem:[%s12656_s24 + $0xc0] sm:$0xff]  }
 0x173   : > { %v10903_v51 = vpop.f32.mrf.mxu1  ;;  %11174 = vmatmul.mubr.bf16.gmra.mxu1 %v12142_v9  ;;  %11105 = vmatprep.mubr.bf16.mxu0 %v12143_v29 }
 0x174   : > { %15273 = vst [vmem:[#allocation33_spill] sm:$0xff] %v13237_v56  ;;  %v13239_v31 = vadd.f32 %v10903_v51, %v10831_v21  ;;  %v1360_v16 = vpop.f32.mrf.mxu0  ;;  %11177 = vmatprep.mubr.bf16.mxu1 %v12143_v29 }
 0x175   : > { %v1833_v11 = vpop.f32.mrf.mxu1 }
 0x176   : > { %15274 = vst [vmem:[#allocation34_spill] sm:$0xff] %v13239_v31  ;;  %v13241_v54 = vadd.f32 %v1833_v11, %v1360_v16  ;;  %v10832_v55 = vpop.f32.mrf.mxu0 }
 0x177   : > { %v10904_v19 = vpop.f32.mrf.mxu1 }
 0x178   : > { %15275 = vst [vmem:[#allocation35_spill] sm:$0xff] %v13241_v54  ;;  %v13245_v59 = vadd.f32 %v10904_v19, %v10832_v55  ;;  %v1363_v41 = vpop.f32.mrf.mxu0  ;;  %v12148_v55 = vld [vmem:[%s12656_s24 + $0xc8] sm:$0xff]  }
 0x179   : > { %v1836_v49 = vpop.f32.mrf.mxu1 }
 0x17a   : > { %15276 = vst [vmem:[#allocation36_spill] sm:$0xff] %v13245_v59  ;;  %v13247_v56 = vadd.f32 %v1836_v49, %v1363_v41  ;;  %v10923_v9 = vpop.f32.mrf.mxu0  ;;  %11106 = vmatmul.mubr.bf16.gmra.mxu0 %v12144_v0  ;;  %v12149_v59 = vld [vmem:[%s12656_s24 + $0xd0] sm:$0xff]  }
 0x17b   : > { %v10995_v21 = vpop.f32.mrf.mxu1  ;;  %11178 = vmatmul.mubr.bf16.gmra.mxu1 %v12144_v0  ;;  %11109 = vmatprep.mubr.bf16.mxu0 %v12147_v37 }
 0x17c   : > { %15277 = vst [vmem:[#allocation37_spill] sm:$0xff] %v13247_v56  ;;  %v13249_v29 = vadd.f32 %v10995_v21, %v10923_v9  ;;  %v1947_v51 = vpop.f32.mrf.mxu0  ;;  %11181 = vmatprep.mubr.bf16.mxu1 %v12147_v37 }
 0x17d   : > { %v2252_v16 = vpop.f32.mrf.mxu1 }
 0x17e   : > { %v13251_v11 = vadd.f32 %v2252_v16, %v1947_v51  ;;  %v10924_v54 = vpop.f32.mrf.mxu0 }
 0x17f   : > { %v10996_v19 = vpop.f32.mrf.mxu1 }
 0x180   : > { %v13255_v31 = vadd.f32 %v10996_v19, %v10924_v54  ;;  %v1950_v41 = vpop.f32.mrf.mxu0  ;;  %v12150_v54 = vld [vmem:[%s12656_s24 + $0xd8] sm:$0xff]  }
 0x181   : > { %v2255_v49 = vpop.f32.mrf.mxu1 }
 0x182   : > { %v13257_v56 = vadd.f32 %v2255_v49, %v1950_v41  ;;  %v10927_v0 = vpop.f32.mrf.mxu0  ;;  %11110 = vmatmul.mubr.bf16.gmra.mxu0 %v12148_v55 }
 0x183   : > { %v10999_v9 = vpop.f32.mrf.mxu1  ;;  %11182 = vmatmul.mubr.bf16.gmra.mxu1 %v12148_v55  ;;  %11113 = vmatprep.mubr.bf16.mxu0 %v12149_v59 }
 0x184   : > { %v13259_v37 = vadd.f32 %v10999_v9, %v10927_v0  ;;  %v1963_v21 = vpop.f32.mrf.mxu0  ;;  %11185 = vmatprep.mubr.bf16.mxu1 %v12149_v59 }
 0x185   : > { %v2268_v51 = vpop.f32.mrf.mxu1 }
 0x186   : > { %v13261_v16 = vadd.f32 %v2268_v51, %v1963_v21  ;;  %v10928_v2 = vpop.f32.mrf.mxu0 }
 0x187   : > { %v11000_v19 = vpop.f32.mrf.mxu1 }
 0x188   : > { %v13265_v45 = vadd.f32 %v11000_v19, %v10928_v2  ;;  %v1966_v41 = vpop.f32.mrf.mxu0  ;;  %v12154_v2 = vld [vmem:[%s12656_s24 + $0xe8] sm:$0xff]  }
 0x189   : > { %v2271_v49 = vpop.f32.mrf.mxu1 }
 0x18a   : > { %v13267_v4 = vadd.f32 %v2271_v49, %v1966_v41  ;;  %v10931_v55 = vpop.f32.mrf.mxu0  ;;  %11114 = vmatmul.mubr.bf16.gmra.mxu0 %v12150_v54 }
 0x18b   : > { %v11003_v0 = vpop.f32.mrf.mxu1  ;;  %11186 = vmatmul.mubr.bf16.gmra.mxu1 %v12150_v54  ;;  %11117 = vmatprep.mubr.bf16.mxu0 %v12153_v63 }
 0x18c   : > { %v13269_v59 = vadd.f32 %v11003_v0, %v10931_v55  ;;  %v1979_v9 = vpop.f32.mrf.mxu0  ;;  %11189 = vmatprep.mubr.bf16.mxu1 %v12153_v63 }
 0x18d   : > { %v2284_v21 = vpop.f32.mrf.mxu1 }
 0x18e   : > { %v13271_v51 = vadd.f32 %v2284_v21, %v1979_v9  ;;  %v10932_v42 = vpop.f32.mrf.mxu0 }
 0x18f   : > { %v11004_v19 = vpop.f32.mrf.mxu1 }
 0x190   : > { %v13275_v26 = vadd.f32 %v11004_v19, %v10932_v42  ;;  %v1982_v41 = vpop.f32.mrf.mxu0  ;;  %v12156_v42 = vld [vmem:[%s12656_s24 + $0x20] sm:$0xff]  }
 0x191   : > { %v2287_v49 = vpop.f32.mrf.mxu1 }
 0x192   : > { %v13277_v13 = vadd.f32 %v2287_v49, %v1982_v41  ;;  %v10935_v54 = vpop.f32.mrf.mxu0  ;;  %11118 = vmatmul.mubr.bf16.gmra.mxu0 %v12154_v2  ;;  %v12159_v49 = vld [vmem:[%s12656_s24 + $0x28] sm:$0xff]  }
 0x193   : > { %v11007_v55 = vpop.f32.mrf.mxu1  ;;  %11190 = vmatmul.mubr.bf16.gmra.mxu1 %v12154_v2  ;;  %11209 = vmatprep.mubr.bf16.mxu0 %v12155_v35  ;;  %v12161_v2 = vld [vmem:[%s15229_s1 + $0x130] sm:$0xff]  }
 0x194   : > { %v13279_v63 = vadd.f32 %v11007_v55, %v10935_v54  ;;  %v1995_v0 = vpop.f32.mrf.mxu0  ;;  %11281 = vmatprep.mubr.bf16.mxu1 %v12155_v35  ;;  %v12162_v35 = vld [vmem:[%s15230_s2 + $0x130] sm:$0xff]  }
 0x195   : > { %v2300_v9 = vpop.f32.mrf.mxu1 }
 0x196   : > { %v13281_v21 = vadd.f32 %v2300_v9, %v1995_v0  ;;  %v10936_v61 = vpop.f32.mrf.mxu0 }
 0x197   : > { %v11008_v19 = vpop.f32.mrf.mxu1 }
 0x198   : > { %v13284_v53 = vadd.f32 %v11008_v19, %v10936_v61  ;;  %v1998_v41 = vpop.f32.mrf.mxu0 }
 0x199   : > { %v2303_v22 = vpop.f32.mrf.mxu1 }
 0x19a   : > { %v13290_v3 = vadd.f32 %v2303_v22, %v1998_v41  ;;  %v10939_v54 = vpop.f32.mrf.mxu0  ;;  %11210 = vmatmul.mubr.bf16.vlgmr.msra.gmra.mxu0 %v12156_v42  ;;  %v12167_v22 = vld [vmem:[%s15229_s1 + $0x128] sm:$0xff]  }
 0x19b   : > { %v11011_v55 = vpop.f32.mrf.mxu1  ;;  %11282 = vmatmul.mubr.bf16.vlgmr.msra.gmra.mxu1 %v12156_v42  ;;  %11338 = vmatpush3.bf16.msra.mxu0 %v13170_v6  ;;  %v12168_v42 = vld [vmem:[%s15230_s2 + $0x128] sm:$0xff]  }
 0x19c   : > { %v13296_v61 = vadd.f32 %v11011_v55, %v10939_v54  ;;  %11410 = vmatpush3.bf16.msra.mxu1 %v13181_v23  ;;  %v2011_v0 = vpop.f32.mrf.mxu0  ;;  %11213 = vmatprep.mubr.bf16.mxu0 %v12159_v49  ;;  %v12160_v41 = vld [vmem:[%s12656_s24 + $0x30] sm:$0xff]   ;;  %v12163_v23 = vld [vmem:[%s12656_s24 + $0x38] sm:$0xff]  }
 0x19d   : > { %v2316_v9 = vpop.f32.mrf.mxu1  ;;  %11285 = vmatprep.mubr.bf16.mxu1 %v12159_v49  ;;  %11339 = vmatprep.subr.bf16.mxu0 %v12161_v2  ;;  %v12173_v49 = vld [vmem:[%s15229_s1 + $0x120] sm:$0xff]  }
 0x19e   : > { %v13305_v19 = vadd.f32 %v2316_v9, %v2011_v0  ;;  %v10940_v6 = vpop.f32.mrf.mxu0  ;;  %11411 = vmatprep.subr.bf16.mxu1 %v12162_v35 }
 0x19f   : > { %v11012_v54 = vpop.f32.mrf.mxu1  ;;  %11340 = vmatpush3.bf16.msra.mxu0 %v12161_v2  ;;  %v12174_v2 = vld [vmem:[%s15230_s2 + $0x120] sm:$0xff]  }
 0x1a0   : > { %v13309_v55 = vadd.f32 %v11012_v54, %v10940_v6  ;;  %v2014_v46 = vpop.f32.mrf.mxu0  ;;  %11412 = vmatpush3.bf16.msra.mxu1 %v12162_v35  ;;  %11341 = vmatprep.subr.bf16.mxu0 %v12167_v22 }
 0x1a1   : > { %v2319_v39 = vpop.f32.mrf.mxu1  ;;  %11413 = vmatprep.subr.bf16.mxu1 %v12168_v42 }
 0x1a2   : > { %v13314_v32 = vadd.f32 %v2319_v39, %v2014_v46  ;;  %v10943_v0 = vpop.f32.mrf.mxu0  ;;  %11214 = vmatmul.mubr.bf16.gmra.mxu0 %v12160_v41  ;;  %v12179_v39 = vld [vmem:[%s15229_s1 + $0x118] sm:$0xff]  }
 0x1a3   : > { %v11015_v9 = vpop.f32.mrf.mxu1  ;;  %11286 = vmatmul.mubr.bf16.gmra.mxu1 %v12160_v41  ;;  %11217 = vmatprep.mubr.bf16.mxu0 %v12163_v23  ;;  %v12180_v41 = vld [vmem:[%s15230_s2 + $0x118] sm:$0xff]  }
 0x1a4   : > { %v13319_v35 = vadd.f32 %v11015_v9, %v10943_v0  ;;  %v2027_v6 = vpop.f32.mrf.mxu0  ;;  %11289 = vmatprep.mubr.bf16.mxu1 %v12163_v23  ;;  %11342 = vmatpush3.bf16.msra.mxu0 %v12167_v22  ;;  %v12165_v9 = vld [vmem:[%s12656_s24 + $0x48] sm:$0xff]  }
 0x1a5   : > { %v2332_v54 = vpop.f32.mrf.mxu1  ;;  %11414 = vmatpush3.bf16.msra.mxu1 %v12168_v42  ;;  %11343 = vmatprep.subr.bf16.mxu0 %v12173_v49 }
 0x1a6   : > { %v13324_v46 = vadd.f32 %v2332_v54, %v2027_v6  ;;  %v10944_v28 = vpop.f32.mrf.mxu0  ;;  %11415 = vmatprep.subr.bf16.mxu1 %v12174_v2  ;;  %v12183_v6 = vld [vmem:[%s15229_s1 + $0x110] sm:$0xff]  }
 0x1a7   : > { %v11016_v0 = vpop.f32.mrf.mxu1 }
 0x1a8   : > { %v13331_v23 = vadd.f32 %v11016_v0, %v10944_v28  ;;  %v2030_v22 = vpop.f32.mrf.mxu0  ;;  %11344 = vmatpush3.bf16.msra.mxu0 %v12173_v49  ;;  %v12184_v28 = vld [vmem:[%s15230_s2 + $0x110] sm:$0xff]  }
 0x1a9   : > { %v2335_v42 = vpop.f32.mrf.mxu1  ;;  %11416 = vmatpush3.bf16.msra.mxu1 %v12174_v2  ;;  %11345 = vmatprep.subr.bf16.mxu0 %v12179_v39 }
 0x1aa   : > { %v13336_v54 = vadd.f32 %v2335_v42, %v2030_v22  ;;  %v10947_v1 = vpop.f32.mrf.mxu0  ;;  %11218 = vmatmul.mubr.bf16.gmra.mxu0 %v12164_v14  ;;  %11417 = vmatprep.subr.bf16.mxu1 %v12180_v41  ;;  %v12189_v22 = vld [vmem:[%s15229_s1 + $0x108] sm:$0xff]  }
 0x1ab   : > { %v11019_v0 = vpop.f32.mrf.mxu1  ;;  %11290 = vmatmul.mubr.bf16.gmra.mxu1 %v12164_v14  ;;  %11221 = vmatprep.mubr.bf16.mxu0 %v12165_v9 }
 0x1ac   : > { %15278 = vst [vmem:[#allocation38_spill] sm:$0xff] %v13336_v54  ;;  %v13341_v49 = vadd.f32 %v11019_v0, %v10947_v1  ;;  %v2043_v2 = vpop.f32.mrf.mxu0  ;;  %11293 = vmatprep.mubr.bf16.mxu1 %v12165_v9  ;;  %11346 = vmatpush3.bf16.msra.mxu0 %v12179_v39  ;;  %v12190_v1 = vld [vmem:[%s15230_s2 + $0x108] sm:$0xff]   ;;  %v12169_v0 = vld [vmem:[%s12656_s24 + $0x58] sm:$0xff]  }
 0x1ad   : > { %v2348_v62 = vpop.f32.mrf.mxu1  ;;  %11418 = vmatpush3.bf16.msra.mxu1 %v12180_v41  ;;  %11347 = vmatprep.subr.bf16.mxu0 %v12183_v6 }
 0x1ae   : > { %15279 = vst [vmem:[#allocation39_spill] sm:$0xff] %v13341_v49  ;;  %v13346_v42 = vadd.f32 %v2348_v62, %v2043_v2  ;;  %v10948_v50 = vpop.f32.mrf.mxu0  ;;  %11419 = vmatprep.subr.bf16.mxu1 %v12184_v28  ;;  %v12195_v62 = vld [vmem:[%s15229_s1 + $0x100] sm:$0xff]  }
 0x1af   : > { %v11020_v14 = vpop.f32.mrf.mxu1 }
 0x1b0   : > { %15280 = vst [vmem:[#allocation40_spill] sm:$0xff] %v13346_v42  ;;  %v13353_v9 = vadd.f32 %v11020_v14, %v10948_v50  ;;  %v2046_v39 = vpop.f32.mrf.mxu0  ;;  %11348 = vmatpush3.bf16.msra.mxu0 %v12183_v6  ;;  %v12196_v50 = vld [vmem:[%s15230_s2 + $0x100] sm:$0xff]  }
 0x1b1   : > { %v2351_v41 = vpop.f32.mrf.mxu1  ;;  %11420 = vmatpush3.bf16.msra.mxu1 %v12184_v28  ;;  %11349 = vmatprep.subr.bf16.mxu0 %v12189_v22 }
 0x1b2   : > { %15281 = vst [vmem:[#allocation41_spill] sm:$0xff] %v13353_v9  ;;  %v13358_v2 = vadd.f32 %v2351_v41, %v2046_v39  ;;  %v10951_v42 = vpop.f32.mrf.mxu0  ;;  %11222 = vmatmul.mubr.bf16.gmra.mxu0 %v12166_v10  ;;  %11421 = vmatprep.subr.bf16.mxu1 %v12190_v1 }
 0x1b3   : > { %v11023_v14 = vpop.f32.mrf.mxu1  ;;  %11294 = vmatmul.mubr.bf16.gmra.mxu1 %v12166_v10  ;;  %11225 = vmatprep.mubr.bf16.mxu0 %v12169_v0 }
 0x1b4   : > { %15282 = vst [vmem:[#allocation42_spill] sm:$0xff] %v13358_v2  ;;  %v13363_v6 = vadd.f32 %v11023_v14, %v10951_v42  ;;  %v2059_v28 = vpop.f32.mrf.mxu0  ;;  %11297 = vmatprep.mubr.bf16.mxu1 %v12169_v0  ;;  %11350 = vmatpush3.bf16.msra.mxu0 %v12189_v22  ;;  %v12170_v2 = vld [vmem:[%s12656_s24 + $0x60] sm:$0xff]  }
 0x1b5   : > { %v2364_v9 = vpop.f32.mrf.mxu1  ;;  %11422 = vmatpush3.bf16.msra.mxu1 %v12190_v1  ;;  %11351 = vmatprep.subr.bf16.mxu0 %v12195_v62 }
 0x1b6   : > { %v13365_v39 = vadd.f32 %v2364_v9, %v2059_v28  ;;  %v10952_v41 = vpop.f32.mrf.mxu0  ;;  %11423 = vmatprep.subr.bf16.mxu1 %v12196_v50 }
 0x1b7   : > { %v11024_v49 = vpop.f32.mrf.mxu1 }
 0x1b8   : > { %v13369_v54 = vadd.f32 %v11024_v49, %v10952_v41  ;;  %v2062_v47 = vpop.f32.mrf.mxu0  ;;  %11352 = vmatpush3.bf16.msra.mxu0 %v12195_v62  ;;  %v12172_v41 = vld [vmem:[%s12656_s24 + $0x70] sm:$0xff]  }
 0x1b9   : > { %v2367_v10 = vpop.f32.mrf.mxu1  ;;  %11424 = vmatpush3.bf16.msra.mxu1 %v12196_v50 }
 0x1ba   : > { %15283 = vst [vmem:[#allocation43_spill] sm:$0xff] %v13369_v54  ;;  %v13371_v42 = vadd.f32 %v2367_v10, %v2062_v47  ;;  %v10955_v22 = vpop.f32.mrf.mxu0  ;;  %11226 = vmatmul.mubr.bf16.gmra.mxu0 %v12170_v2  ;;  %v12175_v54 = vld [vmem:[%s12656_s24 + $0x78] sm:$0xff]  }
 0x1bb   : > { %v11027_v1 = vpop.f32.mrf.mxu1  ;;  %11298 = vmatmul.mubr.bf16.gmra.mxu1 %v12170_v2  ;;  %11229 = vmatprep.mubr.bf16.mxu0 %v12171_v57 }
 0x1bc   : > { %15284 = vst [vmem:[#allocation44_spill] sm:$0xff] %v13371_v42  ;;  %v13373_v0 = vadd.f32 %v11027_v1, %v10955_v22  ;;  %v2075_v9 = vpop.f32.mrf.mxu0  ;;  %11301 = vmatprep.mubr.bf16.mxu1 %v12171_v57 }
 0x1bd   : > { %v2380_v14 = vpop.f32.mrf.mxu1 }
 0x1be   : > { %15285 = vst [vmem:[#allocation45_spill] sm:$0xff] %v13373_v0  ;;  %v13375_v49 = vadd.f32 %v2380_v14, %v2075_v9  ;;  %v10956_v28 = vpop.f32.mrf.mxu0 }
 0x1bf   : > { %v11028_v62 = vpop.f32.mrf.mxu1 }
 0x1c0   : > { %15286 = vst [vmem:[#allocation46_spill] sm:$0xff] %v13375_v49  ;;  %v13379_v50 = vadd.f32 %v11028_v62, %v10956_v28  ;;  %v2078_v47 = vpop.f32.mrf.mxu0  ;;  %v12176_v28 = vld [vmem:[%s12656_s24 + $0x80] sm:$0xff]  }
 0x1c1   : > { %v2383_v10 = vpop.f32.mrf.mxu1 }
 0x1c2   : > { %15287 = vst [vmem:[#allocation47_spill] sm:$0xff] %v13379_v50  ;;  %v13381_v42 = vadd.f32 %v2383_v10, %v2078_v47  ;;  %v10959_v2 = vpop.f32.mrf.mxu0  ;;  %11230 = vmatmul.mubr.bf16.gmra.mxu0 %v12172_v41  ;;  %v12177_v50 = vld [vmem:[%s12656_s24 + $0x88] sm:$0xff]  }
 0x1c3   : > { %v11031_v22 = vpop.f32.mrf.mxu1  ;;  %11302 = vmatmul.mubr.bf16.gmra.mxu1 %v12172_v41  ;;  %11233 = vmatprep.mubr.bf16.mxu0 %v12175_v54 }
 0x1c4   : > { %15288 = vst [vmem:[#allocation48_spill] sm:$0xff] %v13381_v42  ;;  %v13383_v57 = vadd.f32 %v11031_v22, %v10959_v2  ;;  %v2091_v1 = vpop.f32.mrf.mxu0  ;;  %11305 = vmatprep.mubr.bf16.mxu1 %v12175_v54 }
 0x1c5   : > { %v2396_v9 = vpop.f32.mrf.mxu1 }
 0x1c6   : > { %15289 = vst [vmem:[#allocation49_spill] sm:$0xff] %v13383_v57  ;;  %v13385_v14 = vadd.f32 %v2396_v9, %v2091_v1  ;;  %v10960_v49 = vpop.f32.mrf.mxu0 }
 0x1c7   : > { %v11032_v62 = vpop.f32.mrf.mxu1 }
 0x1c8   : > { %15290 = vst [vmem:[#allocation50_spill] sm:$0xff] %v13385_v14  ;;  %v13389_v0 = vadd.f32 %v11032_v62, %v10960_v49  ;;  %v2094_v47 = vpop.f32.mrf.mxu0  ;;  %v12178_v49 = vld [vmem:[%s12656_s24 + $0x90] sm:$0xff]  }
 0x1c9   : > { %v2399_v10 = vpop.f32.mrf.mxu1 }
 0x1ca   : > { %15291 = vst [vmem:[#allocation51_spill] sm:$0xff] %v13389_v0  ;;  %v13391_v42 = vadd.f32 %v2399_v10, %v2094_v47  ;;  %v10963_v41 = vpop.f32.mrf.mxu0  ;;  %11234 = vmatmul.mubr.bf16.gmra.mxu0 %v12176_v28  ;;  %v12181_v0 = vld [vmem:[%s12656_s24 + $0x98] sm:$0xff]  }
 0x1cb   : > { %v11035_v2 = vpop.f32.mrf.mxu1  ;;  %11306 = vmatmul.mubr.bf16.gmra.mxu1 %v12176_v28  ;;  %11237 = vmatprep.mubr.bf16.mxu0 %v12177_v50 }
 0x1cc   : > { %15292 = vst [vmem:[#allocation52_spill] sm:$0xff] %v13391_v42  ;;  %v13393_v54 = vadd.f32 %v11035_v2, %v10963_v41  ;;  %v2107_v22 = vpop.f32.mrf.mxu0  ;;  %11309 = vmatprep.mubr.bf16.mxu1 %v12177_v50 }
 0x1cd   : > { %v2412_v1 = vpop.f32.mrf.mxu1 }
 0x1ce   : > { %15293 = vst [vmem:[#allocation53_spill] sm:$0xff] %v13393_v54  ;;  %v13395_v9 = vadd.f32 %v2412_v1, %v2107_v22  ;;  %v10964_v14 = vpop.f32.mrf.mxu0 }
 0x1cf   : > { %v11036_v62 = vpop.f32.mrf.mxu1 }
 0x1d0   : > { %15294 = vst [vmem:[#allocation54_spill] sm:$0xff] %v13395_v9  ;;  %v13399_v57 = vadd.f32 %v11036_v62, %v10964_v14  ;;  %v2110_v47 = vpop.f32.mrf.mxu0  ;;  %v12182_v14 = vld [vmem:[%s12656_s24 + $0xa0] sm:$0xff]  }
 0x1d1   : > { %v2415_v10 = vpop.f32.mrf.mxu1 }
 0x1d2   : > { %15295 = vst [vmem:[#allocation55_spill] sm:$0xff] %v13399_v57  ;;  %v13401_v42 = vadd.f32 %v2415_v10, %v2110_v47  ;;  %v10967_v28 = vpop.f32.mrf.mxu0  ;;  %11238 = vmatmul.mubr.bf16.gmra.mxu0 %v12178_v49  ;;  %v12185_v57 = vld [vmem:[%s12656_s24 + $0xa8] sm:$0xff]  }
 0x1d3   : > { %v11039_v41 = vpop.f32.mrf.mxu1  ;;  %11310 = vmatmul.mubr.bf16.gmra.mxu1 %v12178_v49  ;;  %11241 = vmatprep.mubr.bf16.mxu0 %v12181_v0 }
 0x1d4   : > { %15296 = vst [vmem:[#allocation56_spill] sm:$0xff] %v13401_v42  ;;  %v13403_v50 = vadd.f32 %v11039_v41, %v10967_v28  ;;  %v2123_v2 = vpop.f32.mrf.mxu0  ;;  %11313 = vmatprep.mubr.bf16.mxu1 %v12181_v0 }
 0x1d5   : > { %v2428_v22 = vpop.f32.mrf.mxu1 }
 0x1d6   : > { %15297 = vst [vmem:[#allocation57_spill] sm:$0xff] %v13403_v50  ;;  %v13405_v1 = vadd.f32 %v2428_v22, %v2123_v2  ;;  %v10968_v9 = vpop.f32.mrf.mxu0 }
 0x1d7   : > { %v11040_v62 = vpop.f32.mrf.mxu1 }
 0x1d8   : > { %15298 = vst [vmem:[#allocation58_spill] sm:$0xff] %v13405_v1  ;;  %v13409_v54 = vadd.f32 %v11040_v62, %v10968_v9  ;;  %v2126_v47 = vpop.f32.mrf.mxu0  ;;  %v12186_v9 = vld [vmem:[%s12656_s24 + $0xb0] sm:$0xff]  }
 0x1d9   : > { %v2431_v10 = vpop.f32.mrf.mxu1 }
 0x1da   : > { %15299 = vst [vmem:[#allocation59_spill] sm:$0xff] %v13409_v54  ;;  %v13411_v42 = vadd.f32 %v2431_v10, %v2126_v47  ;;  %v10971_v49 = vpop.f32.mrf.mxu0  ;;  %11242 = vmatmul.mubr.bf16.gmra.mxu0 %v12182_v14  ;;  %v12187_v54 = vld [vmem:[%s12656_s24 + $0xb8] sm:$0xff]  }
 0x1db   : > { %v11043_v28 = vpop.f32.mrf.mxu1  ;;  %11314 = vmatmul.mubr.bf16.gmra.mxu1 %v12182_v14  ;;  %11245 = vmatprep.mubr.bf16.mxu0 %v12185_v57 }
 0x1dc   : > { %15300 = vst [vmem:[#allocation60_spill] sm:$0xff] %v13411_v42  ;;  %v13413_v0 = vadd.f32 %v11043_v28, %v10971_v49  ;;  %v2139_v41 = vpop.f32.mrf.mxu0  ;;  %11317 = vmatprep.mubr.bf16.mxu1 %v12185_v57 }
 0x1dd   : > { %v2444_v2 = vpop.f32.mrf.mxu1 }
 0x1de   : > { %15301 = vst [vmem:[#allocation61_spill] sm:$0xff] %v13413_v0  ;;  %v13415_v22 = vadd.f32 %v2444_v2, %v2139_v41  ;;  %v10972_v1 = vpop.f32.mrf.mxu0 }
 0x1df   : > { %v11044_v62 = vpop.f32.mrf.mxu1 }
 0x1e0   : > { %15302 = vst [vmem:[#allocation62_spill] sm:$0xff] %v13415_v22  ;;  %v13419_v50 = vadd.f32 %v11044_v62, %v10972_v1  ;;  %v2142_v47 = vpop.f32.mrf.mxu0  ;;  %v12188_v1 = vld [vmem:[%s12656_s24 + $0xc0] sm:$0xff]  }
 0x1e1   : > { %v2447_v10 = vpop.f32.mrf.mxu1 }
 0x1e2   : > { %15303 = vst [vmem:[#allocation63_spill] sm:$0xff] %v13419_v50  ;;  %v13421_v42 = vadd.f32 %v2447_v10, %v2142_v47  ;;  %v10975_v14 = vpop.f32.mrf.mxu0  ;;  %11246 = vmatmul.mubr.bf16.gmra.mxu0 %v12186_v9  ;;  %v12191_v50 = vld [vmem:[%s12656_s24 + $0xc8] sm:$0xff]  }
 0x1e3   : > { %v11047_v49 = vpop.f32.mrf.mxu1  ;;  %11318 = vmatmul.mubr.bf16.gmra.mxu1 %v12186_v9  ;;  %11249 = vmatprep.mubr.bf16.mxu0 %v12187_v54 }
 0x1e4   : > { %15304 = vst [vmem:[#allocation64_spill] sm:$0xff] %v13421_v42  ;;  %v13423_v57 = vadd.f32 %v11047_v49, %v10975_v14  ;;  %v2155_v28 = vpop.f32.mrf.mxu0  ;;  %11321 = vmatprep.mubr.bf16.mxu1 %v12187_v54 }
 0x1e5   : > { %v2460_v41 = vpop.f32.mrf.mxu1 }
 0x1e6   : > { %v13425_v2 = vadd.f32 %v2460_v41, %v2155_v28  ;;  %v10976_v22 = vpop.f32.mrf.mxu0 }
 0x1e7   : > { %v11048_v62 = vpop.f32.mrf.mxu1 }
 0x1e8   : > { %v13429_v0 = vadd.f32 %v11048_v62, %v10976_v22  ;;  %v2158_v47 = vpop.f32.mrf.mxu0 }
 0x1e9   : > { %v2463_v10 = vpop.f32.mrf.mxu1 }
 0x1ea   : > { %v13431_v42 = vadd.f32 %v2463_v10, %v2158_v47  ;;  %v11067_v9 = vpop.f32.mrf.mxu0  ;;  %11250 = vmatmul.mubr.bf16.gmra.mxu0 %v12188_v1  ;;  %v12192_v10 = vld [vmem:[%s12656_s24 + $0xd0] sm:$0xff]  }
 0x1eb   : > { %v13434_v14 = vadd.f32 %v11067_v9, %v13047_v7  ;;  %v11139_v54 = vpop.f32.mrf.mxu1  ;;  %11322 = vmatmul.mubr.bf16.gmra.mxu1 %v12188_v1  ;;  %11253 = vmatprep.mubr.bf16.mxu0 %v12191_v50  ;;  %v12193_v1 = vld [vmem:[%s12656_s24 + $0xd8] sm:$0xff]  }
 0x1ec   : > { %v13437_v49 = vadd.f32 %v11139_v54, %v13249_v29  ;;  %v2799_v28 = vpop.f32.mrf.mxu0  ;;  %11325 = vmatprep.mubr.bf16.mxu1 %v12191_v50 }
 0x1ed   : > { %15305 = vst [vmem:[#allocation65_spill] sm:$0xff] %v13434_v14  ;;  %v13440_v22 = vadd.f32 %v2799_v28, %v13050_v12  ;;  %v3177_v41 = vpop.f32.mrf.mxu1 }
 0x1ee   : > { %v13443_v62 = vadd.f32 %v3177_v41, %v13251_v11  ;;  %v11068_v47 = vpop.f32.mrf.mxu0 }
 0x1ef   : > { %v13447_v7 = vadd.f32 %v11068_v47, %v13052_v17  ;;  %v11140_v9 = vpop.f32.mrf.mxu1 }
 0x1f0   : > { %v13451_v14 = vadd.f32 %v11140_v9, %v13255_v31  ;;  %v2802_v29 = vpop.f32.mrf.mxu0 }
 0x1f1   : > { %v13454_v50 = vadd.f32 %v2802_v29, %v13054_v20  ;;  %v3180_v12 = vpop.f32.mrf.mxu1  ;;  %v12194_v29 = vld [vmem:[%s12656_s24 + $0xe0] sm:$0xff]  }
 0x1f2   : > { %v13457_v54 = vadd.f32 %v3180_v12, %v13257_v56  ;;  %v11071_v11 = vpop.f32.mrf.mxu0  ;;  %11254 = vmatmul.mubr.bf16.gmra.mxu0 %v12192_v10 }
 0x1f3   : > { %15306 = vst [vmem:[#allocation66_spill] sm:$0xff] %v13454_v50  ;;  %v13460_v17 = vadd.f32 %v11071_v11, %v13059_v24  ;;  %v11143_v28 = vpop.f32.mrf.mxu1  ;;  %11326 = vmatmul.mubr.bf16.gmra.mxu1 %v12192_v10  ;;  %11257 = vmatprep.mubr.bf16.mxu0 %v12193_v1  ;;  %v12197_v10 = vld [vmem:[%s12656_s24 + $0xe8] sm:$0xff]  }
 0x1f4   : > { %15307 = vst [vmem:[#allocation67_spill] sm:$0xff] %v13457_v54  ;;  %v13463_v31 = vadd.f32 %v11143_v28, %v13259_v37  ;;  %v2815_v41 = vpop.f32.mrf.mxu0  ;;  %11329 = vmatprep.mubr.bf16.mxu1 %v12193_v1  ;;  %v15337_v54 = vld [vmem:[#allocation43_spill] sm:$0xff] }
 0x1f5   : > { %v13466_v20 = vadd.f32 %v2815_v41, %v13062_v27  ;;  %v3193_v47 = vpop.f32.mrf.mxu1 }
 0x1f6   : > { %v13469_v56 = vadd.f32 %v3193_v47, %v13261_v16  ;;  %v11072_v9 = vpop.f32.mrf.mxu0 }
 0x1f7   : > { %v13473_v24 = vadd.f32 %v11072_v9, %v13064_v30  ;;  %v11144_v12 = vpop.f32.mrf.mxu1 }
 0x1f8   : > { %v13477_v11 = vadd.f32 %v11144_v12, %v13265_v45  ;;  %v2818_v37 = vpop.f32.mrf.mxu0 }
 0x1f9   : > { %v13480_v1 = vadd.f32 %v2818_v37, %v13066_v33  ;;  %v3196_v27 = vpop.f32.mrf.mxu1  ;;  %v12198_v37 = vld [vmem:[%s12656_s24 + $0xf0] sm:$0xff]  }
 0x1fa   : > { %v13483_v28 = vadd.f32 %v3196_v27, %v13267_v4  ;;  %v11075_v16 = vpop.f32.mrf.mxu0  ;;  %11258 = vmatmul.mubr.bf16.gmra.mxu0 %v12194_v29 }
 0x1fb   : > { %15308 = vst [vmem:[#allocation68_spill] sm:$0xff] %v13480_v1  ;;  %v13486_v30 = vadd.f32 %v11075_v16, %v13071_v36  ;;  %v11147_v41 = vpop.f32.mrf.mxu1  ;;  %11330 = vmatmul.mubr.bf16.gmra.mxu1 %v12194_v29  ;;  %11261 = vmatprep.mubr.bf16.mxu0 %v12197_v10  ;;  %v12199_v29 = vld [vmem:[%s12656_s24 + $0x20] sm:$0xff]   ;;  %v15335_v1 = vld [vmem:[#allocation12_spill] sm:$0xff] }
 0x1fc   : > { %15309 = vst [vmem:[#allocation69_spill] sm:$0xff] %v13483_v28  ;;  %v13489_v45 = vadd.f32 %v11147_v41, %v13269_v59  ;;  %v2831_v47 = vpop.f32.mrf.mxu0  ;;  %11333 = vmatprep.mubr.bf16.mxu1 %v12197_v10 }
 0x1fd   : > { %v13492_v33 = vadd.f32 %v2831_v47, %v13075_v40  ;;  %v3209_v9 = vpop.f32.mrf.mxu1 }
 0x1fe   : > { %v13495_v4 = vadd.f32 %v3209_v9, %v13271_v51  ;;  %v11076_v12 = vpop.f32.mrf.mxu0 }
 0x1ff   : > { %v13499_v36 = vadd.f32 %v11076_v12, %v13077_v43  ;;  %v11148_v27 = vpop.f32.mrf.mxu1 }
 0x200   : > { %v13503_v16 = vadd.f32 %v11148_v27, %v13275_v26  ;;  %v2834_v59 = vpop.f32.mrf.mxu0 }
 0x201   : > { %v13506_v10 = vadd.f32 %v2834_v59, %v13079_v48  ;;  %v3212_v40 = vpop.f32.mrf.mxu1  ;;  %v12200_v59 = vld [vmem:[%s12656_s24 + $0x28] sm:$0xff]  }
 0x202   : > { %v13509_v41 = vadd.f32 %v3212_v40, %v13277_v13  ;;  %v11079_v51 = vpop.f32.mrf.mxu0  ;;  %11262 = vmatmul.mubr.bf16.gmra.mxu0 %v12198_v37 }
 0x203   : > { %15310 = vst [vmem:[#allocation70_spill] sm:$0xff] %v13506_v10  ;;  %v13512_v43 = vadd.f32 %v11079_v51, %v13083_v52  ;;  %v11151_v47 = vpop.f32.mrf.mxu1  ;;  %11334 = vmatmul.mubr.bf16.gmra.mxu1 %v12198_v37  ;;  %11353 = vmatprep.mubr.bf16.mxu0 %v12199_v29  ;;  %v12201_v37 = vld [vmem:[%s12656_s24 + $0x30] sm:$0xff]  }
 0x204   : > { %15311 = vst [vmem:[#allocation71_spill] sm:$0xff] %v13509_v41  ;;  %v13515_v26 = vadd.f32 %v11151_v47, %v13279_v63  ;;  %v2847_v9 = vpop.f32.mrf.mxu0  ;;  %11425 = vmatprep.mubr.bf16.mxu1 %v12199_v29  ;;  %v15325_v41 = vld [vmem:[#allocation41_spill] sm:$0xff] }
 0x205   : > { %v13518_v48 = vadd.f32 %v2847_v9, %v13086_v60  ;;  %v3225_v12 = vpop.f32.mrf.mxu1 }
 0x206   : > { %v13521_v13 = vadd.f32 %v3225_v12, %v13281_v21  ;;  %v11080_v27 = vpop.f32.mrf.mxu0 }
 0x207   : > { %v13525_v52 = vadd.f32 %v11080_v27, %v13088_v15  ;;  %v11152_v40 = vpop.f32.mrf.mxu1 }
 0x208   : > { %v13529_v51 = vadd.f32 %v11152_v40, %v13284_v53  ;;  %v2850_v63 = vpop.f32.mrf.mxu0 }
 0x209   : > { %v13532_v29 = vadd.f32 %v2850_v63, %v13094_v44  ;;  %v3228_v60 = vpop.f32.mrf.mxu1  ;;  %v12202_v63 = vld [vmem:[%s12656_s24 + $0x38] sm:$0xff]  }
 0x20a   : > { %v13535_v47 = vadd.f32 %v3228_v60, %v13290_v3  ;;  %v11083_v21 = vpop.f32.mrf.mxu0  ;;  %11354 = vmatmul.mubr.bf16.vlgmr.msra.gmra.mxu0 %v12200_v59 }
 0x20b   : > { %15312 = vst [vmem:[#allocation72_spill] sm:$0xff] %v13532_v29  ;;  %v13538_v15 = vadd.f32 %v11083_v21, %v13106_v58  ;;  %v11155_v9 = vpop.f32.mrf.mxu1  ;;  %11426 = vmatmul.mubr.bf16.vlgmr.msra.gmra.mxu1 %v12200_v59  ;;  %11357 = vmatprep.mubr.bf16.mxu0 %v12201_v37  ;;  %v12203_v59 = vld [vmem:[%s12656_s24 + $0x40] sm:$0xff]   ;;  %v15324_v29 = vld [vmem:[#allocation8_spill] sm:$0xff] }
 0x20c   : > { %15313 = vst [vmem:[#allocation73_spill] sm:$0xff] %v13535_v47  ;;  %v13541_v53 = vadd.f32 %v11155_v9, %v13296_v61  ;;  %v2863_v12 = vpop.f32.mrf.mxu0  ;;  %11429 = vmatprep.mubr.bf16.mxu1 %v12201_v37  ;;  %v12206_v47 = vld [vmem:[%s12656_s24 + $0x58] sm:$0xff]  }
 0x20d   : > { %v13544_v44 = vadd.f32 %v2863_v12, %v13111_v5  ;;  %v3241_v27 = vpop.f32.mrf.mxu1 }
 0x20e   : > { %v13547_v3 = vadd.f32 %v3241_v27, %v13305_v19  ;;  %v11084_v40 = vpop.f32.mrf.mxu0 }
 0x20f   : > { %v13551_v58 = vadd.f32 %v11084_v40, %v13113_v8  ;;  %v11156_v60 = vpop.f32.mrf.mxu1 }
 0x210   : > { %v13555_v21 = vadd.f32 %v11156_v60, %v13309_v55  ;;  %v2866_v61 = vpop.f32.mrf.mxu0 }
 0x211   : > { %v13558_v37 = vadd.f32 %v2866_v61, %v13121_v18  ;;  %v3244_v5 = vpop.f32.mrf.mxu1  ;;  %v12204_v61 = vld [vmem:[%s12656_s24 + $0x48] sm:$0xff]  }
 0x212   : > { %v13561_v9 = vadd.f32 %v3244_v5, %v13314_v32  ;;  %v11087_v19 = vpop.f32.mrf.mxu0  ;;  %11358 = vmatmul.mubr.bf16.gmra.mxu0 %v12202_v63 }
 0x213   : > { %15314 = vst [vmem:[#allocation74_spill] sm:$0xff] %v13558_v37  ;;  %v13564_v8 = vadd.f32 %v11087_v19, %v13126_v25  ;;  %v11159_v12 = vpop.f32.mrf.mxu1  ;;  %11430 = vmatmul.mubr.bf16.gmra.mxu1 %v12202_v63  ;;  %11361 = vmatprep.mubr.bf16.mxu0 %v12203_v59  ;;  %v12205_v63 = vld [vmem:[%s12656_s24 + $0x50] sm:$0xff]  }
 0x214   : > { %15315 = vst [vmem:[#allocation75_spill] sm:$0xff] %v13561_v9  ;;  %v13567_v55 = vadd.f32 %v11159_v12, %v13319_v35  ;;  %v2879_v27 = vpop.f32.mrf.mxu0  ;;  %11433 = vmatprep.mubr.bf16.mxu1 %v12203_v59  ;;  %v15316_v12 = vld [vmem:[#allocation5_spill] sm:$0xff] }
 0x215   : > { %v13570_v18 = vadd.f32 %v2879_v27, %v13133_v34  ;;  %v3257_v40 = vpop.f32.mrf.mxu1  ;;  %v15318_v27 = vld [vmem:[#allocation38_spill] sm:$0xff] }
 0x216   : > { %v13573_v32 = vadd.f32 %v3257_v40, %v13324_v46  ;;  %v11088_v60 = vpop.f32.mrf.mxu0  ;;  %v15320_v40 = vld [vmem:[#allocation6_spill] sm:$0xff] }
 0x217   : > { %v13577_v25 = vadd.f32 %v11088_v60, %v13135_v38  ;;  %v11160_v5 = vpop.f32.mrf.mxu1 }
 0x218   : > { %v13581_v19 = vadd.f32 %v11160_v5, %v13331_v23  ;;  %v2882_v35 = vpop.f32.mrf.mxu0  ;;  %v15321_v23 = vld [vmem:[#allocation39_spill] sm:$0xff] }
 0x219   : > { %v13584_v59 = vadd.f32 %v2882_v35, %v15316_v12  ;;  %v3260_v34 = vpop.f32.mrf.mxu1  ;;  %v15322_v35 = vld [vmem:[#allocation7_spill] sm:$0xff] }
 0x21a   : > { %v13587_v9 = vadd.f32 %v3260_v34, %v15318_v27  ;;  %v11091_v46 = vpop.f32.mrf.mxu0  ;;  %11362 = vmatmul.mubr.bf16.gmra.mxu0 %v12204_v61  ;;  %v15323_v34 = vld [vmem:[#allocation40_spill] sm:$0xff] }
 0x21b   : > { %15317 = vst [vmem:[#allocation5_spill] sm:$0xff] %v13584_v59  ;;  %v13590_v38 = vadd.f32 %v11091_v46, %v15320_v40  ;;  %v11163_v60 = vpop.f32.mrf.mxu1  ;;  %11434 = vmatmul.mubr.bf16.gmra.mxu1 %v12204_v61  ;;  %11365 = vmatprep.mubr.bf16.mxu0 %v12205_v63  ;;  %v12207_v61 = vld [vmem:[%s12656_s24 + $0x60] sm:$0xff]  }
 0x21c   : > { %15319 = vst [vmem:[#allocation38_spill] sm:$0xff] %v13587_v9  ;;  %v13593_v5 = vadd.f32 %v11163_v60, %v15321_v23  ;;  %v2895_v37 = vpop.f32.mrf.mxu0  ;;  %11437 = vmatprep.mubr.bf16.mxu1 %v12205_v63  ;;  %v15326_v23 = vld [vmem:[#allocation9_spill] sm:$0xff] }
 0x21d   : > { %v13596_v12 = vadd.f32 %v2895_v37, %v15322_v35  ;;  %v3273_v59 = vpop.f32.mrf.mxu1  ;;  %v15328_v35 = vld [vmem:[#allocation42_spill] sm:$0xff] }
 0x21e   : > { %v13599_v27 = vadd.f32 %v3273_v59, %v15323_v34  ;;  %v11092_v9 = vpop.f32.mrf.mxu0  ;;  %v15330_v34 = vld [vmem:[#allocation10_spill] sm:$0xff] }
 0x21f   : > { %v13603_v46 = vadd.f32 %v11092_v9, %v15324_v29  ;;  %v11164_v40 = vpop.f32.mrf.mxu1 }
 0x220   : > { %v13607_v10 = vadd.f32 %v11164_v40, %v15325_v41  ;;  %v2898_v60 = vpop.f32.mrf.mxu0 }
 0x221   : > { %v13610_v63 = vadd.f32 %v2898_v60, %v15326_v23  ;;  %v3276_v37 = vpop.f32.mrf.mxu1  ;;  %v15332_v60 = vld [vmem:[#allocation11_spill] sm:$0xff] }
 0x222   : > { %v13613_v28 = vadd.f32 %v3276_v37, %v15328_v35  ;;  %v11095_v59 = vpop.f32.mrf.mxu0  ;;  %11366 = vmatmul.mubr.bf16.gmra.mxu0 %v12206_v47 }
 0x223   : > { %15327 = vst [vmem:[#allocation6_spill] sm:$0xff] %v13610_v63  ;;  %v13616_v29 = vadd.f32 %v11095_v59, %v15330_v34  ;;  %v11167_v9 = vpop.f32.mrf.mxu1  ;;  %11438 = vmatmul.mubr.bf16.gmra.mxu1 %v12206_v47  ;;  %11369 = vmatprep.mubr.bf16.mxu0 %v12207_v61  ;;  %v12209_v47 = vld [vmem:[%s12656_s24 + $0x70] sm:$0xff]  }
 0x224   : > { %15329 = vst [vmem:[#allocation39_spill] sm:$0xff] %v13613_v28  ;;  %v13619_v41 = vadd.f32 %v11167_v9, %v13363_v6  ;;  %v2911_v40 = vpop.f32.mrf.mxu0  ;;  %11441 = vmatprep.mubr.bf16.mxu1 %v12207_v61  ;;  %v12208_v28 = vld [vmem:[%s12656_s24 + $0x68] sm:$0xff]   ;;  %v12227_v61 = vld [vmem:[%s15232_s4 + $0x78] sm:$0xff]  }
 0x225   : > { %v13622_v23 = vadd.f32 %v2911_v40, %v15332_v60  ;;  %v3289_v63 = vpop.f32.mrf.mxu1  ;;  %11481 = vmatprep.subr.bf16.mxu0 %v12227_v61 }
 0x226   : > { %15331 = vst [vmem:[#allocation7_spill] sm:$0xff] %v13619_v41  ;;  %v13625_v37 = vadd.f32 %v3289_v63, %v13365_v39  ;;  %v11096_v35 = vpop.f32.mrf.mxu0  ;;  %v12228_v39 = vld [vmem:[%s15232_s4 + $0x38] sm:$0xff]   ;;  %11482 = vmatpush3.bf16.msra.mxu0 %v12227_v61 }
 0x227   : > { %15333 = vst [vmem:[#allocation40_spill] sm:$0xff] %v13622_v23  ;;  %v13629_v59 = vadd.f32 %v11096_v35, %v15335_v1  ;;  %v11168_v34 = vpop.f32.mrf.mxu1  ;;  %v15339_v63 = vld [vmem:[#allocation13_spill] sm:$0xff]  ;;  %v15341_v1 = vld [vmem:[#allocation44_spill] sm:$0xff]  ;;  %11517 = vmatprep.subr.bf16.mxu1 %v12228_v39 }
 0x228   : > { %15334 = vst [vmem:[#allocation8_spill] sm:$0xff] %v13625_v37  ;;  %v13633_v50 = vadd.f32 %v11168_v34, %v15337_v54  ;;  %v2914_v6 = vpop.f32.mrf.mxu0  ;;  %v15343_v54 = vld [vmem:[#allocation14_spill] sm:$0xff]  ;;  %11518 = vmatpush3.bf16.msra.mxu1 %v12228_v39  ;;  %v15355_v41 = vld [vmem:[#allocation17_spill] sm:$0xff]  ;;  %v15357_v39 = vld [vmem:[#allocation48_spill] sm:$0xff] }
 0x229   : > { %15336 = vst [vmem:[#allocation41_spill] sm:$0xff] %v13629_v59  ;;  %v13642_v9 = vadd.f32 %v2914_v6, %v15339_v63  ;;  %v3292_v40 = vpop.f32.mrf.mxu1  ;;  %v15345_v59 = vld [vmem:[#allocation45_spill] sm:$0xff]  ;;  %v15347_v63 = vld [vmem:[#allocation15_spill] sm:$0xff] }
 0x22a   : > { %15338 = vst [vmem:[#allocation9_spill] sm:$0xff] %v13633_v50  ;;  %v13645_v60 = vadd.f32 %v3292_v40, %v15341_v1  ;;  %v11099_v35 = vpop.f32.mrf.mxu0  ;;  %11370 = vmatmul.mubr.bf16.gmra.mxu0 %v12208_v28 }
 0x22b   : > { %15340 = vst [vmem:[#allocation42_spill] sm:$0xff] %v13642_v9  ;;  %v13648_v34 = vadd.f32 %v11099_v35, %v15343_v54  ;;  %v11171_v50 = vpop.f32.mrf.mxu1  ;;  %11442 = vmatmul.mubr.bf16.gmra.mxu1 %v12208_v28  ;;  %11373 = vmatprep.mubr.bf16.mxu0 %v12209_v47  ;;  %v12210_v54 = vld [vmem:[%s12656_s24 + $0x78] sm:$0xff]  }
 0x22c   : > { %15342 = vst [vmem:[#allocation10_spill] sm:$0xff] %v13645_v60  ;;  %v13651_v37 = vadd.f32 %v11171_v50, %v15345_v59  ;;  %v2927_v6 = vpop.f32.mrf.mxu0  ;;  %11445 = vmatprep.mubr.bf16.mxu1 %v12209_v47  ;;  %v15349_v60 = vld [vmem:[#allocation46_spill] sm:$0xff]  ;;  %v12211_v50 = vld [vmem:[%s12656_s24 + $0x80] sm:$0xff]   ;;  %v15353_v59 = vld [vmem:[#allocation47_spill] sm:$0xff] }
 0x22d   : > { %15344 = vst [vmem:[#allocation11_spill] sm:$0xff] %v13648_v34  ;;  %v13654_v40 = vadd.f32 %v2927_v6, %v15347_v63  ;;  %v3305_v1 = vpop.f32.mrf.mxu1  ;;  %v15351_v34 = vld [vmem:[#allocation16_spill] sm:$0xff] }
 0x22e   : > { %15346 = vst [vmem:[#allocation12_spill] sm:$0xff] %v13651_v37  ;;  %v13657_v9 = vadd.f32 %v3305_v1, %v15349_v60  ;;  %v11100_v35 = vpop.f32.mrf.mxu0  ;;  %v15359_v1 = vld [vmem:[#allocation18_spill] sm:$0xff] }
 0x22f   : > { %15348 = vst [vmem:[#allocation43_spill] sm:$0xff] %v13654_v40  ;;  %v13661_v28 = vadd.f32 %v11100_v35, %v15351_v34  ;;  %v11172_v23 = vpop.f32.mrf.mxu1 }
 0x230   : > { %15350 = vst [vmem:[#allocation13_spill] sm:$0xff] %v13657_v9  ;;  %v13665_v37 = vadd.f32 %v11172_v23, %v15353_v59  ;;  %v2930_v47 = vpop.f32.mrf.mxu0  ;;  %v15361_v23 = vld [vmem:[#allocation49_spill] sm:$0xff] }
 0x231   : > { %15352 = vst [vmem:[#allocation44_spill] sm:$0xff] %v13661_v28  ;;  %v13668_v6 = vadd.f32 %v2930_v47, %v15355_v41  ;;  %v3308_v61 = vpop.f32.mrf.mxu1  ;;  %v15363_v41 = vld [vmem:[#allocation19_spill] sm:$0xff]  ;;  %v15383_v28 = vld [vmem:[#allocation24_spill] sm:$0xff] }
 0x232   : > { %15354 = vst [vmem:[#allocation14_spill] sm:$0xff] %v13665_v37  ;;  %v13671_v63 = vadd.f32 %v3308_v61, %v15357_v39  ;;  %v11103_v60 = vpop.f32.mrf.mxu0  ;;  %11374 = vmatmul.mubr.bf16.gmra.mxu0 %v12210_v54  ;;  %v15365_v61 = vld [vmem:[#allocation50_spill] sm:$0xff] }
 0x233   : > { %15356 = vst [vmem:[#allocation45_spill] sm:$0xff] %v13668_v6  ;;  %v13674_v9 = vadd.f32 %v11103_v60, %v15359_v1  ;;  %v11175_v34 = vpop.f32.mrf.mxu1  ;;  %11446 = vmatmul.mubr.bf16.gmra.mxu1 %v12210_v54  ;;  %11377 = vmatprep.mubr.bf16.mxu0 %v12211_v50  ;;  %v12212_v37 = vld [vmem:[%s12656_s24 + $0x88] sm:$0xff]   ;;  %v12229_v60 = vld [vmem:[%s15232_s4 + $0x70] sm:$0xff]  }
 0x234   : > { %15358 = vst [vmem:[#allocation15_spill] sm:$0xff] %v13671_v63  ;;  %v13677_v35 = vadd.f32 %v11175_v34, %v15361_v23  ;;  %v2943_v59 = vpop.f32.mrf.mxu0  ;;  %11449 = vmatprep.mubr.bf16.mxu1 %v12211_v50  ;;  %v12230_v54 = vld [vmem:[%s15232_s4 + $0x30] sm:$0xff]   ;;  %v12213_v23 = vld [vmem:[%s12656_s24 + $0x90] sm:$0xff]   ;;  %11483 = vmatprep.subr.bf16.mxu0 %v12229_v60 }
 0x235   : > { %15360 = vst [vmem:[#allocation46_spill] sm:$0xff] %v13674_v9  ;;  %v13680_v47 = vadd.f32 %v2943_v59, %v15363_v41  ;;  %v3321_v6 = vpop.f32.mrf.mxu1  ;;  %v15367_v1 = vld [vmem:[#allocation20_spill] sm:$0xff]  ;;  %v15369_v59 = vld [vmem:[#allocation51_spill] sm:$0xff]  ;;  %11519 = vmatprep.subr.bf16.mxu1 %v12230_v54  ;;  %11484 = vmatpush3.bf16.msra.mxu0 %v12229_v60 }
 0x236   : > { %15362 = vst [vmem:[#allocation16_spill] sm:$0xff] %v13677_v35  ;;  %v13683_v39 = vadd.f32 %v3321_v6, %v15365_v61  ;;  %v11104_v63 = vpop.f32.mrf.mxu0  ;;  %v15371_v61 = vld [vmem:[#allocation21_spill] sm:$0xff]  ;;  %11520 = vmatpush3.bf16.msra.mxu1 %v12230_v54  ;;  %v15373_v35 = vld [vmem:[#allocation52_spill] sm:$0xff]  ;;  %v15379_v60 = vld [vmem:[#allocation23_spill] sm:$0xff] }
 0x237   : > { %15364 = vst [vmem:[#allocation47_spill] sm:$0xff] %v13680_v47  ;;  %v13693_v34 = vadd.f32 %v11104_v63, %v15367_v1  ;;  %v11176_v50 = vpop.f32.mrf.mxu1  ;;  %v15375_v1 = vld [vmem:[#allocation22_spill] sm:$0xff] }
 0x238   : > { %15366 = vst [vmem:[#allocation17_spill] sm:$0xff] %v13683_v39  ;;  %v13697_v41 = vadd.f32 %v11176_v50, %v15369_v59  ;;  %v2946_v6 = vpop.f32.mrf.mxu0  ;;  %v15377_v59 = vld [vmem:[#allocation53_spill] sm:$0xff] }
 0x239   : > { %15368 = vst [vmem:[#allocation48_spill] sm:$0xff] %v13693_v34  ;;  %v13700_v39 = vadd.f32 %v2946_v6, %v15371_v61  ;;  %v3324_v47 = vpop.f32.mrf.mxu1 }
 0x23a   : > { %15370 = vst [vmem:[#allocation18_spill] sm:$0xff] %v13697_v41  ;;  %v13703_v9 = vadd.f32 %v3324_v47, %v15373_v35  ;;  %v11107_v63 = vpop.f32.mrf.mxu0  ;;  %11378 = vmatmul.mubr.bf16.gmra.mxu0 %v12212_v37  ;;  %v15381_v35 = vld [vmem:[#allocation54_spill] sm:$0xff] }
 0x23b   : > { %15372 = vst [vmem:[#allocation49_spill] sm:$0xff] %v13700_v39  ;;  %v13706_v34 = vadd.f32 %v11107_v63, %v15375_v1  ;;  %v11179_v50 = vpop.f32.mrf.mxu1  ;;  %11450 = vmatmul.mubr.bf16.gmra.mxu1 %v12212_v37  ;;  %11381 = vmatprep.mubr.bf16.mxu0 %v12213_v23  ;;  %v12214_v39 = vld [vmem:[%s12656_s24 + $0x98] sm:$0xff]   ;;  %v12215_v37 = vld [vmem:[%s12656_s24 + $0xa0] sm:$0xff]  }
 0x23c   : > { %15374 = vst [vmem:[#allocation19_spill] sm:$0xff] %v13703_v9  ;;  %v13709_v41 = vadd.f32 %v11179_v50, %v15377_v59  ;;  %v2959_v6 = vpop.f32.mrf.mxu0  ;;  %11453 = vmatprep.mubr.bf16.mxu1 %v12213_v23  ;;  %v15387_v59 = vld [vmem:[#allocation25_spill] sm:$0xff] }
 0x23d   : > { %15376 = vst [vmem:[#allocation50_spill] sm:$0xff] %v13706_v34  ;;  %v13712_v61 = vadd.f32 %v2959_v6, %v15379_v60  ;;  %v3337_v54 = vpop.f32.mrf.mxu1  ;;  %v15385_v34 = vld [vmem:[#allocation55_spill] sm:$0xff]  ;;  %v15389_v60 = vld [vmem:[#allocation56_spill] sm:$0xff] }
 0x23e   : > { %15378 = vst [vmem:[#allocation20_spill] sm:$0xff] %v13709_v41  ;;  %v13715_v47 = vadd.f32 %v3337_v54, %v15381_v35  ;;  %v11108_v9 = vpop.f32.mrf.mxu0  ;;  %v15391_v35 = vld [vmem:[#allocation26_spill] sm:$0xff] }
 0x23f   : > { %15380 = vst [vmem:[#allocation51_spill] sm:$0xff] %v13712_v61  ;;  %v13719_v63 = vadd.f32 %v11108_v9, %v15383_v28  ;;  %v11180_v1 = vpop.f32.mrf.mxu1  ;;  %v15393_v28 = vld [vmem:[#allocation57_spill] sm:$0xff] }
 0x240   : > { %15382 = vst [vmem:[#allocation21_spill] sm:$0xff] %v13715_v47  ;;  %v13723_v40 = vadd.f32 %v11180_v1, %v15385_v34  ;;  %v2962_v50 = vpop.f32.mrf.mxu0 }
 0x241   : > { %15384 = vst [vmem:[#allocation52_spill] sm:$0xff] %v13719_v63  ;;  %v13726_v23 = vadd.f32 %v2962_v50, %v15387_v59  ;;  %v3340_v6 = vpop.f32.mrf.mxu1  ;;  %v12231_v50 = vld [vmem:[%s15232_s4 + $0x68] sm:$0xff]  }
 0x242   : > { %15386 = vst [vmem:[#allocation22_spill] sm:$0xff] %v13723_v40  ;;  %v13729_v61 = vadd.f32 %v3340_v6, %v15389_v60  ;;  %v11111_v54 = vpop.f32.mrf.mxu0  ;;  %11382 = vmatmul.mubr.bf16.gmra.mxu0 %v12214_v39  ;;  %v12232_v59 = vld [vmem:[%s15232_s4 + $0x28] sm:$0xff]   ;;  %11485 = vmatprep.subr.bf16.mxu0 %v12231_v50 }
 0x243   : > { %15388 = vst [vmem:[#allocation53_spill] sm:$0xff] %v13726_v23  ;;  %v13732_v47 = vadd.f32 %v11111_v54, %v15391_v35  ;;  %v11183_v9 = vpop.f32.mrf.mxu1  ;;  %11454 = vmatmul.mubr.bf16.gmra.mxu1 %v12214_v39  ;;  %11385 = vmatprep.mubr.bf16.mxu0 %v12215_v37  ;;  %v15395_v6 = vld [vmem:[#allocation27_spill] sm:$0xff]  ;;  %v15397_v39 = vld [vmem:[#allocation58_spill] sm:$0xff] }
 0x244   : > { %15390 = vst [vmem:[#allocation23_spill] sm:$0xff] %v13729_v61  ;;  %v13735_v34 = vadd.f32 %v11183_v9, %v15393_v28  ;;  %v2975_v1 = vpop.f32.mrf.mxu0  ;;  %11457 = vmatprep.mubr.bf16.mxu1 %v12215_v37  ;;  %v12216_v9 = vld [vmem:[%s12656_s24 + $0xa8] sm:$0xff]   ;;  %11521 = vmatprep.subr.bf16.mxu1 %v12232_v59  ;;  %v15399_v37 = vld [vmem:[#allocation28_spill] sm:$0xff] }
 0x245   : > { %15392 = vst [vmem:[#allocation54_spill] sm:$0xff] %v13732_v47  ;;  %v13744_v60 = vadd.f32 %v2975_v1, %v15395_v6  ;;  %v3353_v54 = vpop.f32.mrf.mxu1  ;;  %11486 = vmatpush3.bf16.msra.mxu0 %v12231_v50  ;;  %11522 = vmatpush3.bf16.msra.mxu1 %v12232_v59  ;;  %v15401_v47 = vld [vmem:[#allocation59_spill] sm:$0xff]  ;;  %v15403_v6 = vld [vmem:[#allocation29_spill] sm:$0xff] }
 0x246   : > { %15394 = vst [vmem:[#allocation24_spill] sm:$0xff] %v13735_v34  ;;  %v13747_v35 = vadd.f32 %v3353_v54, %v15397_v39  ;;  %v11112_v61 = vpop.f32.mrf.mxu0  ;;  %v12217_v34 = vld [vmem:[%s12656_s24 + $0xb0] sm:$0xff]   ;;  %v15405_v39 = vld [vmem:[#allocation60_spill] sm:$0xff] }
 0x247   : > { %15396 = vst [vmem:[#allocation55_spill] sm:$0xff] %v13744_v60  ;;  %v13751_v28 = vadd.f32 %v11112_v61, %v15399_v37  ;;  %v11184_v23 = vpop.f32.mrf.mxu1  ;;  %v15407_v61 = vld [vmem:[#allocation30_spill] sm:$0xff] }
 0x248   : > { %15398 = vst [vmem:[#allocation25_spill] sm:$0xff] %v13747_v35  ;;  %v13755_v40 = vadd.f32 %v11184_v23, %v15401_v47  ;;  %v2978_v1 = vpop.f32.mrf.mxu0  ;;  %v15409_v47 = vld [vmem:[#allocation61_spill] sm:$0xff] }
 0x249   : > { %15400 = vst [vmem:[#allocation56_spill] sm:$0xff] %v13751_v28  ;;  %v13758_v60 = vadd.f32 %v2978_v1, %v15403_v6  ;;  %v3356_v54 = vpop.f32.mrf.mxu1  ;;  %v15410_v1 = vld [vmem:[#allocation31_spill] sm:$0xff]  ;;  %v15413_v28 = vld [vmem:[#allocation32_spill] sm:$0xff] }
 0x24a   : > { %15402 = vst [vmem:[#allocation26_spill] sm:$0xff] %v13755_v40  ;;  %v13761_v35 = vadd.f32 %v3356_v54, %v15405_v39  ;;  %v11115_v63 = vpop.f32.mrf.mxu0  ;;  %11386 = vmatmul.mubr.bf16.gmra.mxu0 %v12216_v9  ;;  %v15412_v54 = vld [vmem:[#allocation62_spill] sm:$0xff]  ;;  %v12218_v40 = vld [vmem:[%s12656_s24 + $0xb8] sm:$0xff]  }
 0x24b   : > { %15404 = vst [vmem:[#allocation57_spill] sm:$0xff] %v13758_v60  ;;  %v13764_v37 = vadd.f32 %v11115_v63, %v15407_v61  ;;  %v11187_v50 = vpop.f32.mrf.mxu1  ;;  %11458 = vmatmul.mubr.bf16.gmra.mxu1 %v12216_v9  ;;  %11389 = vmatprep.mubr.bf16.mxu0 %v12217_v34  ;;  %v12219_v9 = vld [vmem:[%s12656_s24 + $0xc0] sm:$0xff]  }
 0x24c   : > { %15406 = vst [vmem:[#allocation27_spill] sm:$0xff] %v13761_v35  ;;  %v13767_v23 = vadd.f32 %v11187_v50, %v15409_v47  ;;  %v2991_v59 = vpop.f32.mrf.mxu0  ;;  %11461 = vmatprep.mubr.bf16.mxu1 %v12217_v34  ;;  %v15416_v47 = vld [vmem:[#allocation33_spill] sm:$0xff] }
 0x24d   : > { %15408 = vst [vmem:[#allocation58_spill] sm:$0xff] %v13764_v37  ;;  %v13770_v6 = vadd.f32 %v2991_v59, %v15410_v1  ;;  %v3369_v60 = vpop.f32.mrf.mxu1  ;;  %v15414_v37 = vld [vmem:[#allocation63_spill] sm:$0xff]  ;;  %v15418_v1 = vld [vmem:[#allocation64_spill] sm:$0xff] }
 0x24e   : > { %v13773_v39 = vadd.f32 %v3369_v60, %v15412_v54  ;;  %v11116_v35 = vpop.f32.mrf.mxu0  ;;  %v15420_v54 = vld [vmem:[#allocation34_spill] sm:$0xff] }
 0x24f   : > { %15411 = vst [vmem:[#allocation28_spill] sm:$0xff] %v13770_v6  ;;  %v13777_v63 = vadd.f32 %v11116_v35, %v15413_v28  ;;  %v11188_v61 = vpop.f32.mrf.mxu1 }
 0x250   : > { %v13781_v41 = vadd.f32 %v11188_v61, %v15414_v37  ;;  %v2994_v50 = vpop.f32.mrf.mxu0 }
 0x251   : > { %v13784_v34 = vadd.f32 %v2994_v50, %v15416_v47  ;;  %v3372_v59 = vpop.f32.mrf.mxu1  ;;  %v15422_v50 = vld [vmem:[#allocation35_spill] sm:$0xff] }
 0x252   : > { %15415 = vst [vmem:[#allocation59_spill] sm:$0xff] %v13781_v41  ;;  %v13787_v6 = vadd.f32 %v3372_v59, %v15418_v1  ;;  %v11119_v60 = vpop.f32.mrf.mxu0  ;;  %11390 = vmatmul.mubr.bf16.gmra.mxu0 %v12218_v40  ;;  %v15423_v41 = vld [vmem:[#allocation36_spill] sm:$0xff] }
 0x253   : > { %15417 = vst [vmem:[#allocation29_spill] sm:$0xff] %v13784_v34  ;;  %v13790_v35 = vadd.f32 %v11119_v60, %v15420_v54  ;;  %v11191_v28 = vpop.f32.mrf.mxu1  ;;  %11462 = vmatmul.mubr.bf16.gmra.mxu1 %v12218_v40  ;;  %11393 = vmatprep.mubr.bf16.mxu0 %v12219_v9  ;;  %v12221_v40 = vld [vmem:[%s12656_s24 + $0xd0] sm:$0xff]  }
 0x254   : > { %15419 = vst [vmem:[#allocation60_spill] sm:$0xff] %v13787_v6  ;;  %v13793_v37 = vadd.f32 %v11191_v28, %v13423_v57  ;;  %v3007_v61 = vpop.f32.mrf.mxu0  ;;  %11465 = vmatprep.mubr.bf16.mxu1 %v12219_v9  ;;  %v12220_v6 = vld [vmem:[%s12656_s24 + $0xc8] sm:$0xff]   ;;  %v15424_v28 = vld [vmem:[#allocation37_spill] sm:$0xff] }
 0x255   : > { %15421 = vst [vmem:[#allocation30_spill] sm:$0xff] %v13790_v35  ;;  %v13796_v47 = vadd.f32 %v3007_v61, %v15422_v50  ;;  %v3385_v34 = vpop.f32.mrf.mxu1 }
 0x256   : > { %v13799_v59 = vadd.f32 %v3385_v34, %v13425_v2  ;;  %v11120_v1 = vpop.f32.mrf.mxu0  ;;  %v12234_v2 = vld [vmem:[%s15232_s4 + $0x20] sm:$0xff]  }
 0x257   : > { %v13803_v60 = vadd.f32 %v11120_v1, %v15423_v41  ;;  %v11192_v54 = vpop.f32.mrf.mxu1  ;;  %v15427_v41 = vld [vmem:[#allocation65_spill] sm:$0xff]  ;;  %11523 = vmatprep.subr.bf16.mxu1 %v12234_v2 }
 0x258   : > { %v13807_v35 = vadd.f32 %v11192_v54, %v13429_v0  ;;  %v3010_v57 = vpop.f32.mrf.mxu0  ;;  %11524 = vmatpush3.bf16.msra.mxu1 %v12234_v2 }
 0x259   : > { %v13810_v9 = vadd.f32 %v3010_v57, %v15424_v28  ;;  %v3388_v61 = vpop.f32.mrf.mxu1 }
 0x25a   : > { %v13816_v34 = vadd.f32 %v3388_v61, %v13431_v42  ;;  %v11211_v50 = vpop.f32.mrf.mxu0  ;;  %11394 = vmatmul.mubr.bf16.gmra.mxu0 %v12220_v6  ;;  %v12236_v61 = vld [vmem:[%s15232_s4 + $0x18] sm:$0xff]  }
 0x25b   : > { %15425 = vst [vmem:[#allocation61_spill] sm:$0xff] %v13810_v9  ;;  %v13819_v1 = vadd.f32 %v11211_v50, %v15427_v41  ;;  %v11283_v0 = vpop.f32.mrf.mxu1  ;;  %11466 = vmatmul.mubr.bf16.gmra.mxu1 %v12220_v6  ;;  %11397 = vmatprep.mubr.bf16.mxu0 %v12221_v40  ;;  %v12222_v41 = vld [vmem:[%s12656_s24 + $0xd8] sm:$0xff]   ;;  %v12235_v9 = vld [vmem:[%s15232_s4 + $0x58] sm:$0xff]  }
 0x25c   : > { %15426 = vst [vmem:[#allocation31_spill] sm:$0xff] %v13816_v34  ;;  %v13822_v54 = vadd.f32 %v11283_v0, %v13437_v49  ;;  %v3780_v57 = vpop.f32.mrf.mxu0  ;;  %11469 = vmatprep.mubr.bf16.mxu1 %v12221_v40  ;;  %v12233_v49 = vld [vmem:[%s15232_s4 + $0x60] sm:$0xff]   ;;  %v12223_v0 = vld [vmem:[%s12656_s24 + $0xe0] sm:$0xff]   ;;  %11525 = vmatprep.subr.bf16.mxu1 %v12236_v61 }
 0x25d   : > { %v13825_v28 = vadd.f32 %v3780_v57, %v13440_v22  ;;  %v4158_v42 = vpop.f32.mrf.mxu1  ;;  %11487 = vmatprep.subr.bf16.mxu0 %v12233_v49  ;;  %11526 = vmatpush3.bf16.msra.mxu1 %v12236_v61 }
 0x25e   : > { %v13831_v50 = vadd.f32 %v4158_v42, %v13443_v62  ;;  %v11212_v6 = vpop.f32.mrf.mxu0  ;;  %11488 = vmatpush3.bf16.msra.mxu0 %v12233_v49  ;;  %v12237_v42 = vld [vmem:[%s15232_s4 + $0x10] sm:$0xff]  }
 0x25f   : > { %v13838_v40 = vadd.f32 %v11212_v6, %v13447_v7  ;;  %v11284_v22 = vpop.f32.mrf.mxu1  ;;  %11527 = vmatprep.subr.bf16.mxu1 %v12237_v42  ;;  %11489 = vmatprep.subr.bf16.mxu0 %v12235_v9 }
 0x260   : > { %v13842_v2 = vadd.f32 %v11284_v22, %v13451_v14  ;;  %v13844_v57 = vpop.f32.mrf.mxu0 }
 0x261   : > { %v13846_v62 = vpop.f32.mrf.mxu1  ;;  %11528 = vmatpush3.bf16.msra.mxu1 %v12237_v42 }
 0x262   : > { %v11215_v34 = vpop.f32.mrf.mxu0  ;;  %11398 = vmatmul.mubr.bf16.gmra.mxu0 %v12222_v41 }
 0x263   : > { %v13852_v7 = vadd.f32 %v11215_v34, %v13460_v17  ;;  %v11287_v6 = vpop.f32.mrf.mxu1  ;;  %11470 = vmatmul.mubr.bf16.gmra.mxu1 %v12222_v41  ;;  %11401 = vmatprep.mubr.bf16.mxu0 %v12223_v0  ;;  %v12238_v17 = vld [vmem:[%s15232_s4 + $0x8] sm:$0xff]   ;;  %v12224_v41 = vld [vmem:[%s12656_s24 + $0xe8] sm:$0xff]  }
 0x264   : > { %v13855_v14 = vadd.f32 %v11287_v6, %v13463_v31  ;;  %v3796_v22 = vpop.f32.mrf.mxu0  ;;  %11473 = vmatprep.mubr.bf16.mxu1 %v12223_v0  ;;  %v12225_v6 = vld [vmem:[%s12656_s24 + $0xf0] sm:$0xff]   ;;  %11529 = vmatprep.subr.bf16.mxu1 %v12238_v17 }
 0x265   : > { %v13858_v61 = vadd.f32 %v3796_v22, %v13466_v20  ;;  %v4174_v49 = vpop.f32.mrf.mxu1  ;;  %11490 = vmatpush3.bf16.msra.mxu0 %v12235_v9  ;;  %11530 = vmatpush3.bf16.msra.mxu1 %v12238_v17 }
 0x266   : > { %v13867_v34 = vadd.f32 %v4174_v49, %v13469_v56  ;;  %v11216_v31 = vpop.f32.mrf.mxu0  ;;  %v12240_v56 = vld [vmem:[%s15232_s4 + $0x50] sm:$0xff]  }
 0x267   : > { %15428 = vst [vmem:[#allocation62_spill] sm:$0xff] %v13858_v61  ;;  %v13871_v0 = vadd.f32 %v11216_v31, %v13473_v24  ;;  %v11288_v20 = vpop.f32.mrf.mxu1  ;;  %v12241_v24 = vld [vmem:[%s15232_s4] sm:$0xff]   ;;  %11491 = vmatprep.subr.bf16.mxu0 %v12240_v56 }
 0x268   : > { %v13875_v22 = vadd.f32 %v11288_v20, %v13477_v11  ;;  %v13877_v42 = vpop.f32.mrf.mxu0  ;;  %11531 = vmatprep.subr.bf16.mxu1 %v12241_v24 }
 0x269   : > { %v13879_v61 = vpop.f32.mrf.mxu1  ;;  %11492 = vmatpush3.bf16.msra.mxu0 %v12240_v56  ;;  %11532 = vmatpush3.bf16.msra.mxu1 %v12241_v24 }
 0x26a   : > { %15429 = vst [vmem:[#allocation32_spill] sm:$0xff] %v13875_v22  ;;  %v11219_v49 = vpop.f32.mrf.mxu0  ;;  %11402 = vmatmul.mubr.bf16.gmra.mxu0 %v12224_v41 }
 0x26b   : > { %v13888_v11 = vadd.f32 %v11219_v49, %v13486_v30  ;;  %v11291_v31 = vpop.f32.mrf.mxu1  ;;  %11474 = vmatmul.mubr.bf16.gmra.mxu1 %v12224_v41  ;;  %11405 = vmatprep.mubr.bf16.mxu0 %v12225_v6  ;;  %v12242_v30 = vld [vmem:[%s15232_s4 + $0x48] sm:$0xff]  }
 0x26c   : > { %v13891_v9 = vadd.f32 %v11291_v31, %v13489_v45  ;;  %v3812_v17 = vpop.f32.mrf.mxu0  ;;  %11477 = vmatprep.mubr.bf16.mxu1 %v12225_v6  ;;  %11493 = vmatprep.subr.bf16.mxu0 %v12242_v30 }
 0x26d   : > { %15430 = vst [vmem:[#allocation63_spill] sm:$0xff] %v13888_v11  ;;  %v13894_v20 = vadd.f32 %v3812_v17, %v13492_v33  ;;  %v4190_v22 = vpop.f32.mrf.mxu1  ;;  %v12226_v11 = vld [vmem:[%s12656_s24 + $0xf8] sm:$0xff]   ;;  %11494 = vmatpush3.bf16.msra.mxu0 %v12242_v30 }
 0x26e   : > { %v13900_v49 = vadd.f32 %v4190_v22, %v13495_v4  ;;  %v11220_v41 = vpop.f32.mrf.mxu0  ;;  %v12245_v4 = vld [vmem:[%s15232_s4 + $0x40] sm:$0xff]  }
 0x26f   : > { %v13904_v45 = vadd.f32 %v11220_v41, %v13499_v36  ;;  %v11292_v6 = vpop.f32.mrf.mxu1  ;;  %11495 = vmatprep.subr.bf16.mxu0 %v12245_v4 }
 0x270   : > { %v13907_v33 = vadd.f32 %v11292_v6, %v13503_v16  ;;  %v13909_v31 = vpop.f32.mrf.mxu0 }
 0x271   : > { %v13911_v56 = vpop.f32.mrf.mxu1  ;;  %11496 = vmatpush3.bf16.msra.mxu0 %v12245_v4 }
 0x272   : > { %15431 = vst [vmem:[#allocation33_spill] sm:$0xff] %v13907_v33  ;;  %15432 = vst [vmem:[#allocation64_spill] sm:$0xff] %v13911_v56  ;;  %v11223_v17 = vpop.f32.mrf.mxu0  ;;  %11406 = vmatmul.mubr.bf16.gmra.mxu0 %v12226_v11 }
 0x273   : > { %v13917_v22 = vadd.f32 %v11223_v17, %v13512_v43  ;;  %v11295_v36 = vpop.f32.mrf.mxu1  ;;  %11478 = vmatmul.mubr.bf16.gmra.mxu1 %v12226_v11 }
 0x274   : > { %v13920_v24 = vadd.f32 %v11295_v36, %v13515_v26  ;;  %v3828_v16 = vpop.f32.mrf.mxu0 }
 0x275   : > { %v13923_v41 = vadd.f32 %v3828_v16, %v13518_v48  ;;  %v4206_v30 = vpop.f32.mrf.mxu1 }
 0x276   : > { %v13926_v6 = vadd.f32 %v4206_v30, %v13521_v13  ;;  %v11224_v33 = vpop.f32.mrf.mxu0 }
 0x277   : > { %v13929_v56 = vadd.f32 %v11224_v33, %v13525_v52  ;;  %v11296_v43 = vpop.f32.mrf.mxu1 }
 0x278   : > { %v13932_v11 = vadd.f32 %v11296_v43, %v13529_v51  ;;  %v13934_v26 = vpop.f32.mrf.mxu0 }
 0x279   : > { %v13936_v17 = vpop.f32.mrf.mxu1 }
 0x27a   : > { %15433 = vst [vmem:[#allocation34_spill] sm:$0xff] %v13932_v11  ;;  %v11227_v36 = vpop.f32.mrf.mxu0 }
 0x27b   : > { %v13939_v48 = vadd.f32 %v11227_v36, %v13538_v15  ;;  %v11299_v4 = vpop.f32.mrf.mxu1 }
 0x27c   : > { %v13942_v13 = vadd.f32 %v11299_v4, %v13541_v53  ;;  %v3844_v16 = vpop.f32.mrf.mxu0 }
 0x27d   : > { %v13945_v52 = vadd.f32 %v3844_v16, %v13544_v44  ;;  %v4222_v33 = vpop.f32.mrf.mxu1 }
 0x27e   : > { %v13948_v51 = vadd.f32 %v4222_v33, %v13547_v3  ;;  %v11228_v30 = vpop.f32.mrf.mxu0 }
 0x27f   : > { %v13951_v43 = vadd.f32 %v11228_v30, %v13551_v58  ;;  %v11300_v11 = vpop.f32.mrf.mxu1 }
 0x280   : > { %v13954_v15 = vadd.f32 %v11300_v11, %v13555_v21  ;;  %v13956_v36 = vpop.f32.mrf.mxu0 }
 0x281   : > { %v13958_v53 = vpop.f32.mrf.mxu1 }
 0x282   : > { %15434 = vst [vmem:[#allocation35_spill] sm:$0xff] %v13954_v15  ;;  %15435 = vst [vmem:[#allocation36_spill] sm:$0xff] %v13958_v53  ;;  %v11231_v4 = vpop.f32.mrf.mxu0 }
 0x283   : > { %v13961_v44 = vadd.f32 %v11231_v4, %v13564_v8  ;;  %v11303_v16 = vpop.f32.mrf.mxu1 }
 0x284   : > { %v13964_v3 = vadd.f32 %v11303_v16, %v13567_v55  ;;  %v3860_v33 = vpop.f32.mrf.mxu0 }
 0x285   : > { %v13967_v58 = vadd.f32 %v3860_v33, %v13570_v18  ;;  %v4238_v30 = vpop.f32.mrf.mxu1 }
 0x286   : > { %v13970_v21 = vadd.f32 %v4238_v30, %v13573_v32  ;;  %v11232_v11 = vpop.f32.mrf.mxu0 }
 0x287   : > { %v13973_v15 = vadd.f32 %v11232_v11, %v13577_v25  ;;  %v11304_v53 = vpop.f32.mrf.mxu1 }
 0x288   : > { %v13976_v8 = vadd.f32 %v11304_v53, %v13581_v19  ;;  %v13978_v4 = vpop.f32.mrf.mxu0 }
 0x289   : > { %15436 = vst [vmem:[#allocation37_spill] sm:$0xff] %v13973_v15  ;;  %v13980_v55 = vpop.f32.mrf.mxu1 }
 0x28a   : > { %15437 = vst [vmem:[#allocation65_spill] sm:$0xff] %v13976_v8  ;;  %v11235_v16 = vpop.f32.mrf.mxu0 }
 0x28b   : > { %v13983_v18 = vadd.f32 %v11235_v16, %v13590_v38  ;;  %v11307_v33 = vpop.f32.mrf.mxu1 }
 0x28c   : > { %v13986_v32 = vadd.f32 %v11307_v33, %v13593_v5  ;;  %v3876_v30 = vpop.f32.mrf.mxu0 }
 0x28d   : > { %15438 = vst [vmem:[#allocation76_spill] sm:$0xff] %v13983_v18  ;;  %v13989_v25 = vadd.f32 %v3876_v30, %v13596_v12  ;;  %v4254_v11 = vpop.f32.mrf.mxu1 }
 0x28e   : > { %15439 = vst [vmem:[#allocation77_spill] sm:$0xff] %v13986_v32  ;;  %v13992_v19 = vadd.f32 %v4254_v11, %v13599_v27  ;;  %v11236_v53 = vpop.f32.mrf.mxu0  ;;  %v15482_v32 = vld [vmem:[#allocation48_spill] sm:$0xff] }
 0x28f   : > { %15440 = vst [vmem:[#allocation78_spill] sm:$0xff] %v13989_v25  ;;  %v13995_v8 = vadd.f32 %v11236_v53, %v13603_v46  ;;  %v11308_v15 = vpop.f32.mrf.mxu1  ;;  %v15447_v25 = vld [vmem:[#allocation7_spill] sm:$0xff] }
 0x290   : > { %15441 = vst [vmem:[#allocation79_spill] sm:$0xff] %v13992_v19  ;;  %v13998_v38 = vadd.f32 %v11308_v15, %v13607_v10  ;;  %v14000_v16 = vpop.f32.mrf.mxu0  ;;  %v15449_v19 = vld [vmem:[#allocation40_spill] sm:$0xff] }
 0x291   : > { %15442 = vst [vmem:[#allocation80_spill] sm:$0xff] %v13995_v8  ;;  %15444 = vst [vmem:[#allocation82_spill] sm:$0xff] %v14000_v16  ;;  %v14002_v5 = vpop.f32.mrf.mxu1  ;;  %v15451_v8 = vld [vmem:[#allocation8_spill] sm:$0xff] }
 0x292   : > { %15443 = vst [vmem:[#allocation81_spill] sm:$0xff] %v13998_v38  ;;  %15445 = vst [vmem:[#allocation83_spill] sm:$0xff] %v14002_v5  ;;  %v11239_v33 = vpop.f32.mrf.mxu0  ;;  %v14019_v38 = vld [vmem:[%s15233_s5 + $0x38] sm:$0xff]  }
 0x293   : > { %v14005_v12 = vadd.f32 %v11239_v33, %v13616_v29  ;;  %v11311_v30 = vpop.f32.mrf.mxu1  ;;  %v15453_v29 = vld [vmem:[#allocation41_spill] sm:$0xff]  ;;  %11589 = vmatprep.subr.bf16.mxu1 %v14019_v38 }
 0x294   : > { %v14008_v27 = vadd.f32 %v11311_v30, %v15447_v25  ;;  %v3892_v11 = vpop.f32.mrf.mxu0  ;;  %v15455_v25 = vld [vmem:[#allocation9_spill] sm:$0xff] }
 0x295   : > { %15446 = vst [vmem:[#allocation84_spill] sm:$0xff] %v14005_v12  ;;  %v14011_v46 = vadd.f32 %v3892_v11, %v15449_v19  ;;  %v4270_v53 = vpop.f32.mrf.mxu1  ;;  %v15459_v11 = vld [vmem:[#allocation11_spill] sm:$0xff] }
 0x296   : > { %15448 = vst [vmem:[#allocation7_spill] sm:$0xff] %v14008_v27  ;;  %v14014_v10 = vadd.f32 %v4270_v53, %v15451_v8  ;;  %v11240_v15 = vpop.f32.mrf.mxu0 }
 0x297   : > { %15450 = vst [vmem:[#allocation40_spill] sm:$0xff] %v14011_v46  ;;  %v14022_v33 = vadd.f32 %v11240_v15, %v15453_v29  ;;  %v11312_v12 = vpop.f32.mrf.mxu1  ;;  %v15461_v46 = vld [vmem:[#allocation12_spill] sm:$0xff]  ;;  %v15463_v29 = vld [vmem:[#allocation43_spill] sm:$0xff] }
 0x298   : > { %15452 = vst [vmem:[#allocation8_spill] sm:$0xff] %v14014_v10  ;;  %v14025_v30 = vadd.f32 %v11312_v12, %v15455_v25  ;;  %v14027_v27 = vpop.f32.mrf.mxu0  ;;  %v15465_v25 = vld [vmem:[#allocation13_spill] sm:$0xff] }
 0x299   : > { %15454 = vst [vmem:[#allocation41_spill] sm:$0xff] %v14022_v33  ;;  %15457 = vst [vmem:[#allocation85_spill] sm:$0xff] %v14027_v27  ;;  %v14030_v19 = vpop.f32.mrf.mxu1 }
 0x29a   : > { %15456 = vst [vmem:[#allocation9_spill] sm:$0xff] %v14025_v30  ;;  %15458 = vst [vmem:[#allocation86_spill] sm:$0xff] %v14030_v19  ;;  %v11243_v8 = vpop.f32.mrf.mxu0  ;;  %v14047_v19 = vld [vmem:[%s15233_s5 + $0x78] sm:$0xff]  }
 0x29b   : > { %v14033_v53 = vadd.f32 %v11243_v8, %v15459_v11  ;;  %v11315_v10 = vpop.f32.mrf.mxu1  ;;  %15467 = vst [vmem:[#allocation87_spill] sm:$0xff] %v14047_v19  ;;  %v15468_v8 = vld [vmem:[#allocation44_spill] sm:$0xff]  ;;  %11553 = vmatprep.subr.bf16.mxu0 %v14047_v19  ;;  %v15484_v19 = vld [vmem:[#allocation18_spill] sm:$0xff] }
 0x29c   : > { %v14036_v5 = vadd.f32 %v11315_v10, %v15461_v46  ;;  %v3908_v15 = vpop.f32.mrf.mxu0  ;;  %v15470_v46 = vld [vmem:[#allocation14_spill] sm:$0xff] }
 0x29d   : > { %15460 = vst [vmem:[#allocation11_spill] sm:$0xff] %v14033_v53  ;;  %v14039_v33 = vadd.f32 %v3908_v15, %v15463_v29  ;;  %v4286_v12 = vpop.f32.mrf.mxu1 }
 0x29e   : > { %15462 = vst [vmem:[#allocation12_spill] sm:$0xff] %v14036_v5  ;;  %v14042_v30 = vadd.f32 %v4286_v12, %v15465_v25  ;;  %v11244_v27 = vpop.f32.mrf.mxu0  ;;  %v15474_v12 = vld [vmem:[#allocation46_spill] sm:$0xff] }
 0x29f   : > { %15464 = vst [vmem:[#allocation43_spill] sm:$0xff] %v14039_v33  ;;  %v14050_v11 = vadd.f32 %v11244_v27, %v15468_v8  ;;  %v11316_v53 = vpop.f32.mrf.mxu1  ;;  %v15476_v33 = vld [vmem:[#allocation16_spill] sm:$0xff]  ;;  %v15478_v8 = vld [vmem:[#allocation47_spill] sm:$0xff] }
 0x2a0   : > { %15466 = vst [vmem:[#allocation13_spill] sm:$0xff] %v14042_v30  ;;  %v14053_v10 = vadd.f32 %v11316_v53, %v15470_v46  ;;  %v14055_v5 = vpop.f32.mrf.mxu0  ;;  %v15480_v46 = vld [vmem:[#allocation17_spill] sm:$0xff] }
 0x2a1   : > { %15469 = vst [vmem:[#allocation44_spill] sm:$0xff] %v14050_v11  ;;  %15472 = vst [vmem:[#allocation88_spill] sm:$0xff] %v14055_v5  ;;  %v14058_v15 = vpop.f32.mrf.mxu1 }
 0x2a2   : > { %15471 = vst [vmem:[#allocation14_spill] sm:$0xff] %v14053_v10  ;;  %15473 = vst [vmem:[#allocation89_spill] sm:$0xff] %v14058_v15  ;;  %v11247_v29 = vpop.f32.mrf.mxu0 }
 0x2a3   : > { %v14061_v25 = vadd.f32 %v11247_v29, %v15474_v12  ;;  %v11319_v30 = vpop.f32.mrf.mxu1 }
 0x2a4   : > { %v14064_v16 = vadd.f32 %v11319_v30, %v15476_v33  ;;  %v3924_v27 = vpop.f32.mrf.mxu0 }
 0x2a5   : > { %15475 = vst [vmem:[#allocation46_spill] sm:$0xff] %v14061_v25  ;;  %v14067_v11 = vadd.f32 %v3924_v27, %v15478_v8  ;;  %v4302_v53 = vpop.f32.mrf.mxu1  ;;  %v15498_v25 = vld [vmem:[#allocation22_spill] sm:$0xff] }
 0x2a6   : > { %15477 = vst [vmem:[#allocation16_spill] sm:$0xff] %v14064_v16  ;;  %v14070_v10 = vadd.f32 %v4302_v53, %v15480_v46  ;;  %v11248_v5 = vpop.f32.mrf.mxu0  ;;  %v15488_v16 = vld [vmem:[#allocation50_spill] sm:$0xff] }
 0x2a7   : > { %15479 = vst [vmem:[#allocation47_spill] sm:$0xff] %v14067_v11  ;;  %v14073_v18 = vadd.f32 %v11248_v5, %v15482_v32  ;;  %v11320_v15 = vpop.f32.mrf.mxu1  ;;  %v15490_v11 = vld [vmem:[#allocation20_spill] sm:$0xff] }
 0x2a8   : > { %15481 = vst [vmem:[#allocation17_spill] sm:$0xff] %v14070_v10  ;;  %v14076_v29 = vadd.f32 %v11320_v15, %v15484_v19  ;;  %v14078_v12 = vpop.f32.mrf.mxu0  ;;  %v15492_v10 = vld [vmem:[#allocation51_spill] sm:$0xff] }
 0x2a9   : > { %15483 = vst [vmem:[#allocation48_spill] sm:$0xff] %v14073_v18  ;;  %15486 = vst [vmem:[#allocation90_spill] sm:$0xff] %v14078_v12  ;;  %v14080_v33 = vpop.f32.mrf.mxu1  ;;  %v15494_v18 = vld [vmem:[#allocation21_spill] sm:$0xff] }
 0x2aa   : > { %15485 = vst [vmem:[#allocation18_spill] sm:$0xff] %v14076_v29  ;;  %15487 = vst [vmem:[#allocation91_spill] sm:$0xff] %v14080_v33  ;;  %v11251_v30 = vpop.f32.mrf.mxu0  ;;  %v15496_v29 = vld [vmem:[#allocation52_spill] sm:$0xff] }
 0x2ab   : > { %v14083_v27 = vadd.f32 %v11251_v30, %v15488_v16  ;;  %v11323_v8 = vpop.f32.mrf.mxu1 }
 0x2ac   : > { %v14086_v53 = vadd.f32 %v11323_v8, %v15490_v11  ;;  %v3940_v46 = vpop.f32.mrf.mxu0 }
 0x2ad   : > { %15489 = vst [vmem:[#allocation50_spill] sm:$0xff] %v14083_v27  ;;  %v14089_v32 = vadd.f32 %v3940_v46, %v15492_v10  ;;  %v4318_v5 = vpop.f32.mrf.mxu1  ;;  %v15510_v27 = vld [vmem:[#allocation26_spill] sm:$0xff] }
 0x2ae   : > { %15491 = vst [vmem:[#allocation20_spill] sm:$0xff] %v14086_v53  ;;  %v14092_v19 = vadd.f32 %v4318_v5, %v15494_v18  ;;  %v11252_v15 = vpop.f32.mrf.mxu0  ;;  %v15502_v53 = vld [vmem:[#allocation54_spill] sm:$0xff] }
 0x2af   : > { %15493 = vst [vmem:[#allocation51_spill] sm:$0xff] %v14089_v32  ;;  %v14095_v12 = vadd.f32 %v11252_v15, %v15496_v29  ;;  %v11324_v33 = vpop.f32.mrf.mxu1  ;;  %v15503_v32 = vld [vmem:[#allocation24_spill] sm:$0xff] }
 0x2b0   : > { %15495 = vst [vmem:[#allocation21_spill] sm:$0xff] %v14092_v19  ;;  %v14098_v16 = vadd.f32 %v11324_v33, %v15498_v25  ;;  %v14100_v30 = vpop.f32.mrf.mxu0  ;;  %v15505_v19 = vld [vmem:[#allocation55_spill] sm:$0xff] }
 0x2b1   : > { %15497 = vst [vmem:[#allocation52_spill] sm:$0xff] %v14095_v12  ;;  %15500 = vst [vmem:[#allocation92_spill] sm:$0xff] %v14100_v30  ;;  %v14102_v11 = vpop.f32.mrf.mxu1  ;;  %v15506_v12 = vld [vmem:[#allocation25_spill] sm:$0xff] }
 0x2b2   : > { %15499 = vst [vmem:[#allocation22_spill] sm:$0xff] %v14098_v16  ;;  %15501 = vst [vmem:[#allocation93_spill] sm:$0xff] %v14102_v11  ;;  %v11255_v8 = vpop.f32.mrf.mxu0  ;;  %v15508_v16 = vld [vmem:[#allocation56_spill] sm:$0xff] }
 0x2b3   : > { %v14105_v10 = vadd.f32 %v11255_v8, %v15502_v53  ;;  %v11327_v46 = vpop.f32.mrf.mxu1 }
 0x2b4   : > { %v14108_v18 = vadd.f32 %v11327_v46, %v15503_v32  ;;  %v3956_v5 = vpop.f32.mrf.mxu0 }
 0x2b5   : > { %v14111_v29 = vadd.f32 %v3956_v5, %v15505_v19  ;;  %v4334_v15 = vpop.f32.mrf.mxu1 }
 0x2b6   : > { %15504 = vst [vmem:[#allocation54_spill] sm:$0xff] %v14108_v18  ;;  %v14114_v25 = vadd.f32 %v4334_v15, %v15506_v12  ;;  %v11256_v33 = vpop.f32.mrf.mxu0  ;;  %v15513_v18 = vld [vmem:[#allocation58_spill] sm:$0xff] }
 0x2b7   : > { %v14117_v30 = vadd.f32 %v11256_v33, %v15508_v16  ;;  %v11328_v11 = vpop.f32.mrf.mxu1 }
 0x2b8   : > { %15507 = vst [vmem:[#allocation24_spill] sm:$0xff] %v14114_v25  ;;  %v14120_v53 = vadd.f32 %v11328_v11, %v15510_v27  ;;  %v14122_v8 = vpop.f32.mrf.mxu0  ;;  %v15515_v25 = vld [vmem:[#allocation28_spill] sm:$0xff] }
 0x2b9   : > { %15509 = vst [vmem:[#allocation55_spill] sm:$0xff] %v14117_v30  ;;  %v14124_v32 = vpop.f32.mrf.mxu1  ;;  %v15516_v30 = vld [vmem:[#allocation59_spill] sm:$0xff] }
 0x2ba   : > { %15511 = vst [vmem:[#allocation25_spill] sm:$0xff] %v14120_v53  ;;  %15512 = vst [vmem:[#allocation56_spill] sm:$0xff] %v14124_v32  ;;  %v11259_v46 = vpop.f32.mrf.mxu0 }
 0x2bb   : > { %v14127_v19 = vadd.f32 %v11259_v46, %v15513_v18  ;;  %v11331_v5 = vpop.f32.mrf.mxu1 }
 0x2bc   : > { %v14130_v12 = vadd.f32 %v11331_v5, %v13767_v23  ;;  %v3972_v15 = vpop.f32.mrf.mxu0 }
 0x2bd   : > { %v14133_v16 = vadd.f32 %v3972_v15, %v15515_v25  ;;  %v4350_v33 = vpop.f32.mrf.mxu1 }
 0x2be   : > { %15514 = vst [vmem:[#allocation26_spill] sm:$0xff] %v14130_v12  ;;  %v14136_v27 = vadd.f32 %v4350_v33, %v13773_v39  ;;  %v11260_v11 = vpop.f32.mrf.mxu0  ;;  %v15519_v12 = vld [vmem:[#allocation30_spill] sm:$0xff] }
 0x2bf   : > { %v14139_v53 = vadd.f32 %v11260_v11, %v13777_v63  ;;  %v11332_v32 = vpop.f32.mrf.mxu1 }
 0x2c0   : > { %v14142_v18 = vadd.f32 %v11332_v32, %v15516_v30  ;;  %v14144_v46 = vpop.f32.mrf.mxu0 }
 0x2c1   : > { %v14146_v23 = vpop.f32.mrf.mxu1 }
 0x2c2   : > { %15517 = vst [vmem:[#allocation58_spill] sm:$0xff] %v14142_v18  ;;  %15518 = vst [vmem:[#allocation28_spill] sm:$0xff] %v14146_v23  ;;  %v11263_v5 = vpop.f32.mrf.mxu0 }
 0x2c3   : > { %v14149_v25 = vadd.f32 %v11263_v5, %v15519_v12  ;;  %v11335_v15 = vpop.f32.mrf.mxu1 }
 0x2c4   : > { %v14152_v39 = vadd.f32 %v11335_v15, %v13793_v37  ;;  %v3988_v33 = vpop.f32.mrf.mxu0 }
 0x2c5   : > { %v14155_v63 = vadd.f32 %v3988_v33, %v13796_v47  ;;  %v4366_v11 = vpop.f32.mrf.mxu1 }
 0x2c6   : > { %15520 = vst [vmem:[#allocation59_spill] sm:$0xff] %v14152_v39  ;;  %v14158_v30 = vadd.f32 %v4366_v11, %v13799_v59  ;;  %v11264_v32 = vpop.f32.mrf.mxu0 }
 0x2c7   : > { %15521 = vst [vmem:[#allocation30_spill] sm:$0xff] %v14155_v63  ;;  %v14161_v18 = vadd.f32 %v11264_v32, %v13803_v60  ;;  %v11336_v23 = vpop.f32.mrf.mxu1 }
 0x2c8   : > { %15522 = vst [vmem:[#allocation94_spill] sm:$0xff] %v14158_v30  ;;  %v14164_v12 = vadd.f32 %v11336_v23, %v13807_v35  ;;  %v14166_v5 = vpop.f32.mrf.mxu0  ;;  %v15527_v35 = vld [vmem:[#allocation66_spill] sm:$0xff] }
 0x2c9   : > { %15523 = vst [vmem:[#allocation95_spill] sm:$0xff] %v14161_v18  ;;  %15525 = vst [vmem:[#allocation97_spill] sm:$0xff] %v14166_v5  ;;  %v14168_v37 = vpop.f32.mrf.mxu1  ;;  %v4004_v23 = vadd.f32 %v13844_v57, %v15527_v35  ;;  %v15528_v5 = vld [vmem:[#allocation67_spill] sm:$0xff] }
 0x2ca   : > { %15524 = vst [vmem:[#allocation96_spill] sm:$0xff] %v14164_v12  ;;  %15526 = vst [vmem:[#allocation98_spill] sm:$0xff] %v14168_v37  ;;  %v11355_v15 = vpop.f32.mrf.mxu0 }
 0x2cb   : > { %v4986_v47 = vadd.f32 %v11355_v15, %v13819_v1  ;;  %v11427_v33 = vpop.f32.mrf.mxu1  ;;  %v4382_v1 = vadd.f32 %v13846_v62, %v15528_v5 }
 0x2cc   : > { %v5364_v63 = vadd.f32 %v11427_v33, %v13822_v54  ;;  %v4761_v59 = vpop.f32.mrf.mxu0 }
 0x2cd   : > { %v4984_v11 = vadd.f32 %v4761_v59, %v13825_v28  ;;  %v5139_v30 = vpop.f32.mrf.mxu1 }
 0x2ce   : > { %v5420_v60 = vmax.f32 %v4986_v47, %v5364_v63  ;;  %v5362_v32 = vadd.f32 %v5139_v30, %v13831_v50  ;;  %v11356_v18 = vpop.f32.mrf.mxu0  ;;  %v14183_v50 = vld [vmem:[%s15231_s3] ss:$0 sm:$0xff] }
 0x2cf   : > { %v4987_v12 = vadd.f32 %v11356_v18, %v13838_v40  ;;  %v11428_v37 = vpop.f32.mrf.mxu1 }
 0x2d0   : > { %v5418_v15 = vmax.f32 %v4984_v11, %v5362_v32  ;;  %v5365_v54 = vadd.f32 %v11428_v37, %v13842_v2  ;;  %v4764_v33 = vpop.f32.mrf.mxu0  ;;  %v15529_v37 = vld [vmem:[#allocation62_spill] sm:$0xff] }
 0x2d1   : > { %v4985_v39 = vadd.f32 %v4764_v33, %v4004_v23  ;;  %v5142_v28 = vpop.f32.mrf.mxu1 }
 0x2d2   : > { %v5474_v59 = vmax.f32 %v5418_v15, %v5420_v60  ;;  %v5421_v63 = vmax.f32 %v4987_v12, %v5365_v54  ;;  %v5363_v57 = vadd.f32 %v5142_v28, %v4382_v1  ;;  %v11359_v30 = vpop.f32.mrf.mxu0  ;;  %v15530_v12 = vld [vmem:[#allocation68_spill] sm:$0xff] }
 0x2d3   : > { %v4990_v40 = vadd.f32 %v11359_v30, %v13852_v7  ;;  %v11431_v18 = vpop.f32.mrf.mxu1  ;;  %v4008_v1 = vadd.f32 %v13877_v42, %v15530_v12 }
 0x2d4   : > { %v5419_v47 = vmax.f32 %v4985_v39, %v5363_v57  ;;  %v5368_v62 = vadd.f32 %v11431_v18, %v13855_v14  ;;  %v4777_v5 = vpop.f32.mrf.mxu0  ;;  %v5509_v2 = vadd.f32 %v14183_v50, %v5474_v59  ;;  %v15531_v39 = vld [vmem:[#allocation69_spill] sm:$0xff]  ;;  %v15532_v59 = vld [vmem:[#allocation32_spill] sm:$0xff] }
 0x2d5   : > { %v4988_v11 = vadd.f32 %v4777_v5, %v15529_v37  ;;  %v5155_v60 = vpop.f32.mrf.mxu1  ;;  %v4386_v14 = vadd.f32 %v13879_v61, %v15531_v39  ;;  %v15533_v37 = vld [vmem:[#allocation63_spill] sm:$0xff]  ;;  %v15534_v39 = vld [vmem:[#allocation70_spill] sm:$0xff] }
 0x2d6   : > { %v5475_v32 = vmax.f32 %v5419_v47, %v5421_v63  ;;  %v5424_v35 = vmax.f32 %v4990_v40, %v5368_v62  ;;  %v5366_v23 = vadd.f32 %v5155_v60, %v13867_v34  ;;  %v11360_v15 = vpop.f32.mrf.mxu0  ;;  %v5537_v63 = vmax.f32 %v5509_v2, 0.0 }
 0x2d7   : > { %v4991_v7 = vadd.f32 %v11360_v15, %v13871_v0  ;;  %v11432_v54 = vpop.f32.mrf.mxu1 }
 0x2d8   : > { %v5510_v33 = vadd.f32 %v14183_v50, %v5475_v32  ;;  %v5422_v28 = vmax.f32 %v4988_v11, %v5366_v23  ;;  %v5369_v57 = vadd.f32 %v11432_v54, %v15532_v59  ;;  %v4780_v30 = vpop.f32.mrf.mxu0  ;;  %v15535_v59 = vld [vmem:[#allocation71_spill] sm:$0xff] }
 0x2d9   : > { %v4989_v40 = vadd.f32 %v4780_v30, %v4008_v1  ;;  %v5158_v18 = vpop.f32.mrf.mxu1 }
 0x2da   : > { %v5538_v34 = vmax.f32 %v5510_v33, 0.0  ;;  %v5476_v47 = vmax.f32 %v5422_v28, %v5424_v35  ;;  %v5425_v62 = vmax.f32 %v4991_v7, %v5369_v57  ;;  %v5367_v5 = vadd.f32 %v5158_v18, %v4386_v14  ;;  %v11363_v42 = vpop.f32.mrf.mxu0 }
 0x2db   : > { %v4994_v0 = vadd.f32 %v11363_v42, %v15533_v37  ;;  %v11435_v60 = vpop.f32.mrf.mxu1  ;;  %v4012_v14 = vadd.f32 %v13909_v31, %v15534_v39 }
 0x2dc   : > { %v10049_v15 = vpack.c.bf16 %v5538_v34, %v5537_v63  ;;  %v5423_v12 = vmax.f32 %v4989_v40, %v5367_v5  ;;  %v5372_v61 = vadd.f32 %v11435_v60, %v13891_v9  ;;  %v4793_v32 = vpop.f32.mrf.mxu0  ;;  %v5511_v11 = vadd.f32 %v14183_v50, %v5476_v47  ;;  %v15536_v9 = vld [vmem:[#allocation64_spill] sm:$0xff] }
 0x2dd   : > { %v4992_v23 = vadd.f32 %v4793_v32, %v13894_v20  ;;  %v5171_v2 = vpop.f32.mrf.mxu1  ;;  %v4390_v57 = vadd.f32 %v15536_v9, %v15535_v59  ;;  %v15537_v20 = vld [vmem:[#allocation33_spill] sm:$0xff]  ;;  %v15540_v9 = vld [vmem:[#allocation34_spill] sm:$0xff] }
 0x2de   : > { %10050 = vst [vmem:[#allocation2] sm:$0xff] %v10049_v15   ;;  %v5477_v1 = vmax.f32 %v5423_v12, %v5425_v62  ;;  %v5428_v54 = vmax.f32 %v4994_v0, %v5372_v61  ;;  %v5370_v35 = vadd.f32 %v5171_v2, %v13900_v49  ;;  %v11364_v7 = vpop.f32.mrf.mxu0  ;;  %v5539_v34 = vmax.f32 %v5511_v11, 0.0 }
 0x2df   : > { %v4995_v33 = vadd.f32 %v11364_v7, %v13904_v45  ;;  %v11436_v28 = vpop.f32.mrf.mxu1 }
 0x2e0   : > { %v5512_v30 = vadd.f32 %v14183_v50, %v5477_v1  ;;  %v5426_v63 = vmax.f32 %v4992_v23, %v5370_v35  ;;  %v5373_v40 = vadd.f32 %v11436_v28, %v15537_v20  ;;  %v4796_v18 = vpop.f32.mrf.mxu0 }
 0x2e1   : > { %v4993_v47 = vadd.f32 %v4796_v18, %v4012_v14  ;;  %v5174_v62 = vpop.f32.mrf.mxu1 }
 0x2e2   : > { %v5540_v49 = vmax.f32 %v5512_v30, 0.0  ;;  %v5478_v5 = vmax.f32 %v5426_v63, %v5428_v54  ;;  %v5429_v42 = vmax.f32 %v4995_v33, %v5373_v40  ;;  %v5371_v37 = vadd.f32 %v5174_v62, %v4390_v57  ;;  %v11367_v31 = vpop.f32.mrf.mxu0  ;;  %v15539_v33 = vld [vmem:[#allocation73_spill] sm:$0xff] }
 0x2e3   : > { %v4998_v45 = vadd.f32 %v11367_v31, %v13917_v22  ;;  %v11439_v0 = vpop.f32.mrf.mxu1  ;;  %v15538_v22 = vld [vmem:[#allocation72_spill] sm:$0xff] }
 0x2e4   : > { %v10054_v60 = vpack.c.bf16 %v5540_v49, %v5539_v34  ;;  %v5427_v15 = vmax.f32 %v4993_v47, %v5371_v37  ;;  %v5376_v12 = vadd.f32 %v11439_v0, %v13920_v24  ;;  %v4809_v61 = vpop.f32.mrf.mxu0  ;;  %v5513_v32 = vadd.f32 %v14183_v50, %v5478_v5  ;;  %v12258_v37 = vld [vmem:[%s15233_s5 + $0x30] sm:$0xff]  }
 0x2e5   : > { %v4996_v23 = vadd.f32 %v4809_v61, %v13923_v41  ;;  %v5187_v11 = vpop.f32.mrf.mxu1  ;;  %v14213_v2 = vld [vmem:[#allocation2] sm:$0xff]   ;;  %v4016_v39 = vadd.f32 %v13934_v26, %v15538_v22  ;;  %v4394_v41 = vadd.f32 %v13936_v17, %v15539_v33 }
 0x2e6   : > { %10141 = vst [vmem:[#allocation2 + $0x8] sm:$0xff] %v10054_v60   ;;  %v5479_v1 = vmax.f32 %v5427_v15, %v5429_v42  ;;  %v5432_v54 = vmax.f32 %v4998_v45, %v5376_v12  ;;  %v5374_v35 = vadd.f32 %v5187_v11, %v13926_v6  ;;  %v11368_v7 = vpop.f32.mrf.mxu0  ;;  %11533 = vmatprep.mubr.bf16.mxu1 %v14213_v2  ;;  %v5541_v63 = vmax.f32 %v5513_v32, 0.0 }
 0x2e7   : > { %v4999_v14 = vadd.f32 %v11368_v7, %v13929_v56  ;;  %v11440_v24 = vpop.f32.mrf.mxu1 }
 0x2e8   : > { %v5514_v28 = vadd.f32 %v14183_v50, %v5479_v1  ;;  %v5430_v59 = vmax.f32 %v4996_v23, %v5374_v35  ;;  %v5377_v57 = vadd.f32 %v11440_v24, %v15540_v9  ;;  %v4812_v30 = vpop.f32.mrf.mxu0 }
 0x2e9   : > { %v4997_v6 = vadd.f32 %v4812_v30, %v4016_v39  ;;  %v5190_v20 = vpop.f32.mrf.mxu1  ;;  %v15544_v39 = vld [vmem:[#allocation35_spill] sm:$0xff] }
 0x2ea   : > { %v5542_v40 = vmax.f32 %v5514_v28, 0.0  ;;  %v5480_v18 = vmax.f32 %v5430_v59, %v5432_v54  ;;  %v5433_v26 = vmax.f32 %v4999_v14, %v5377_v57  ;;  %v5375_v34 = vadd.f32 %v5190_v20, %v4394_v41  ;;  %v11371_v56 = vpop.f32.mrf.mxu0  ;;  %v15543_v54 = vld [vmem:[#allocation36_spill] sm:$0xff]  ;;  %v12262_v57 = vld [vmem:[%s15233_s5 + $0x28] sm:$0xff]  }
 0x2eb   : > { %v5002_v47 = vadd.f32 %v11371_v56, %v13939_v48  ;;  %v11443_v62 = vpop.f32.mrf.mxu1 }
 0x2ec   : > { %v10059_v49 = vpack.c.bf16 %v5542_v40, %v5541_v63  ;;  %v5431_v5 = vmax.f32 %v4997_v6, %v5375_v34  ;;  %v5380_v17 = vadd.f32 %v11443_v62, %v13942_v13  ;;  %v4825_v42 = vpop.f32.mrf.mxu0  ;;  %v5515_v31 = vadd.f32 %v14183_v50, %v5480_v18  ;;  %v15541_v13 = vld [vmem:[#allocation74_spill] sm:$0xff] }
 0x2ed   : > { %v5000_v45 = vadd.f32 %v4825_v42, %v13945_v52  ;;  %v5203_v0 = vpop.f32.mrf.mxu1  ;;  %v14231_v60 = vld [vmem:[#allocation2 + $0x8] sm:$0xff]   ;;  %v4020_v23 = vadd.f32 %v13956_v36, %v15541_v13  ;;  %v15545_v42 = vld [vmem:[#allocation5_spill] sm:$0xff] }
 0x2ee   : > { %10142 = vst [vmem:[#allocation2 + $0x10] sm:$0xff] %v10059_v49   ;;  %v5481_v15 = vmax.f32 %v5431_v5, %v5433_v26  ;;  %v5436_v48 = vmax.f32 %v5002_v47, %v5380_v17  ;;  %v5378_v12 = vadd.f32 %v5203_v0, %v13948_v51  ;;  %v11372_v61 = vpop.f32.mrf.mxu0  ;;  %v14234_v32 = vld [vmem:[#allocation2 + $0x8] sm:$0xff]   ;;  %11497 = vmatprep.mubr.bf16.mxu0 %v14231_v60  ;;  %v5543_v24 = vmax.f32 %v5515_v31, 0.0  ;;  %v12264_v26 = vld [vmem:[%s15233_s5 + $0x20] sm:$0xff]  }
 0x2ef   : > { %v5003_v11 = vadd.f32 %v11372_v61, %v13951_v43  ;;  %v11444_v1 = vpop.f32.mrf.mxu1  ;;  %v15542_v52 = vld [vmem:[#allocation75_spill] sm:$0xff]  ;;  %11534 = vmatmul.mubr.bf16.vlgmr.msra.gmra.mxu1 %v14234_v32  ;;  %v4024_v31 = vadd.f32 %v13978_v4, %v15545_v42  ;;  %v15548_v61 = vld [vmem:[#allocation65_spill] sm:$0xff] }
 0x2f0   : > { %v4398_v35 = vadd.f32 %v15543_v54, %v15542_v52  ;;  %v5516_v7 = vadd.f32 %v14183_v50, %v5481_v15  ;;  %v5434_v22 = vmax.f32 %v5000_v45, %v5378_v12  ;;  %v5381_v14 = vadd.f32 %v11444_v1, %v15544_v39  ;;  %v4828_v51 = vpop.f32.mrf.mxu0  ;;  %11590 = vmatpush3.bf16.msra.mxu1 %v14019_v38  ;;  %v12259_v38 = vld [vmem:[%s15233_s5 + $0x70] sm:$0xff]   ;;  %v15546_v45 = vld [vmem:[#allocation38_spill] sm:$0xff]  ;;  %v12268_v39 = vld [vmem:[%s15233_s5 + $0x18] sm:$0xff]  }
 0x2f1   : > { %v5001_v33 = vadd.f32 %v4828_v51, %v4020_v23  ;;  %v5206_v41 = vpop.f32.mrf.mxu1  ;;  %11591 = vmatprep.subr.bf16.mxu1 %v12258_v37  ;;  %v4402_v0 = vadd.f32 %v13980_v55, %v15546_v45  ;;  %v15549_v23 = vld [vmem:[#allocation87_spill] sm:$0xff]  ;;  %v15558_v45 = vld [vmem:[#allocation80_spill] sm:$0xff] }
 0x2f2   : > { %v5544_v43 = vmax.f32 %v5516_v7, 0.0  ;;  %v5482_v36 = vmax.f32 %v5434_v22, %v5436_v48  ;;  %v5437_v28 = vmax.f32 %v5003_v11, %v5381_v14  ;;  %v5379_v59 = vadd.f32 %v5206_v41, %v4398_v35  ;;  %v11375_v9 = vpop.f32.mrf.mxu0  ;;  %v12263_v55 = vld [vmem:[%s15233_s5 + $0x68] sm:$0xff]   ;;  %v15550_v14 = vld [vmem:[#allocation76_spill] sm:$0xff] }
 0x2f3   : > { %v5006_v30 = vadd.f32 %v11375_v9, %v13961_v44  ;;  %v11447_v63 = vpop.f32.mrf.mxu1  ;;  %v12270_v9 = vld [vmem:[%s15233_s5 + $0x10] sm:$0xff]   ;;  %v15557_v42 = vld [vmem:[#allocation83_spill] sm:$0xff] }
 0x2f4   : > { %v10064_v6 = vpack.c.bf16 %v5544_v43, %v5543_v24  ;;  %v5435_v20 = vmax.f32 %v5001_v33, %v5379_v59  ;;  %v5384_v40 = vadd.f32 %v11447_v63, %v13964_v3  ;;  %v4841_v18 = vpop.f32.mrf.mxu0  ;;  %v5517_v34 = vadd.f32 %v14183_v50, %v5482_v36  ;;  %11592 = vmatpush3.bf16.msra.mxu1 %v12258_v37  ;;  %v15551_v43 = vld [vmem:[#allocation77_spill] sm:$0xff]  ;;  %v12265_v59 = vld [vmem:[%s15233_s5 + $0x60] sm:$0xff]  }
 0x2f5   : > { %v5004_v56 = vadd.f32 %v4841_v18, %v13967_v58  ;;  %v5219_v47 = vpop.f32.mrf.mxu1  ;;  %v14259_v44 = vld [vmem:[#allocation2 + $0x10] sm:$0xff]   ;;  %11593 = vmatprep.subr.bf16.mxu1 %v12262_v57  ;;  %v15547_v58 = vld [vmem:[#allocation37_spill] sm:$0xff] }
 0x2f6   : > { %10143 = vst [vmem:[#allocation2 + $0x18] sm:$0xff] %v10064_v6   ;;  %v5483_v62 = vmax.f32 %v5435_v20, %v5437_v28  ;;  %v5440_v3 = vmax.f32 %v5006_v30, %v5384_v40  ;;  %v5382_v49 = vadd.f32 %v5219_v47, %v13970_v21  ;;  %v11376_v5 = vpop.f32.mrf.mxu0  ;;  %v14262_v17 = vld [vmem:[#allocation2 + $0x10] sm:$0xff]   ;;  %11498 = vmatmul.mubr.bf16.vlgmr.msra.gmra.mxu0 %v14259_v44  ;;  %v5545_v11 = vmax.f32 %v5517_v34, 0.0  ;;  %v15552_v30 = vld [vmem:[#allocation78_spill] sm:$0xff] }
 0x2f7   : > { %v5007_v15 = vadd.f32 %v11376_v5, %v15547_v58  ;;  %v11448_v48 = vpop.f32.mrf.mxu1  ;;  %11537 = vmatprep.mubr.bf16.mxu1 %v14262_v17  ;;  %11554 = vmatpush3.bf16.msra.mxu0 %v15549_v23  ;;  %v15556_v5 = vld [vmem:[#allocation39_spill] sm:$0xff]  ;;  %v12269_v23 = vld [vmem:[%s15233_s5 + $0x58] sm:$0xff]  }
 0x2f8   : > { %v5518_v37 = vadd.f32 %v14183_v50, %v5483_v62  ;;  %v5438_v12 = vmax.f32 %v5004_v56, %v5382_v49  ;;  %v5385_v21 = vadd.f32 %v11448_v48, %v15548_v61  ;;  %v4844_v13 = vpop.f32.mrf.mxu0  ;;  %11555 = vmatprep.subr.bf16.mxu0 %v12259_v38  ;;  %11594 = vmatpush3.bf16.msra.mxu1 %v12262_v57  ;;  %v15554_v62 = vld [vmem:[#allocation6_spill] sm:$0xff]  ;;  %v15559_v48 = vld [vmem:[#allocation81_spill] sm:$0xff] }
 0x2f9   : > { %v5005_v4 = vadd.f32 %v4844_v13, %v4024_v31  ;;  %v5222_v1 = vpop.f32.mrf.mxu1  ;;  %11595 = vmatprep.subr.bf16.mxu1 %v12264_v26  ;;  %v4406_v31 = vadd.f32 %v15557_v42, %v15556_v5  ;;  %v15567_v5 = vld [vmem:[#allocation86_spill] sm:$0xff] }
 0x2fa   : > { %v5546_v52 = vmax.f32 %v5518_v37, 0.0  ;;  %v5484_v54 = vmax.f32 %v5438_v12, %v5440_v3  ;;  %v5441_v35 = vmax.f32 %v5007_v15, %v5385_v21  ;;  %v5383_v7 = vadd.f32 %v5222_v1, %v4402_v0  ;;  %v11379_v22 = vpop.f32.mrf.mxu0  ;;  %v15555_v3 = vld [vmem:[#allocation82_spill] sm:$0xff] }
 0x2fb   : > { %v5010_v51 = vadd.f32 %v11379_v22, %v15550_v14  ;;  %v11451_v24 = vpop.f32.mrf.mxu1  ;;  %11556 = vmatpush3.bf16.msra.mxu0 %v12259_v38  ;;  %v15553_v38 = vld [vmem:[#allocation79_spill] sm:$0xff]  ;;  %v4028_v49 = vadd.f32 %v15555_v3, %v15554_v62  ;;  %v15565_v62 = vld [vmem:[#allocation85_spill] sm:$0xff] }
 0x2fc   : > { %v10069_v33 = vpack.c.bf16 %v5546_v52, %v5545_v11  ;;  %v5439_v41 = vmax.f32 %v5005_v4, %v5383_v7  ;;  %v5388_v36 = vadd.f32 %v11451_v24, %v15551_v43  ;;  %v4857_v28 = vpop.f32.mrf.mxu0  ;;  %v5519_v57 = vadd.f32 %v14183_v50, %v5484_v54  ;;  %11557 = vmatprep.subr.bf16.mxu0 %v12263_v55  ;;  %v12275_v43 = vld [vmem:[%s15233_s5] sm:$0xff]  }
 0x2fd   : > { %v5008_v63 = vadd.f32 %v4857_v28, %v15552_v30  ;;  %v5235_v6 = vpop.f32.mrf.mxu1  ;;  %v14290_v20 = vld [vmem:[#allocation2 + $0x18] sm:$0xff]   ;;  %11596 = vmatpush3.bf16.msra.mxu1 %v12264_v26  ;;  %v15562_v28 = vld [vmem:[#allocation40_spill] sm:$0xff] }
 0x2fe   : > { %10144 = vst [vmem:[#allocation2 + $0x20] sm:$0xff] %v10069_v33   ;;  %v5485_v40 = vmax.f32 %v5439_v41, %v5441_v35  ;;  %v5444_v18 = vmax.f32 %v5010_v51, %v5388_v36  ;;  %v5386_v34 = vadd.f32 %v5235_v6, %v15553_v38  ;;  %v11380_v56 = vpop.f32.mrf.mxu0  ;;  %v14293_v47 = vld [vmem:[#allocation2 + $0x18] sm:$0xff]   ;;  %11597 = vmatprep.subr.bf16.mxu1 %v12268_v39  ;;  %v5547_v61 = vmax.f32 %v5519_v57, 0.0  ;;  %v12273_v35 = vld [vmem:[%s15233_s5 + $0x8] sm:$0xff]   ;;  %v12274_v41 = vld [vmem:[%s15233_s5 + $0x50] sm:$0xff]  }
 0x2ff   : > { %v5011_v0 = vadd.f32 %v11380_v56, %v15558_v45  ;;  %v11452_v58 = vpop.f32.mrf.mxu1  ;;  %11501 = vmatprep.mubr.bf16.mxu0 %v14290_v20  ;;  %11538 = vmatmul.mubr.bf16.gmra.mxu1 %v14293_v47  ;;  %v15564_v56 = vld [vmem:[#allocation42_spill] sm:$0xff] }
 0x300   : > { %v5520_v26 = vadd.f32 %v14183_v50, %v5485_v40  ;;  %v5442_v15 = vmax.f32 %v5008_v63, %v5386_v34  ;;  %v5389_v37 = vadd.f32 %v11452_v58, %v15559_v48  ;;  %v4860_v12 = vpop.f32.mrf.mxu0  ;;  %11558 = vmatpush3.bf16.msra.mxu0 %v12263_v55  ;;  %v15560_v55 = vld [vmem:[#allocation84_spill] sm:$0xff]  ;;  %v4032_v3 = vadd.f32 %v15565_v62, %v15564_v56  ;;  %v15574_v56 = vld [vmem:[#allocation45_spill] sm:$0xff] }
 0x301   : > { %v5009_v21 = vadd.f32 %v4860_v12, %v4028_v49  ;;  %v5238_v13 = vpop.f32.mrf.mxu1  ;;  %11559 = vmatprep.subr.bf16.mxu0 %v12265_v59  ;;  %11598 = vmatpush3.bf16.msra.mxu1 %v12268_v39  ;;  %v15561_v39 = vld [vmem:[#allocation7_spill] sm:$0xff]  ;;  %v15563_v40 = vld [vmem:[#allocation8_spill] sm:$0xff]  ;;  %v15566_v49 = vld [vmem:[#allocation10_spill] sm:$0xff] }
 0x302   : > { %v5548_v11 = vmax.f32 %v5520_v26, 0.0  ;;  %v5486_v4 = vmax.f32 %v5442_v15, %v5444_v18  ;;  %v5445_v1 = vmax.f32 %v5011_v0, %v5389_v37  ;;  %v5387_v52 = vadd.f32 %v5238_v13, %v4406_v31  ;;  %v11383_v54 = vpop.f32.mrf.mxu0  ;;  %11599 = vmatprep.subr.bf16.mxu1 %v12270_v9  ;;  %v15568_v31 = vld [vmem:[#allocation41_spill] sm:$0xff]  ;;  %v15575_v62 = vld [vmem:[#allocation88_spill] sm:$0xff] }
 0x303   : > { %v5014_v7 = vadd.f32 %v11383_v54, %v15560_v55  ;;  %v11455_v22 = vpop.f32.mrf.mxu1  ;;  %v4410_v42 = vadd.f32 %v15567_v5, %v15566_v49  ;;  %v15569_v26 = vld [vmem:[#allocation9_spill] sm:$0xff]  ;;  %v15576_v49 = vld [vmem:[#allocation15_spill] sm:$0xff] }
 0x304   : > { %v10074_v14 = vpack.c.bf16 %v5548_v11, %v5547_v61  ;;  %v5443_v51 = vmax.f32 %v5009_v21, %v5387_v52  ;;  %v5392_v24 = vadd.f32 %v11455_v22, %v15561_v39  ;;  %v4873_v33 = vpop.f32.mrf.mxu0  ;;  %11560 = vmatpush3.bf16.msra.mxu0 %v12265_v59  ;;  %v5521_v36 = vadd.f32 %v14183_v50, %v5486_v4  ;;  %v12276_v21 = vld [vmem:[%s15233_s5 + $0x48] sm:$0xff]   ;;  %v14340_v54 = vld [vmem:[%s15233_s5 + $0xb8] sm:$0xff]  }
 0x305   : > { %v5012_v57 = vadd.f32 %v4873_v33, %v15562_v28  ;;  %v5251_v30 = vpop.f32.mrf.mxu1  ;;  %v14320_v63 = vld [vmem:[#allocation2 + $0x20] sm:$0xff]   ;;  %11561 = vmatprep.subr.bf16.mxu0 %v12269_v23  ;;  %11600 = vmatpush3.bf16.msra.mxu1 %v12270_v9  ;;  %v15577_v5 = vld [vmem:[#allocation89_spill] sm:$0xff] }
 0x306   : > { %10145 = vst [vmem:[#allocation2 + $0x28] sm:$0xff] %v10074_v14   ;;  %v5487_v6 = vmax.f32 %v5443_v51, %v5445_v1  ;;  %v5448_v59 = vmax.f32 %v5014_v7, %v5392_v24  ;;  %v5390_v18 = vadd.f32 %v5251_v30, %v15563_v40  ;;  %v11384_v38 = vpop.f32.mrf.mxu0  ;;  %v14323_v34 = vld [vmem:[#allocation2 + $0x20] sm:$0xff]   ;;  %11601 = vmatprep.subr.bf16.mxu1 %v12273_v35  ;;  %v5549_v37 = vmax.f32 %v5521_v36, 0.0  ;;  %v15571_v14 = vld [vmem:[#allocation12_spill] sm:$0xff]  ;;  %v15572_v36 = vld [vmem:[#allocation43_spill] sm:$0xff] }
 0x307   : > { %v5015_v45 = vadd.f32 %v11384_v38, %v15568_v31  ;;  %v11456_v0 = vpop.f32.mrf.mxu1  ;;  %11502 = vmatmul.mubr.bf16.gmra.mxu0 %v14320_v63  ;;  %11541 = vmatprep.mubr.bf16.mxu1 %v14323_v34  ;;  %v12278_v24 = vld [vmem:[%s15233_s5 + $0x40] sm:$0xff]   ;;  %v15573_v40 = vld [vmem:[#allocation13_spill] sm:$0xff]  ;;  %v15578_v31 = vld [vmem:[#allocation44_spill] sm:$0xff] }
 0x308   : > { %v5522_v9 = vadd.f32 %v14183_v50, %v5487_v6  ;;  %v5446_v58 = vmax.f32 %v5012_v57, %v5390_v18  ;;  %v5393_v15 = vadd.f32 %v11456_v0, %v15569_v26  ;;  %v4876_v48 = vpop.f32.mrf.mxu0  ;;  %11562 = vmatpush3.bf16.msra.mxu0 %v12269_v23  ;;  %v15570_v23 = vld [vmem:[#allocation11_spill] sm:$0xff] }
 0x309   : > { %v5013_v12 = vadd.f32 %v4876_v48, %v4032_v3  ;;  %v5254_v61 = vpop.f32.mrf.mxu1  ;;  %11563 = vmatprep.subr.bf16.mxu0 %v12274_v41  ;;  %11602 = vmatpush3.bf16.msra.mxu1 %v12273_v35  ;;  %v4036_v3 = vadd.f32 %v15575_v62, %v15574_v56  ;;  %v15584_v62 = vld [vmem:[#allocation49_spill] sm:$0xff] }
 0x30a   : > { %v5550_v13 = vmax.f32 %v5522_v9, 0.0  ;;  %v5488_v11 = vmax.f32 %v5446_v58, %v5448_v59  ;;  %v5449_v4 = vmax.f32 %v5015_v45, %v5393_v15  ;;  %v5391_v1 = vadd.f32 %v5254_v61, %v4410_v42  ;;  %v11387_v52 = vpop.f32.mrf.mxu0  ;;  %11603 = vmatprep.subr.bf16.mxu1 %v12275_v43  ;;  %v15579_v58 = vld [vmem:[#allocation14_spill] sm:$0xff]  ;;  %v14367_v61 = vld [vmem:[%s15232_s4 + $0xb8] sm:$0xff]  }
 0x30b   : > { %v5018_v55 = vadd.f32 %v11387_v52, %v15570_v23  ;;  %v11459_v7 = vpop.f32.mrf.mxu1  ;;  %v4414_v42 = vadd.f32 %v15577_v5, %v15576_v49  ;;  %v15580_v23 = vld [vmem:[#allocation46_spill] sm:$0xff]  ;;  %v15586_v49 = vld [vmem:[#allocation48_spill] sm:$0xff] }
 0x30c   : > { %v10079_v22 = vpack.c.bf16 %v5550_v13, %v5549_v37  ;;  %v5447_v35 = vmax.f32 %v5013_v12, %v5391_v1  ;;  %v5396_v51 = vadd.f32 %v11459_v7, %v15571_v14  ;;  %v4889_v39 = vpop.f32.mrf.mxu0  ;;  %11564 = vmatpush3.bf16.msra.mxu0 %v12274_v41  ;;  %v5523_v33 = vadd.f32 %v14183_v50, %v5488_v11 }
 0x30d   : > { %v5016_v28 = vadd.f32 %v4889_v39, %v15572_v36  ;;  %v5267_v57 = vpop.f32.mrf.mxu1  ;;  %v14349_v30 = vld [vmem:[#allocation2 + $0x28] sm:$0xff]   ;;  %11604 = vmatpush3.bf16.msra.mxu1 %v12275_v43  ;;  %11565 = vmatprep.subr.bf16.mxu0 %v12276_v21 }
 0x30e   : > { %10146 = vst [vmem:[#allocation2 + $0x30] sm:$0xff] %v10079_v22   ;;  %v5489_v6 = vmax.f32 %v5447_v35, %v5449_v4  ;;  %v5452_v59 = vmax.f32 %v5018_v55, %v5396_v51  ;;  %v5394_v18 = vadd.f32 %v5267_v57, %v15573_v40  ;;  %v11388_v38 = vpop.f32.mrf.mxu0  ;;  %v14352_v41 = vld [vmem:[#allocation2 + $0x28] sm:$0xff]   ;;  %11661 = vmatprep.subr.bf16.mxu1 %v14340_v54  ;;  %v5551_v48 = vmax.f32 %v5523_v33, 0.0  ;;  %v15583_v40 = vld [vmem:[#allocation17_spill] sm:$0xff] }
 0x30f   : > { %v5019_v45 = vadd.f32 %v11388_v38, %v15578_v31  ;;  %v11460_v43 = vpop.f32.mrf.mxu1  ;;  %11505 = vmatprep.mubr.bf16.mxu0 %v14349_v30  ;;  %11542 = vmatmul.mubr.bf16.gmra.mxu1 %v14352_v41  ;;  %v15582_v33 = vld [vmem:[#allocation47_spill] sm:$0xff] }
 0x310   : > { %v5524_v0 = vadd.f32 %v14183_v50, %v5489_v6  ;;  %v5450_v9 = vmax.f32 %v5016_v28, %v5394_v18  ;;  %v5397_v26 = vadd.f32 %v11460_v43, %v15579_v58  ;;  %v4892_v15 = vpop.f32.mrf.mxu0  ;;  %11566 = vmatpush3.bf16.msra.mxu0 %v12276_v21  ;;  %v15581_v21 = vld [vmem:[#allocation16_spill] sm:$0xff]  ;;  %v15587_v31 = vld [vmem:[#allocation19_spill] sm:$0xff]  ;;  %v15589_v58 = vld [vmem:[#allocation18_spill] sm:$0xff] }
 0x311   : > { %v5017_v37 = vadd.f32 %v4892_v15, %v4036_v3  ;;  %v5270_v12 = vpop.f32.mrf.mxu1  ;;  %11567 = vmatprep.subr.bf16.mxu0 %v12278_v24  ;;  %v15585_v3 = vld [vmem:[#allocation90_spill] sm:$0xff] }
 0x312   : > { %v5552_v13 = vmax.f32 %v5524_v0, 0.0  ;;  %v5490_v11 = vmax.f32 %v5450_v9, %v5452_v59  ;;  %v5453_v4 = vmax.f32 %v5019_v45, %v5397_v26  ;;  %v5395_v1 = vadd.f32 %v5270_v12, %v4414_v42  ;;  %v11391_v52 = vpop.f32.mrf.mxu0  ;;  %v15588_v45 = vld [vmem:[#allocation91_spill] sm:$0xff] }
 0x313   : > { %v5022_v55 = vadd.f32 %v11391_v52, %v15580_v23  ;;  %v11463_v7 = vpop.f32.mrf.mxu1  ;;  %v4418_v43 = vadd.f32 %v15588_v45, %v15587_v31  ;;  %v15590_v23 = vld [vmem:[#allocation50_spill] sm:$0xff] }
 0x314   : > { %v10084_v22 = vpack.c.bf16 %v5552_v13, %v5551_v48  ;;  %v5451_v35 = vmax.f32 %v5017_v37, %v5395_v1  ;;  %v5400_v14 = vadd.f32 %v11463_v7, %v15581_v21  ;;  %v4905_v51 = vpop.f32.mrf.mxu0  ;;  %11568 = vmatpush3.bf16.msra.mxu0 %v12278_v24  ;;  %v5525_v39 = vadd.f32 %v14183_v50, %v5490_v11  ;;  %v15591_v21 = vld [vmem:[#allocation20_spill] sm:$0xff] }
 0x315   : > { %v5020_v36 = vadd.f32 %v4905_v51, %v15582_v33  ;;  %v5283_v28 = vpop.f32.mrf.mxu1  ;;  %v14373_v57 = vld [vmem:[#allocation2 + $0x30] sm:$0xff]   ;;  %11625 = vmatprep.subr.bf16.mxu0 %v14367_v61  ;;  %v4040_v24 = vadd.f32 %v15585_v3, %v15584_v62 }
 0x316   : > { %10147 = vst [vmem:[#allocation2 + $0x38] sm:$0xff] %v10084_v22   ;;  %v5491_v6 = vmax.f32 %v5451_v35, %v5453_v4  ;;  %v5456_v59 = vmax.f32 %v5022_v55, %v5400_v14  ;;  %v5398_v18 = vadd.f32 %v5283_v28, %v15583_v40  ;;  %v11392_v38 = vpop.f32.mrf.mxu0  ;;  %v14377_v56 = vld [vmem:[#allocation2 + $0x30] sm:$0xff]   ;;  %11506 = vmatmul.mubr.bf16.gmra.mxu0 %v14373_v57  ;;  %v5553_v48 = vmax.f32 %v5525_v39, 0.0 }
 0x317   : > { %v5023_v5 = vadd.f32 %v11392_v38, %v15586_v49  ;;  %v11464_v42 = vpop.f32.mrf.mxu1  ;;  %11545 = vmatprep.mubr.bf16.mxu1 %v14377_v56  ;;  %v15595_v49 = vld [vmem:[#allocation92_spill] sm:$0xff] }
 0x318   : > { %v5526_v0 = vadd.f32 %v14183_v50, %v5491_v6  ;;  %v5454_v9 = vmax.f32 %v5020_v36, %v5398_v18  ;;  %v5401_v26 = vadd.f32 %v11464_v42, %v15589_v58  ;;  %v4908_v15 = vpop.f32.mrf.mxu0  ;;  %v15592_v36 = vld [vmem:[#allocation51_spill] sm:$0xff]  ;;  %v15593_v18 = vld [vmem:[#allocation21_spill] sm:$0xff]  ;;  %v15596_v42 = vld [vmem:[#allocation52_spill] sm:$0xff] }
 0x319   : > { %v5021_v37 = vadd.f32 %v4908_v15, %v4040_v24  ;;  %v5286_v12 = vpop.f32.mrf.mxu1  ;;  %v15594_v24 = vld [vmem:[#allocation53_spill] sm:$0xff]  ;;  %v15599_v15 = vld [vmem:[#allocation22_spill] sm:$0xff] }
 0x31a   : > { %v5554_v13 = vmax.f32 %v5526_v0, 0.0  ;;  %v5492_v11 = vmax.f32 %v5454_v9, %v5456_v59  ;;  %v5457_v4 = vmax.f32 %v5023_v5, %v5401_v26  ;;  %v5399_v1 = vadd.f32 %v5286_v12, %v4418_v43  ;;  %v11395_v52 = vpop.f32.mrf.mxu0  ;;  %v15597_v43 = vld [vmem:[#allocation23_spill] sm:$0xff]  ;;  %v15598_v0 = vld [vmem:[#allocation93_spill] sm:$0xff] }
 0x31b   : > { %v5026_v55 = vadd.f32 %v11395_v52, %v15590_v23  ;;  %v11467_v7 = vpop.f32.mrf.mxu1  ;;  %v4044_v5 = vadd.f32 %v15595_v49, %v15594_v24  ;;  %v4422_v9 = vadd.f32 %v15598_v0, %v15597_v43  ;;  %v15602_v49 = vld [vmem:[#allocation57_spill] sm:$0xff]  ;;  %v15605_v43 = vld [vmem:[#allocation56_spill] sm:$0xff] }
 0x31c   : > { %v10089_v22 = vpack.c.bf16 %v5554_v13, %v5553_v48  ;;  %v5455_v35 = vmax.f32 %v5021_v37, %v5399_v1  ;;  %v5404_v14 = vadd.f32 %v11467_v7, %v15591_v21  ;;  %v4921_v51 = vpop.f32.mrf.mxu0  ;;  %v5527_v33 = vadd.f32 %v14183_v50, %v5492_v11 }
 0x31d   : > { %v5024_v28 = vadd.f32 %v4921_v51, %v15592_v36  ;;  %v5299_v39 = vpop.f32.mrf.mxu1  ;;  %v14392_v6 = vld [vmem:[#allocation2 + $0x38] sm:$0xff]  }
 0x31e   : > { %10148 = vst [vmem:[#allocation2 + $0x40] sm:$0xff] %v10089_v22   ;;  %v5493_v59 = vmax.f32 %v5455_v35, %v5457_v4  ;;  %v5460_v40 = vmax.f32 %v5026_v55, %v5404_v14  ;;  %v5402_v38 = vadd.f32 %v5299_v39, %v15593_v18  ;;  %v11396_v62 = vpop.f32.mrf.mxu0  ;;  %v14395_v3 = vld [vmem:[#allocation2 + $0x38] sm:$0xff]   ;;  %11509 = vmatprep.mubr.bf16.mxu0 %v14392_v6  ;;  %v5555_v12 = vmax.f32 %v5527_v33, 0.0  ;;  %v15600_v14 = vld [vmem:[#allocation54_spill] sm:$0xff] }
 0x31f   : > { %v5027_v31 = vadd.f32 %v11396_v62, %v15596_v42  ;;  %v11468_v45 = vpop.f32.mrf.mxu1  ;;  %11546 = vmatmul.mubr.bf16.gmra.mxu1 %v14395_v3  ;;  %v15603_v42 = vld [vmem:[#allocation55_spill] sm:$0xff] }
 0x320   : > { %v5528_v58 = vadd.f32 %v14183_v50, %v5493_v59  ;;  %v5458_v26 = vmax.f32 %v5024_v28, %v5402_v38  ;;  %v5405_v48 = vadd.f32 %v11468_v45, %v15599_v15  ;;  %v4924_v37 = vpop.f32.mrf.mxu0  ;;  %v15601_v38 = vld [vmem:[#allocation24_spill] sm:$0xff] }
 0x321   : > { %v5025_v13 = vadd.f32 %v4924_v37, %v4044_v5  ;;  %v5302_v11 = vpop.f32.mrf.mxu1  ;;  %v4048_v5 = vadd.f32 %v14122_v8, %v15602_v49 }
 0x322   : > { %v5556_v4 = vmax.f32 %v5528_v58, 0.0  ;;  %v5494_v1 = vmax.f32 %v5458_v26, %v5460_v40  ;;  %v5461_v52 = vmax.f32 %v5027_v31, %v5405_v48  ;;  %v5403_v23 = vadd.f32 %v5302_v11, %v4422_v9  ;;  %v11399_v55 = vpop.f32.mrf.mxu0  ;;  %v15606_v26 = vld [vmem:[#allocation25_spill] sm:$0xff] }
 0x323   : > { %v5030_v7 = vadd.f32 %v11399_v55, %v14105_v10  ;;  %v11471_v22 = vpop.f32.mrf.mxu1 }
 0x324   : > { %v10094_v35 = vpack.c.bf16 %v5556_v4, %v5555_v12  ;;  %v5459_v21 = vmax.f32 %v5025_v13, %v5403_v23  ;;  %v5408_v51 = vadd.f32 %v11471_v22, %v15600_v14  ;;  %v4937_v36 = vpop.f32.mrf.mxu0  ;;  %v5529_v28 = vadd.f32 %v14183_v50, %v5494_v1 }
 0x325   : > { %v5028_v39 = vadd.f32 %v4937_v36, %v14111_v29  ;;  %v5315_v33 = vpop.f32.mrf.mxu1  ;;  %v14410_v59 = vld [vmem:[#allocation2 + $0x40] sm:$0xff]   ;;  %v15604_v29 = vld [vmem:[#allocation27_spill] sm:$0xff] }
 0x326   : > { %10149 = vst [vmem:[#allocation2 + $0x48] sm:$0xff] %v10094_v35   ;;  %v5495_v40 = vmax.f32 %v5459_v21, %v5461_v52  ;;  %v5464_v18 = vmax.f32 %v5030_v7, %v5408_v51  ;;  %v5406_v62 = vadd.f32 %v5315_v33, %v15601_v38  ;;  %v11400_v24 = vpop.f32.mrf.mxu0  ;;  %v14413_v10 = vld [vmem:[#allocation2 + $0x40] sm:$0xff]   ;;  %11510 = vmatmul.mubr.bf16.gmra.mxu0 %v14410_v59  ;;  %v5557_v37 = vmax.f32 %v5529_v28, 0.0 }
 0x327   : > { %v5031_v31 = vadd.f32 %v11400_v24, %v15603_v42  ;;  %v11472_v45 = vpop.f32.mrf.mxu1  ;;  %v4426_v0 = vadd.f32 %v15605_v43, %v15604_v29  ;;  %11549 = vmatprep.mubr.bf16.mxu1 %v14413_v10  ;;  %v15607_v35 = vld [vmem:[#allocation26_spill] sm:$0xff]  ;;  %v15610_v42 = vld [vmem:[#allocation28_spill] sm:$0xff] }
 0x328   : > { %v5530_v9 = vadd.f32 %v14183_v50, %v5495_v40  ;;  %v5462_v58 = vmax.f32 %v5028_v39, %v5406_v62  ;;  %v5409_v15 = vadd.f32 %v11472_v45, %v15606_v26  ;;  %v4940_v48 = vpop.f32.mrf.mxu0  ;;  %v15608_v62 = vld [vmem:[#allocation29_spill] sm:$0xff]  ;;  %v15611_v43 = vld [vmem:[#allocation58_spill] sm:$0xff] }
 0x329   : > { %v5029_v12 = vadd.f32 %v4940_v48, %v4048_v5  ;;  %v5318_v13 = vpop.f32.mrf.mxu1  ;;  %v4052_v24 = vadd.f32 %v14144_v46, %v15608_v62 }
 0x32a   : > { %v5558_v8 = vmax.f32 %v5530_v9, 0.0  ;;  %v5496_v11 = vmax.f32 %v5462_v58, %v5464_v18  ;;  %v5465_v4 = vmax.f32 %v5031_v31, %v5409_v15  ;;  %v5407_v1 = vadd.f32 %v5318_v13, %v4426_v0  ;;  %v11403_v52 = vpop.f32.mrf.mxu0 }
 0x32b   : > { %v5034_v23 = vadd.f32 %v11403_v52, %v14127_v19  ;;  %v11475_v55 = vpop.f32.mrf.mxu1  ;;  %v12418_v52 = vld [vmem:[%s15231_s3] ss:$0 sm:$0xff] }
 0x32c   : > { %v10099_v7 = vpack.c.bf16 %v5558_v8, %v5557_v37  ;;  %v5463_v22 = vmax.f32 %v5029_v12, %v5407_v1  ;;  %v5412_v21 = vadd.f32 %v11475_v55, %v15607_v35  ;;  %v4953_v14 = vpop.f32.mrf.mxu0  ;;  %v5531_v51 = vadd.f32 %v14183_v50, %v5496_v11  ;;  %v15612_v11 = vld [vmem:[#allocation59_spill] sm:$0xff]  ;;  %v15613_v55 = vld [vmem:[#allocation30_spill] sm:$0xff] }
 0x32d   : > { %v5032_v36 = vadd.f32 %v4953_v14, %v14133_v16  ;;  %v5331_v28 = vpop.f32.mrf.mxu1  ;;  %v14428_v39 = vld [vmem:[#allocation2 + $0x48] sm:$0xff]   ;;  %v15609_v16 = vld [vmem:[#allocation60_spill] sm:$0xff] }
 0x32e   : > { %10150 = vst [vmem:[#allocation2 + $0x50] sm:$0xff] %v10099_v7   ;;  %v5497_v33 = vmax.f32 %v5463_v22, %v5465_v4  ;;  %v5468_v40 = vmax.f32 %v5034_v23, %v5412_v21  ;;  %v5410_v18 = vadd.f32 %v5331_v28, %v14136_v27  ;;  %v11404_v38 = vpop.f32.mrf.mxu0  ;;  %v14431_v19 = vld [vmem:[#allocation2 + $0x48] sm:$0xff]   ;;  %11513 = vmatprep.mubr.bf16.mxu0 %v14428_v39  ;;  %v5559_v9 = vmax.f32 %v5531_v51, 0.0  ;;  %v15615_v28 = vld [vmem:[#allocation61_spill] sm:$0xff] }
 0x32f   : > { %v5035_v49 = vadd.f32 %v11404_v38, %v14139_v53  ;;  %v11476_v5 = vpop.f32.mrf.mxu1  ;;  %v4430_v31 = vadd.f32 %v15610_v42, %v15609_v16  ;;  %11550 = vmatmul.mubr.bf16.gmra.mxu1 %v14431_v19  ;;  %v15618_v38 = vld [vmem:[#allocation98_spill] sm:$0xff] }
 0x330   : > { %v5532_v45 = vadd.f32 %v14183_v50, %v5497_v33  ;;  %v5466_v29 = vmax.f32 %v5032_v36, %v5410_v18  ;;  %v5413_v0 = vadd.f32 %v11476_v5, %v15611_v43  ;;  %v4956_v27 = vpop.f32.mrf.mxu0  ;;  %11605 = vmatprep.mubr.bf16.mxu1 %v14213_v2  ;;  %v12281_v36 = vld [vmem:[%s15233_s5 + $0xb0] sm:$0xff]   ;;  %v15616_v33 = vld [vmem:[#allocation97_spill] sm:$0xff]  ;;  %v15617_v18 = vld [vmem:[#allocation31_spill] sm:$0xff] }
 0x331   : > { %v5033_v58 = vadd.f32 %v4956_v27, %v4052_v24  ;;  %v5334_v26 = vpop.f32.mrf.mxu1  ;;  %v4434_v62 = vadd.f32 %v15618_v38, %v15617_v18  ;;  %v15619_v24 = vld [vmem:[#allocation95_spill] sm:$0xff]  ;;  %v12323_v38 = vld [vmem:[%s15232_s4 + $0xc0] sm:$0xff]  }
 0x332   : > { %v5560_v53 = vmax.f32 %v5532_v45, 0.0  ;;  %v5498_v46 = vmax.f32 %v5466_v29, %v5468_v40  ;;  %v5469_v15 = vmax.f32 %v5035_v49, %v5413_v0  ;;  %v5411_v48 = vadd.f32 %v5334_v26, %v4430_v31  ;;  %v11407_v37 = vpop.f32.mrf.mxu0  ;;  %v15620_v31 = vld [vmem:[#allocation96_spill] sm:$0xff] }
 0x333   : > { %v5038_v12 = vadd.f32 %v11407_v37, %v14149_v25  ;;  %v11479_v13 = vpop.f32.mrf.mxu1  ;;  %v15614_v25 = vld [vmem:[#allocation94_spill] sm:$0xff]  ;;  %v4056_v40 = vadd.f32 %v15616_v33, %v15615_v28  ;;  %v12320_v33 = vld [vmem:[%s15232_s4 + $0xc8] sm:$0xff]  }
 0x334   : > { %v10104_v50 = vpack.c.bf16 %v5560_v53, %v5559_v9  ;;  %v5467_v8 = vmax.f32 %v5033_v58, %v5411_v48  ;;  %v5416_v4 = vadd.f32 %v11479_v13, %v15612_v11  ;;  %v4969_v1 = vpop.f32.mrf.mxu0  ;;  %v5533_v23 = vadd.f32 %v12418_v52, %v5498_v46  ;;  %v12283_v46 = vld [vmem:[%s15233_s5 + $0xa8] sm:$0xff]   ;;  %v12296_v11 = vld [vmem:[#allocation2 + $0x20] sm:$0xff]  }
 0x335   : > { %v5036_v2 = vadd.f32 %v4969_v1, %v15613_v55  ;;  %v5347_v7 = vpop.f32.mrf.mxu1  ;;  %v14449_v22 = vld [vmem:[#allocation2 + $0x50] sm:$0xff]   ;;  %v12311_v55 = vld [vmem:[%s15233_s5 + $0xd8] sm:$0xff]   ;;  %v12319_v28 = vld [vmem:[%s15233_s5 + $0xc0] sm:$0xff]  }
 0x336   : > { %10151 = vst [vmem:[#allocation2 + $0x58] sm:$0xff] %v10104_v50   ;;  %v5499_v35 = vmax.f32 %v5467_v8, %v5469_v15  ;;  %v5472_v21 = vmax.f32 %v5038_v12, %v5416_v4  ;;  %v5414_v14 = vadd.f32 %v5347_v7, %v15614_v25  ;;  %v11408_v51 = vpop.f32.mrf.mxu0  ;;  %11514 = vmatmul.mubr.bf16.gmra.mxu0 %v14449_v22  ;;  %v5561_v43 = vmax.f32 %v5533_v23, 0.0  ;;  %v12287_v50 = vld [vmem:[%s15233_s5 + $0x98] sm:$0xff]   ;;  %v12303_v4 = vld [vmem:[%s15232_s4 + $0xf0] sm:$0xff]   ;;  %v12307_v23 = vld [vmem:[%s15232_s4 + $0xe8] sm:$0xff]  }
 0x337   : > { %v5039_v49 = vadd.f32 %v11408_v51, %v15619_v24  ;;  %v11480_v5 = vpop.f32.mrf.mxu1  ;;  %11606 = vmatmul.mubr.bf16.vlgmr.msra.gmra.mxu1 %v14234_v32  ;;  %11569 = vmatprep.mubr.bf16.mxu0 %v14231_v60  ;;  %v12295_v8 = vld [vmem:[#allocation2 + $0x18] sm:$0xff]   ;;  %v12301_v1 = vld [vmem:[#allocation2 + $0x30] sm:$0xff]   ;;  %v12309_v7 = vld [vmem:[%s15232_s4 + $0xe0] sm:$0xff]  }
 0x338   : > { %v5534_v16 = vadd.f32 %v12418_v52, %v5499_v35  ;;  %v5470_v42 = vmax.f32 %v5036_v2, %v5414_v14  ;;  %v5417_v45 = vadd.f32 %v11480_v5, %v15620_v31  ;;  %v4972_v29 = vpop.f32.mrf.mxu0  ;;  %11609 = vmatprep.mubr.bf16.mxu1 %v14262_v17  ;;  %11662 = vmatpush3.bf16.msra.mxu1 %v14340_v54  ;;  %v12282_v17 = vld [vmem:[%s15232_s4 + $0xb0] sm:$0xff]   ;;  %v12285_v54 = vld [vmem:[%s15233_s5 + $0xa0] sm:$0xff]   ;;  %v12304_v2 = vld [vmem:[#allocation2 + $0x38] sm:$0xff]  }
 0x339   : > { %v5037_v0 = vadd.f32 %v4972_v29, %v4056_v40  ;;  %v5350_v27 = vpop.f32.mrf.mxu1  ;;  %11663 = vmatprep.subr.bf16.mxu1 %v12281_v36  ;;  %v12314_v35 = vld [vmem:[%s15233_s5 + $0xd0] sm:$0xff]   ;;  %v12316_v25 = vld [vmem:[%s15233_s5 + $0xc8] sm:$0xff]   ;;  %v12326_v40 = vld [vmem:[%s15233_s5 + $0x138] sm:$0xff]  }
 0x33a   : > { %v5562_v9 = vmax.f32 %v5534_v16, 0.0  ;;  %v5500_v58 = vmax.f32 %v5470_v42, %v5472_v21  ;;  %v5473_v26 = vmax.f32 %v5039_v49, %v5417_v45  ;;  %v5415_v53 = vadd.f32 %v5350_v27, %v4434_v62  ;;  %v12313_v21 = vld [vmem:[%s15232_s4 + $0xd8] sm:$0xff]   ;;  %v12310_v14 = vld [vmem:[#allocation2 + $0x48] sm:$0xff]   ;;  %v12317_v51 = vld [vmem:[%s15232_s4 + $0xd0] sm:$0xff]  }
 0x33b   : > { %v12318_v62 = vld [vmem:[#allocation2 + $0x18] sm:$0xff]   ;;  %v12321_v49 = vld [vmem:[#allocation2 + $0x20] sm:$0xff]   ;;  %v12328_v5 = vld [vmem:[%s15233_s5 + $0x130] sm:$0xff]  }
 0x33c   : > { %v10109_v32 = vpack.c.bf16 %v5562_v9, %v5561_v43  ;;  %v5471_v15 = vmax.f32 %v5037_v0, %v5415_v53  ;;  %11664 = vmatpush3.bf16.msra.mxu1 %v12281_v36  ;;  %v5535_v60 = vadd.f32 %v12418_v52, %v5500_v58  ;;  %v12312_v36 = vld [vmem:[#allocation2 + $0x50] sm:$0xff]   ;;  %v12325_v24 = vld [vmem:[%s15232_s4 + $0x138] sm:$0xff]   ;;  %v12322_v16 = vld [vmem:[#allocation2 + $0x28] sm:$0xff]  }
 0x33d   : > { %11665 = vmatprep.subr.bf16.mxu1 %v12283_v46  ;;  %v12315_v18 = vld [vmem:[#allocation2 + $0x58] sm:$0xff]   ;;  %v12331_v42 = vld [vmem:[%s15233_s5 + $0x128] sm:$0xff]   ;;  %v12324_v31 = vld [vmem:[#allocation2 + $0x30] sm:$0xff]  }
 0x33e   : > { %10152 = vst [vmem:[#allocation2 + $0x60] sm:$0xff] %v10109_v32   ;;  %v5501_v48 = vmax.f32 %v5471_v15, %v5473_v26  ;;  %11570 = vmatmul.mubr.bf16.vlgmr.msra.gmra.mxu0 %v14259_v44  ;;  %v5563_v12 = vmax.f32 %v5535_v60, 0.0  ;;  %v12284_v44 = vld [vmem:[%s15232_s4 + $0xa8] sm:$0xff]   ;;  %v12329_v45 = vld [vmem:[%s15232_s4 + $0x130] sm:$0xff]   ;;  %v12327_v29 = vld [vmem:[#allocation2 + $0x38] sm:$0xff]  }
 0x33f   : > { %11610 = vmatmul.mubr.bf16.gmra.mxu1 %v14293_v47  ;;  %11573 = vmatprep.mubr.bf16.mxu0 %v14290_v20  ;;  %v12286_v20 = vld [vmem:[%s15232_s4 + $0xa0] sm:$0xff]   ;;  %v12333_v0 = vld [vmem:[%s15232_s4 + $0x128] sm:$0xff]   ;;  %v12337_v27 = vld [vmem:[%s15233_s5 + $0x118] sm:$0xff]  }
 0x340   : > { %v5536_v37 = vadd.f32 %v12418_v52, %v5501_v48  ;;  %11613 = vmatprep.mubr.bf16.mxu1 %v14323_v34  ;;  %11626 = vmatpush3.bf16.msra.mxu0 %v14367_v61  ;;  %v12289_v34 = vld [vmem:[%s15233_s5 + $0x90] sm:$0xff]   ;;  %v12288_v61 = vld [vmem:[%s15232_s4 + $0x98] sm:$0xff]   ;;  %v12308_v52 = vld [vmem:[%s15233_s5 + $0xe0] sm:$0xff]  }
 0x341   : > { %11627 = vmatprep.subr.bf16.mxu0 %v12282_v17  ;;  %11666 = vmatpush3.bf16.msra.mxu1 %v12283_v46  ;;  %v12334_v43 = vld [vmem:[%s15233_s5 + $0x120] sm:$0xff]   ;;  %v12332_v26 = vld [vmem:[#allocation2 + $0x48] sm:$0xff]   ;;  %v12340_v53 = vld [vmem:[%s15233_s5 + $0x110] sm:$0xff]  }
 0x342   : > { %v5564_v13 = vmax.f32 %v5536_v37, 0.0  ;;  %11667 = vmatprep.subr.bf16.mxu1 %v12285_v54  ;;  %v12330_v9 = vld [vmem:[#allocation2 + $0x40] sm:$0xff]   ;;  %v12339_v46 = vld [vmem:[%s15232_s4 + $0x118] sm:$0xff]   ;;  %v12342_v32 = vld [vmem:[%s15233_s5 + $0x108] sm:$0xff]  }
 0x343   : > { %v12335_v58 = vld [vmem:[%s15232_s4 + $0x120] sm:$0xff]   ;;  %v12336_v15 = vld [vmem:[#allocation2 + $0x50] sm:$0xff]   ;;  %v12338_v48 = vld [vmem:[#allocation2 + $0x58] sm:$0xff]  }
 0x344   : > { %v10114_v47 = vpack.c.bf16 %v5564_v13, %v5563_v12  ;;  %11628 = vmatpush3.bf16.msra.mxu0 %v12282_v17  ;;  %v12343_v60 = vld [vmem:[%s15232_s4 + $0x110] sm:$0xff]   ;;  %v12345_v17 = vld [vmem:[%s15233_s5 + $0x100] sm:$0xff]  }
 0x345   : > { %11629 = vmatprep.subr.bf16.mxu0 %v12284_v44  ;;  %11668 = vmatpush3.bf16.msra.mxu1 %v12285_v54  ;;  %v12346_v54 = vld [vmem:[%s15232_s4 + $0x108] sm:$0xff]   ;;  %v12341_v37 = vld [vmem:[#allocation2 + $0x60] sm:$0xff]  }
 0x346   : > { %10153 = vst [vmem:[#allocation2 + $0x68] sm:$0xff] %v10114_v47   ;;  %11574 = vmatmul.mubr.bf16.gmra.mxu0 %v14320_v63  ;;  %11669 = vmatprep.subr.bf16.mxu1 %v12287_v50  ;;  %v12290_v63 = vld [vmem:[%s15233_s5 + $0x88] sm:$0xff]   ;;  %v12349_v12 = vld [vmem:[%s15232_s4 + $0x100] sm:$0xff]  }
 0x347   : > { %11614 = vmatmul.mubr.bf16.gmra.mxu1 %v14352_v41  ;;  %11577 = vmatprep.mubr.bf16.mxu0 %v14349_v30  ;;  %v12291_v30 = vld [vmem:[%s15232_s4 + $0x90] sm:$0xff]   ;;  %v12293_v41 = vld [vmem:[%s15233_s5 + $0x80] sm:$0xff]  }
 0x348   : > { %11617 = vmatprep.mubr.bf16.mxu1 %v14377_v56  ;;  %11630 = vmatpush3.bf16.msra.mxu0 %v12284_v44  ;;  %v12294_v56 = vld [vmem:[%s15232_s4 + $0x88] sm:$0xff]   ;;  %v12344_v13 = vld [vmem:[#allocation2 + $0x20] sm:$0xff]  }
 0x349   : > { %11631 = vmatprep.subr.bf16.mxu0 %v12286_v20  ;;  %11670 = vmatpush3.bf16.msra.mxu1 %v12287_v50  ;;  %v12347_v44 = vld [vmem:[#allocation2 + $0x28] sm:$0xff]   ;;  %v12348_v50 = vld [vmem:[#allocation2 + $0x30] sm:$0xff]  }
 0x34a   : > { %11671 = vmatprep.subr.bf16.mxu1 %v12289_v34 }
 0x34c   : > { %11632 = vmatpush3.bf16.msra.mxu0 %v12286_v20  ;;  %v12350_v20 = vld [vmem:[#allocation2 + $0x38] sm:$0xff]  }
 0x34d   : > { %11633 = vmatprep.subr.bf16.mxu0 %v12288_v61  ;;  %11672 = vmatpush3.bf16.msra.mxu1 %v12289_v34 }
 0x34e   : > { %11578 = vmatmul.mubr.bf16.gmra.mxu0 %v14373_v57  ;;  %11673 = vmatprep.subr.bf16.mxu1 %v12290_v63  ;;  %v12300_v57 = vld [vmem:[%s15233_s5 + $0xf8] sm:$0xff]  }
 0x34f   : > { %11618 = vmatmul.mubr.bf16.gmra.mxu1 %v14395_v3  ;;  %11581 = vmatprep.mubr.bf16.mxu0 %v14392_v6  ;;  %v12297_v6 = vld [vmem:[%s15232_s4 + $0x80] sm:$0xff]   ;;  %v12292_v3 = vld [vmem:[#allocation2 + $0x10] sm:$0xff]  }
 0x350   : > { %11621 = vmatprep.mubr.bf16.mxu1 %v14413_v10  ;;  %11634 = vmatpush3.bf16.msra.mxu0 %v12288_v61  ;;  %v12299_v10 = vld [vmem:[%s15232_s4 + $0xf8] sm:$0xff]  }
 0x351   : > { %11635 = vmatprep.subr.bf16.mxu0 %v12291_v30  ;;  %11674 = vmatpush3.bf16.msra.mxu1 %v12290_v63  ;;  %v12351_v63 = vld [vmem:[#allocation2 + $0x40] sm:$0xff]  }
 0x352   : > { %11675 = vmatprep.subr.bf16.mxu1 %v12293_v41 }
 0x354   : > { %11636 = vmatpush3.bf16.msra.mxu0 %v12291_v30 }
 0x355   : > { %11676 = vmatpush3.bf16.msra.mxu1 %v12293_v41  ;;  %11637 = vmatprep.subr.bf16.mxu0 %v12294_v56 }
 0x356   : > { %11582 = vmatmul.mubr.bf16.gmra.mxu0 %v14410_v59  ;;  %11733 = vmatprep.subr.bf16.mxu1 %v12300_v57  ;;  %v12302_v59 = vld [vmem:[%s15233_s5 + $0xf0] sm:$0xff]  }
 0x357   : > { %11622 = vmatmul.mubr.bf16.gmra.mxu1 %v14431_v19  ;;  %11585 = vmatprep.mubr.bf16.mxu0 %v14428_v39  ;;  %v12305_v39 = vld [vmem:[%s15233_s5 + $0xe8] sm:$0xff]  }
 0x358   : > { %11677 = vmatprep.mubr.bf16.mxu1 %v12292_v3  ;;  %11638 = vmatpush3.bf16.msra.mxu0 %v12294_v56  ;;  %v12298_v19 = vld [vmem:[#allocation2 + $0x28] sm:$0xff]  }
 0x359   : > { %11639 = vmatprep.subr.bf16.mxu0 %v12297_v6 }
 0x35c   : > { %11640 = vmatpush3.bf16.msra.mxu0 %v12297_v6 }
 0x35d   : > { %11697 = vmatprep.subr.bf16.mxu0 %v12299_v10 }
 0x35e   : > { %11586 = vmatmul.mubr.bf16.gmra.mxu0 %v14449_v22  ;;  %v12306_v22 = vld [vmem:[#allocation2 + $0x40] sm:$0xff]  }
 0x35f   : > { %11678 = vmatmul.mubr.bf16.vlgmr.msra.gmra.mxu1 %v12295_v8  ;;  %11641 = vmatprep.mubr.bf16.mxu0 %v12292_v3 }
 0x360   : > { %11681 = vmatprep.mubr.bf16.mxu1 %v12296_v11  ;;  %11734 = vmatpush3.bf16.msra.mxu1 %v12300_v57 }
 0x361   : > { %11735 = vmatprep.subr.bf16.mxu1 %v12302_v59 }
 0x364   : > { %11736 = vmatpush3.bf16.msra.mxu1 %v12302_v59  ;;  %v12353_v59 = vld [vmem:[#allocation2 + $0x50] sm:$0xff]  }
 0x365   : > { %11737 = vmatprep.subr.bf16.mxu1 %v12305_v39 }
 0x366   : > { %11642 = vmatmul.mubr.bf16.vlgmr.msra.gmra.mxu0 %v12295_v8 }
 0x367   : > { %11682 = vmatmul.mubr.bf16.gmra.mxu1 %v12298_v19  ;;  %11645 = vmatprep.mubr.bf16.mxu0 %v12296_v11 }
 0x368   : > { %11685 = vmatprep.mubr.bf16.mxu1 %v12301_v1  ;;  %11698 = vmatpush3.bf16.msra.mxu0 %v12299_v10  ;;  %v12352_v10 = vld [vmem:[#allocation2 + $0x48] sm:$0xff]  }
 0x369   : > { %11699 = vmatprep.subr.bf16.mxu0 %v12303_v4  ;;  %11738 = vmatpush3.bf16.msra.mxu1 %v12305_v39 }
 0x36a   : > { %11739 = vmatprep.subr.bf16.mxu1 %v12308_v52 }
 0x36c   : > { %11700 = vmatpush3.bf16.msra.mxu0 %v12303_v4  ;;  %v12354_v4 = vld [vmem:[#allocation2 + $0x58] sm:$0xff]  }
 0x36d   : > { %11701 = vmatprep.subr.bf16.mxu0 %v12307_v23  ;;  %11740 = vmatpush3.bf16.msra.mxu1 %v12308_v52  ;;  %v12355_v52 = vld [vmem:[#allocation2 + $0x60] sm:$0xff]  }
 0x36e   : > { %11646 = vmatmul.mubr.bf16.gmra.mxu0 %v12298_v19  ;;  %11741 = vmatprep.subr.bf16.mxu1 %v12311_v55 }
 0x36f   : > { %11686 = vmatmul.mubr.bf16.gmra.mxu1 %v12304_v2  ;;  %11649 = vmatprep.mubr.bf16.mxu0 %v12301_v1 }
 0x370   : > { %11689 = vmatprep.mubr.bf16.mxu1 %v12306_v22  ;;  %11702 = vmatpush3.bf16.msra.mxu0 %v12307_v23 }
 0x371   : > { %11703 = vmatprep.subr.bf16.mxu0 %v12309_v7  ;;  %11742 = vmatpush3.bf16.msra.mxu1 %v12311_v55 }
 0x372   : > { %11743 = vmatprep.subr.bf16.mxu1 %v12314_v35 }
 0x374   : > { %11704 = vmatpush3.bf16.msra.mxu0 %v12309_v7 }
 0x375   : > { %11705 = vmatprep.subr.bf16.mxu0 %v12313_v21  ;;  %11744 = vmatpush3.bf16.msra.mxu1 %v12314_v35 }
 0x376   : > { %11650 = vmatmul.mubr.bf16.gmra.mxu0 %v12304_v2  ;;  %11745 = vmatprep.subr.bf16.mxu1 %v12316_v25 }
 0x377   : > { %11690 = vmatmul.mubr.bf16.gmra.mxu1 %v12310_v14  ;;  %11653 = vmatprep.mubr.bf16.mxu0 %v12306_v22 }
 0x378   : > { %11693 = vmatprep.mubr.bf16.mxu1 %v12312_v36  ;;  %11706 = vmatpush3.bf16.msra.mxu0 %v12313_v21 }
 0x379   : > { %11707 = vmatprep.subr.bf16.mxu0 %v12317_v51  ;;  %11746 = vmatpush3.bf16.msra.mxu1 %v12316_v25 }
 0x37a   : > { %11747 = vmatprep.subr.bf16.mxu1 %v12319_v28 }
 0x37c   : > { %11708 = vmatpush3.bf16.msra.mxu0 %v12317_v51  ;;  %v12356_v51 = vld [vmem:[#allocation2 + $0x68] sm:$0xff]  }
 0x37d   : > { %11748 = vmatpush3.bf16.msra.mxu1 %v12319_v28  ;;  %11709 = vmatprep.subr.bf16.mxu0 %v12320_v33 }
 0x37e   : > { %11654 = vmatmul.mubr.bf16.gmra.mxu0 %v12310_v14  ;;  %11805 = vmatprep.subr.bf16.mxu1 %v12326_v40 }
 0x37f   : > { %11694 = vmatmul.mubr.bf16.gmra.mxu1 %v12315_v18  ;;  %11657 = vmatprep.mubr.bf16.mxu0 %v12312_v36 }
 0x380   : > { %11749 = vmatprep.mubr.bf16.mxu1 %v12318_v62  ;;  %11710 = vmatpush3.bf16.msra.mxu0 %v12320_v33 }
 0x381   : > { %11711 = vmatprep.subr.bf16.mxu0 %v12323_v38 }
 0x384   : > { %11712 = vmatpush3.bf16.msra.mxu0 %v12323_v38 }
 0x385   : > { %11769 = vmatprep.subr.bf16.mxu0 %v12325_v24 }
 0x386   : > { %11658 = vmatmul.mubr.bf16.gmra.mxu0 %v12315_v18 }
 0x387   : > { %11750 = vmatmul.mubr.bf16.vlgmr.msra.gmra.mxu1 %v12321_v49  ;;  %11713 = vmatprep.mubr.bf16.mxu0 %v12318_v62 }
 0x388   : > { %11753 = vmatprep.mubr.bf16.mxu1 %v12322_v16  ;;  %11806 = vmatpush3.bf16.msra.mxu1 %v12326_v40 }
 0x389   : > { %11807 = vmatprep.subr.bf16.mxu1 %v12328_v5 }
 0x38c   : > { %11808 = vmatpush3.bf16.msra.mxu1 %v12328_v5 }
 0x38d   : > { %11809 = vmatprep.subr.bf16.mxu1 %v12331_v42 }
 0x38e   : > { %11714 = vmatmul.mubr.bf16.vlgmr.msra.gmra.mxu0 %v12321_v49 }
 0x38f   : > { %11754 = vmatmul.mubr.bf16.gmra.mxu1 %v12324_v31  ;;  %11717 = vmatprep.mubr.bf16.mxu0 %v12322_v16 }
 0x390   : > { %11757 = vmatprep.mubr.bf16.mxu1 %v12327_v29  ;;  %11770 = vmatpush3.bf16.msra.mxu0 %v12325_v24 }
 0x391   : > { %11771 = vmatprep.subr.bf16.mxu0 %v12329_v45  ;;  %11810 = vmatpush3.bf16.msra.mxu1 %v12331_v42 }
 0x392   : > { %11811 = vmatprep.subr.bf16.mxu1 %v12334_v43 }
 0x394   : > { %11772 = vmatpush3.bf16.msra.mxu0 %v12329_v45 }
 0x395   : > { %11773 = vmatprep.subr.bf16.mxu0 %v12333_v0  ;;  %11812 = vmatpush3.bf16.msra.mxu1 %v12334_v43 }
 0x396   : > { %11718 = vmatmul.mubr.bf16.gmra.mxu0 %v12324_v31  ;;  %11813 = vmatprep.subr.bf16.mxu1 %v12337_v27 }
 0x397   : > { %11758 = vmatmul.mubr.bf16.gmra.mxu1 %v12330_v9  ;;  %11721 = vmatprep.mubr.bf16.mxu0 %v12327_v29 }
 0x398   : > { %11761 = vmatprep.mubr.bf16.mxu1 %v12332_v26  ;;  %11774 = vmatpush3.bf16.msra.mxu0 %v12333_v0 }
 0x399   : > { %11775 = vmatprep.subr.bf16.mxu0 %v12335_v58  ;;  %11814 = vmatpush3.bf16.msra.mxu1 %v12337_v27 }
 0x39a   : > { %11815 = vmatprep.subr.bf16.mxu1 %v12340_v53 }
 0x39c   : > { %11776 = vmatpush3.bf16.msra.mxu0 %v12335_v58 }
 0x39d   : > { %11777 = vmatprep.subr.bf16.mxu0 %v12339_v46  ;;  %11816 = vmatpush3.bf16.msra.mxu1 %v12340_v53 }
 0x39e   : > { %11722 = vmatmul.mubr.bf16.gmra.mxu0 %v12330_v9  ;;  %11817 = vmatprep.subr.bf16.mxu1 %v12342_v32 }
 0x39f   : > { %11762 = vmatmul.mubr.bf16.gmra.mxu1 %v12336_v15  ;;  %11725 = vmatprep.mubr.bf16.mxu0 %v12332_v26 }
 0x3a0   : > { %11765 = vmatprep.mubr.bf16.mxu1 %v12338_v48  ;;  %11778 = vmatpush3.bf16.msra.mxu0 %v12339_v46 }
 0x3a1   : > { %11779 = vmatprep.subr.bf16.mxu0 %v12343_v60  ;;  %11818 = vmatpush3.bf16.msra.mxu1 %v12342_v32 }
 0x3a2   : > { %11819 = vmatprep.subr.bf16.mxu1 %v12345_v17 }
 0x3a4   : > { %11780 = vmatpush3.bf16.msra.mxu0 %v12343_v60 }
 0x3a5   : > { %11820 = vmatpush3.bf16.msra.mxu1 %v12345_v17  ;;  %11781 = vmatprep.subr.bf16.mxu0 %v12346_v54  ;;  %v12357_v17 = vld [vmem:[%s15235_s7 + $0x38] sm:$0xff]  }
 0x3a6   : > { %11726 = vmatmul.mubr.bf16.gmra.mxu0 %v12336_v15 }
 0x3a7   : > { %11766 = vmatmul.mubr.bf16.gmra.mxu1 %v12341_v37  ;;  %11729 = vmatprep.mubr.bf16.mxu0 %v12338_v48 }
 0x3a8   : > { %11821 = vmatprep.mubr.bf16.mxu1 %v12344_v13  ;;  %11782 = vmatpush3.bf16.msra.mxu0 %v12346_v54 }
 0x3a9   : > { %11783 = vmatprep.subr.bf16.mxu0 %v12349_v12 }
 0x3ac   : > { %11784 = vmatpush3.bf16.msra.mxu0 %v12349_v12 }
 0x3ae   : > { %11730 = vmatmul.mubr.bf16.gmra.mxu0 %v12341_v37  ;;  %v15243_v37 = vmov 0.0  }
 0x3af   : > { %11822 = vmatmul.mubr.bf16.vlgmr.msra.gmra.mxu1 %v12347_v44  ;;  %11785 = vmatprep.mubr.bf16.mxu0 %v12344_v13  ;;  %v11535_v47 = vpop.f32.mrf.mxu1  ;;  %v12358_v13 = vld [vmem:[%s15235_s7 + $0x78] sm:$0xff]  }
 0x3b0   : > { %11825 = vmatprep.mubr.bf16.mxu1 %v12348_v50  ;;  %11861 = vmatprep.subr.bf16.mxu1 %v15243_v37 }
 0x3b1   : > { %v6158_v34 = vpop.f32.mrf.mxu1  ;;  %11841 = vmatprep.subr.bf16.mxu0 %v15243_v37  ;;  %11862 = vmatpush3.bf16.msra.mxu1 %v12357_v17 }
 0x3b2   : > { %11863 = vmatprep.subr.bf16.mxu1 %v15243_v37 }
 0x3b3   : > { %v11536_v57 = vpop.f32.mrf.mxu1 }
 0x3b5   : > { %v14624_v8 = vpop.f32.mrf.mxu1 }
 0x3b6   : > { %v11499_v61 = vpop.f32.mrf.mxu0  ;;  %11786 = vmatmul.mubr.bf16.vlgmr.msra.gmra.mxu0 %v12347_v44 }
 0x3b7   : > { %v14618_v30 = vadd.f32 %v11535_v47, %v11499_v61  ;;  %11826 = vmatmul.mubr.bf16.gmra.mxu1 %v12350_v20  ;;  %11789 = vmatprep.mubr.bf16.mxu0 %v12348_v50  ;;  %v12359_v61 = vld [vmem:[%s15235_s7 + $0x30] sm:$0xff]  }
 0x3b8   : > { %11829 = vmatprep.mubr.bf16.mxu1 %v12351_v63  ;;  %v5937_v41 = vpop.f32.mrf.mxu0  ;;  %11842 = vmatpush3.bf16.msra.mxu0 %v12358_v13  ;;  %v12368_v13 = vld [vmem:[%s15235_s7 + $0x8] sm:$0xff]  }
 0x3b9   : > { %v14620_v56 = vadd.f32 %v6158_v34, %v5937_v41  ;;  %11843 = vmatprep.subr.bf16.mxu0 %v15243_v37  ;;  %11864 = vmatpush3.bf16.msra.mxu1 %v12359_v61 }
 0x3ba   : > { %v11500_v6 = vpop.f32.mrf.mxu0  ;;  %11865 = vmatprep.subr.bf16.mxu1 %v15243_v37 }
 0x3bb   : > { %v14622_v3 = vadd.f32 %v11536_v57, %v11500_v6 }
 0x3bc   : > { %v14626_v39 = vpop.f32.mrf.mxu0 }
 0x3be   : > { %11790 = vmatmul.mubr.bf16.gmra.mxu0 %v12350_v20 }
 0x3bf   : > { %11830 = vmatmul.mubr.bf16.gmra.mxu1 %v12352_v10  ;;  %11793 = vmatprep.mubr.bf16.mxu0 %v12351_v63  ;;  %v11539_v11 = vpop.f32.mrf.mxu1 }
 0x3c0   : > { %11833 = vmatprep.mubr.bf16.mxu1 %v12353_v59 }
 0x3c1   : > { %v6174_v19 = vpop.f32.mrf.mxu1 }
 0x3c3   : > { %v11540_v55 = vpop.f32.mrf.mxu1 }
 0x3c5   : > { %v6177_v21 = vpop.f32.mrf.mxu1 }
 0x3c6   : > { %11794 = vmatmul.mubr.bf16.gmra.mxu0 %v12352_v10 }
 0x3c7   : > { %v11503_v1 = vpop.f32.mrf.mxu0  ;;  %11834 = vmatmul.mubr.bf16.gmra.mxu1 %v12354_v4  ;;  %11797 = vmatprep.mubr.bf16.mxu0 %v12353_v59 }
 0x3c8   : > { %v14628_v23 = vadd.f32 %v11539_v11, %v11503_v1  ;;  %11837 = vmatprep.mubr.bf16.mxu1 %v12355_v52 }
 0x3c9   : > { %v5953_v2 = vpop.f32.mrf.mxu0 }
 0x3ca   : > { %v14630_v7 = vadd.f32 %v6174_v19, %v5953_v2  ;;  %v12361_v19 = vld [vmem:[%s15235_s7 + $0x28] sm:$0xff]  }
 0x3cb   : > { %v11504_v22 = vpop.f32.mrf.mxu0  ;;  %11866 = vmatpush3.bf16.msra.mxu1 %v12361_v19 }
 0x3cc   : > { %v14632_v35 = vadd.f32 %v11540_v55, %v11504_v22  ;;  %v12360_v22 = vld [vmem:[%s15235_s7 + $0x70] sm:$0xff]   ;;  %11867 = vmatprep.subr.bf16.mxu1 %v15243_v37 }
 0x3cd   : > { %v5956_v25 = vpop.f32.mrf.mxu0  ;;  %11844 = vmatpush3.bf16.msra.mxu0 %v12360_v22 }
 0x3ce   : > { %v14634_v14 = vadd.f32 %v6177_v21, %v5956_v25  ;;  %11798 = vmatmul.mubr.bf16.gmra.mxu0 %v12354_v4  ;;  %v12363_v25 = vld [vmem:[%s15235_s7 + $0x20] sm:$0xff]   ;;  %11845 = vmatprep.subr.bf16.mxu0 %v15243_v37 }
 0x3cf   : > { %11838 = vmatmul.mubr.bf16.gmra.mxu1 %v12356_v51  ;;  %11801 = vmatprep.mubr.bf16.mxu0 %v12355_v52  ;;  %v11543_v36 = vpop.f32.mrf.mxu1 }
 0x3d0   : > { %11868 = vmatpush3.bf16.msra.mxu1 %v12363_v25  ;;  %11877 = vmatprep.mubr.msk.bf16.mxu1 %vm12444_vm0, %v15243_v37 }
 0x3d1   : > { %v6190_v28 = vpop.f32.mrf.mxu1  ;;  %11869 = vmatprep.subr.bf16.mxu1 %v15243_v37 }
 0x3d3   : > { %v11544_v18 = vpop.f32.mrf.mxu1 }
 0x3d5   : > { %v6193_v5 = vpop.f32.mrf.mxu1 }
 0x3d6   : > { %v11507_v33 = vpop.f32.mrf.mxu0  ;;  %11802 = vmatmul.mubr.bf16.gmra.mxu0 %v12356_v51 }
 0x3d7   : > { %v14636_v40 = vadd.f32 %v11543_v36, %v11507_v33  ;;  %11857 = vmatprep.mubr.msk.bf16.mxu0 %vm12444_vm0, %v15243_v37 }
 0x3d8   : > { %v5969_v38 = vpop.f32.mrf.mxu0 }
 0x3d9   : > { %v14638_v62 = vadd.f32 %v6190_v28, %v5969_v38 }
 0x3da   : > { %v11508_v24 = vpop.f32.mrf.mxu0 }
 0x3db   : > { %v14640_v49 = vadd.f32 %v11544_v18, %v11508_v24  ;;  %v12362_v24 = vld [vmem:[%s15235_s7 + $0x68] sm:$0xff]  }
 0x3dc   : > { %v5972_v16 = vpop.f32.mrf.mxu0  ;;  %11846 = vmatpush3.bf16.msra.mxu0 %v12362_v24 }
 0x3dd   : > { %v14642_v42 = vadd.f32 %v6193_v5, %v5972_v16  ;;  %v12365_v5 = vld [vmem:[%s15235_s7 + $0x18] sm:$0xff]   ;;  %11847 = vmatprep.subr.bf16.mxu0 %v15243_v37 }
 0x3de   : > { %11870 = vmatpush3.bf16.msra.mxu1 %v12365_v5  ;;  %v12374_v5 = vld [vmem:[%s15235_s7 + $0x40] sm:$0xff]  }
 0x3df   : > { %v11547_v31 = vpop.f32.mrf.mxu1  ;;  %11871 = vmatprep.subr.bf16.mxu1 %v15243_v37 }
 0x3e1   : > { %v6206_v45 = vpop.f32.mrf.mxu1 }
 0x3e3   : > { %v11548_v0 = vpop.f32.mrf.mxu1 }
 0x3e5   : > { %v6209_v53 = vpop.f32.mrf.mxu1 }
 0x3e6   : > { %v11511_v29 = vpop.f32.mrf.mxu0 }
 0x3e7   : > { %v14644_v43 = vadd.f32 %v11547_v31, %v11511_v29 }
 0x3e8   : > { %v5985_v27 = vpop.f32.mrf.mxu0 }
 0x3e9   : > { %v14646_v9 = vadd.f32 %v6206_v45, %v5985_v27  ;;  %v12364_v27 = vld [vmem:[%s15235_s7 + $0x60] sm:$0xff]  }
 0x3ea   : > { %v11512_v58 = vpop.f32.mrf.mxu0  ;;  %11848 = vmatpush3.bf16.msra.mxu0 %v12364_v27 }
 0x3eb   : > { %v14648_v26 = vadd.f32 %v11548_v0, %v11512_v58  ;;  %11849 = vmatprep.subr.bf16.mxu0 %v15243_v37 }
 0x3ec   : > { %v5988_v46 = vpop.f32.mrf.mxu0 }
 0x3ed   : > { %v14650_v32 = vadd.f32 %v6209_v53, %v5988_v46  ;;  %v12366_v53 = vld [vmem:[%s15235_s7 + $0x10] sm:$0xff]  }
 0x3ee   : > { %11872 = vmatpush3.bf16.msra.mxu1 %v12366_v53 }
 0x3ef   : > { %v11551_v15 = vpop.f32.mrf.mxu1  ;;  %11873 = vmatprep.subr.bf16.mxu1 %v15243_v37 }
 0x3f1   : > { %v6222_v60 = vpop.f32.mrf.mxu1 }
 0x3f2   : > { %11874 = vmatpush3.bf16.msra.mxu1 %v12368_v13 }
 0x3f3   : > { %v11552_v48 = vpop.f32.mrf.mxu1  ;;  %11875 = vmatprep.subr.bf16.mxu1 %v15243_v37 }
 0x3f5   : > { %v6225_v54 = vpop.f32.mrf.mxu1 }
 0x3f6   : > { %v11515_v12 = vpop.f32.mrf.mxu0 }
 0x3f7   : > { %v14660_v44 = vadd.f32 %v11551_v15, %v11515_v12  ;;  %v11607_v50 = vpop.f32.mrf.mxu1  ;;  %v12367_v12 = vld [vmem:[%s15235_s7 + $0x58] sm:$0xff]  }
 0x3f8   : > { %v6001_v47 = vpop.f32.mrf.mxu0  ;;  %11850 = vmatpush3.bf16.msra.mxu0 %v12367_v12 }
 0x3f9   : > { %v14663_v20 = vadd.f32 %v6222_v60, %v6001_v47  ;;  %v6497_v34 = vpop.f32.mrf.mxu1  ;;  %11851 = vmatprep.subr.bf16.mxu0 %v15243_v37 }
 0x3fa   : > { %v11516_v63 = vpop.f32.mrf.mxu0 }
 0x3fb   : > { %v14669_v41 = vadd.f32 %v11552_v48, %v11516_v63  ;;  %v11608_v57 = vpop.f32.mrf.mxu1 }
 0x3fc   : > { %v6004_v6 = vpop.f32.mrf.mxu0 }
 0x3fd   : > { %v14672_v10 = vadd.f32 %v6225_v54, %v6004_v6  ;;  %v6500_v59 = vpop.f32.mrf.mxu1  ;;  %v12369_v6 = vld [vmem:[%s15235_s7 + $0x50] sm:$0xff]  }
 0x3fe   : > { %v11571_v11 = vpop.f32.mrf.mxu0  ;;  %11852 = vmatpush3.bf16.msra.mxu0 %v12369_v6 }
 0x3ff   : > { %v14677_v4 = vadd.f32 %v11607_v50, %v11571_v11  ;;  %v11611_v1 = vpop.f32.mrf.mxu1  ;;  %11853 = vmatprep.subr.bf16.mxu0 %v15243_v37 }
 0x400   : > { %v6336_v52 = vpop.f32.mrf.mxu0 }
 0x401   : > { %v14679_v55 = vadd.f32 %v6497_v34, %v6336_v52  ;;  %v6513_v2 = vpop.f32.mrf.mxu1 }
 0x402   : > { %v11572_v21 = vpop.f32.mrf.mxu0 }
 0x403   : > { %v14688_v51 = vadd.f32 %v11608_v57, %v11572_v21  ;;  %v11612_v36 = vpop.f32.mrf.mxu1  ;;  %v12371_v21 = vld [vmem:[%s15235_s7 + $0x48] sm:$0xff]  }
 0x404   : > { %v6339_v28 = vpop.f32.mrf.mxu0  ;;  %11854 = vmatpush3.bf16.msra.mxu0 %v12371_v21 }
 0x405   : > { %v14691_v33 = vadd.f32 %v6500_v59, %v6339_v28  ;;  %v6516_v18 = vpop.f32.mrf.mxu1  ;;  %v12370_v59 = vld [vmem:[%s15235_s7] sm:$0xff]   ;;  %11855 = vmatprep.subr.bf16.mxu0 %v15243_v37 }
 0x406   : > { %v11575_v38 = vpop.f32.mrf.mxu0  ;;  %11876 = vmatpush3.bf16.msra.mxu1 %v12370_v59 }
 0x407   : > { %v14700_v16 = vadd.f32 %v11611_v1, %v11575_v38  ;;  %v11615_v31 = vpop.f32.mrf.mxu1  ;;  %11901 = vmatprep.subr.bf16.mxu1 %v15243_v37 }
 0x408   : > { %v6352_v45 = vpop.f32.mrf.mxu0  ;;  %11856 = vmatpush3.bf16.msra.mxu0 %v12374_v5 }
 0x409   : > { %v14702_v29 = vadd.f32 %v6513_v2, %v6352_v45  ;;  %v6529_v0 = vpop.f32.mrf.mxu1  ;;  %11881 = vmatprep.subr.bf16.mxu0 %v15243_v37 }
 0x40a   : > { %v11576_v58 = vpop.f32.mrf.mxu0 }
 0x40b   : > { %v14712_v46 = vadd.f32 %v11612_v36, %v11576_v58  ;;  %v11616_v15 = vpop.f32.mrf.mxu1 }
 0x40c   : > { %v6355_v60 = vpop.f32.mrf.mxu0 }
 0x40d   : > { %v14714_v48 = vadd.f32 %v6516_v18, %v6355_v60  ;;  %v6532_v17 = vpop.f32.mrf.mxu1 }
 0x40e   : > { %v11579_v54 = vpop.f32.mrf.mxu0 }
 0x40f   : > { %v14724_v50 = vadd.f32 %v11615_v31, %v11579_v54  ;;  %v11619_v47 = vpop.f32.mrf.mxu1 }
 0x410   : > { %v6368_v34 = vpop.f32.mrf.mxu0 }
 0x411   : > { %v14726_v61 = vadd.f32 %v6529_v0, %v6368_v34  ;;  %v6545_v63 = vpop.f32.mrf.mxu1 }
 0x412   : > { %v11580_v57 = vpop.f32.mrf.mxu0 }
 0x413   : > { %v14736_v11 = vadd.f32 %v11616_v15, %v11580_v57  ;;  %v11620_v19 = vpop.f32.mrf.mxu1 }
 0x414   : > { %v6371_v1 = vpop.f32.mrf.mxu0 }
 0x415   : > { %v14738_v52 = vadd.f32 %v6532_v17, %v6371_v1  ;;  %v6548_v2 = vpop.f32.mrf.mxu1 }
 0x416   : > { %v11583_v22 = vpop.f32.mrf.mxu0 }
 0x417   : > { %v14745_v25 = vadd.f32 %v11619_v47, %v11583_v22  ;;  %v11623_v36 = vpop.f32.mrf.mxu1 }
 0x418   : > { %v6384_v28 = vpop.f32.mrf.mxu0 }
 0x419   : > { %v14751_v18 = vadd.f32 %v6545_v63, %v6384_v28  ;;  %v6561_v38 = vpop.f32.mrf.mxu1 }
 0x41a   : > { %v11584_v24 = vpop.f32.mrf.mxu0 }
 0x41b   : > { %v14757_v31 = vadd.f32 %v11620_v19, %v11584_v24  ;;  %v11624_v45 = vpop.f32.mrf.mxu1 }
 0x41c   : > { %v6387_v0 = vpop.f32.mrf.mxu0 }
 0x41d   : > { %v14759_v27 = vadd.f32 %v6548_v2, %v6387_v0  ;;  %v6564_v58 = vpop.f32.mrf.mxu1 }
 0x41e   : > { %v11587_v53 = vpop.f32.mrf.mxu0 }
 0x41f   : > { %v14762_v15 = vadd.f32 %v11623_v36, %v11587_v53  ;;  %v11679_v60 = vpop.f32.mrf.mxu1 }
 0x420   : > { %v14765_v17 = vadd.f32 %v11679_v60, %v14677_v4  ;;  %v6400_v54 = vpop.f32.mrf.mxu0 }
 0x421   : > { %v14767_v12 = vadd.f32 %v6561_v38, %v6400_v54  ;;  %v6954_v13 = vpop.f32.mrf.mxu1 }
 0x422   : > { %v14770_v47 = vadd.f32 %v6954_v13, %v14679_v55  ;;  %v11588_v34 = vpop.f32.mrf.mxu0 }
 0x423   : > { %v14772_v63 = vadd.f32 %v11624_v45, %v11588_v34  ;;  %v11680_v57 = vpop.f32.mrf.mxu1 }
 0x424   : > { %v14775_v6 = vadd.f32 %v11680_v57, %v14688_v51  ;;  %v6403_v59 = vpop.f32.mrf.mxu0 }
 0x425   : > { %v14777_v19 = vadd.f32 %v6564_v58, %v6403_v59  ;;  %v6957_v1 = vpop.f32.mrf.mxu1 }
 0x426   : > { %v14780_v4 = vadd.f32 %v6957_v1, %v14691_v33  ;;  %v11643_v2 = vpop.f32.mrf.mxu0  ;;  %v6162_v33 = vadd.f32 %v14624_v8, %v14626_v39 }
 0x427   : > { %v14783_v22 = vadd.f32 %v11643_v2, %v14618_v30  ;;  %v11683_v55 = vpop.f32.mrf.mxu1 }
 0x428   : > { %v14786_v21 = vadd.f32 %v11683_v55, %v14700_v16  ;;  %v6756_v36 = vpop.f32.mrf.mxu0 }
 0x429   : > { %v14789_v28 = vadd.f32 %v6756_v36, %v14620_v56  ;;  %v6970_v51 = vpop.f32.mrf.mxu1 }
 0x42a   : > { %v14792_v38 = vadd.f32 %v6970_v51, %v14702_v29  ;;  %v11644_v24 = vpop.f32.mrf.mxu0 }
 0x42b   : > { %v14797_v5 = vadd.f32 %v11644_v24, %v14622_v3  ;;  %v11684_v30 = vpop.f32.mrf.mxu1 }
 0x42c   : > { %v14800_v45 = vadd.f32 %v11684_v30, %v14712_v46  ;;  %v6759_v16 = vpop.f32.mrf.mxu0 }
 0x42d   : > { %v14802_v0 = vadd.f32 %v6759_v16, %v6162_v33  ;;  %v6973_v56 = vpop.f32.mrf.mxu1 }
 0x42e   : > { %v14805_v58 = vadd.f32 %v6973_v56, %v14714_v48  ;;  %v11647_v29 = vpop.f32.mrf.mxu0 }
 0x42f   : > { %v14808_v53 = vadd.f32 %v11647_v29, %v14628_v23  ;;  %v11687_v60 = vpop.f32.mrf.mxu1 }
 0x430   : > { %v14811_v8 = vadd.f32 %v11687_v60, %v14724_v50  ;;  %v6772_v3 = vpop.f32.mrf.mxu0 }
 0x431   : > { %v14814_v39 = vadd.f32 %v6772_v3, %v14630_v7  ;;  %v6986_v46 = vpop.f32.mrf.mxu1 }
 0x432   : > { %v14817_v54 = vadd.f32 %v6986_v46, %v14726_v61  ;;  %v11648_v13 = vpop.f32.mrf.mxu0 }
 0x433   : > { %v14820_v48 = vadd.f32 %v11648_v13, %v14632_v35  ;;  %v11688_v34 = vpop.f32.mrf.mxu1 }
 0x434   : > { %v14823_v23 = vadd.f32 %v11688_v34, %v14736_v11  ;;  %v6775_v57 = vpop.f32.mrf.mxu0 }
 0x435   : > { %v14826_v50 = vadd.f32 %v6775_v57, %v14634_v14  ;;  %v6989_v59 = vpop.f32.mrf.mxu1 }
 0x436   : > { %v14829_v7 = vadd.f32 %v6989_v59, %v14738_v52  ;;  %v11651_v1 = vpop.f32.mrf.mxu0 }
 0x437   : > { %v14832_v61 = vadd.f32 %v11651_v1, %v14636_v40  ;;  %v11691_v2 = vpop.f32.mrf.mxu1 }
 0x438   : > { %v14835_v35 = vadd.f32 %v11691_v2, %v14745_v25  ;;  %v6788_v55 = vpop.f32.mrf.mxu0 }
 0x439   : > { %v14838_v11 = vadd.f32 %v6788_v55, %v14638_v62  ;;  %v7002_v36 = vpop.f32.mrf.mxu1 }
 0x43a   : > { %15621 = vst [vmem:[#allocation66_spill] sm:$0xff] %v14835_v35  ;;  %v14841_v14 = vadd.f32 %v7002_v36, %v14751_v18  ;;  %v11652_v51 = vpop.f32.mrf.mxu0 }
 0x43b   : > { %v14844_v52 = vadd.f32 %v11652_v51, %v14640_v49  ;;  %v11692_v24 = vpop.f32.mrf.mxu1 }
 0x43c   : > { %15622 = vst [vmem:[#allocation67_spill] sm:$0xff] %v14841_v14  ;;  %v14847_v40 = vadd.f32 %v11692_v24, %v14757_v31  ;;  %v6791_v33 = vpop.f32.mrf.mxu0 }
 0x43d   : > { %v14850_v25 = vadd.f32 %v6791_v33, %v14642_v42  ;;  %v7005_v30 = vpop.f32.mrf.mxu1 }
 0x43e   : > { %15623 = vst [vmem:[#allocation62_spill] sm:$0xff] %v14847_v40  ;;  %v14853_v62 = vadd.f32 %v7005_v30, %v14759_v27  ;;  %v11655_v16 = vpop.f32.mrf.mxu0 }
 0x43f   : > { %15624 = vst [vmem:[#allocation68_spill] sm:$0xff] %v14850_v25  ;;  %v14856_v18 = vadd.f32 %v11655_v16, %v14644_v43  ;;  %v11695_v56 = vpop.f32.mrf.mxu1 }
 0x440   : > { %15625 = vst [vmem:[#allocation69_spill] sm:$0xff] %v14853_v62  ;;  %v14859_v49 = vadd.f32 %v11695_v56, %v14762_v15  ;;  %v6804_v29 = vpop.f32.mrf.mxu0 }
 0x441   : > { %15626 = vst [vmem:[#allocation32_spill] sm:$0xff] %v14856_v18  ;;  %v14862_v31 = vadd.f32 %v6804_v29, %v14646_v9  ;;  %v7018_v60 = vpop.f32.mrf.mxu1 }
 0x442   : > { %15627 = vst [vmem:[#allocation63_spill] sm:$0xff] %v14859_v49  ;;  %v14865_v42 = vadd.f32 %v7018_v60, %v14767_v12  ;;  %v11656_v3 = vpop.f32.mrf.mxu0 }
 0x443   : > { %15628 = vst [vmem:[#allocation70_spill] sm:$0xff] %v14862_v31  ;;  %v14868_v27 = vadd.f32 %v11656_v3, %v14648_v26  ;;  %v11696_v46 = vpop.f32.mrf.mxu1 }
 0x444   : > { %15629 = vst [vmem:[#allocation71_spill] sm:$0xff] %v14865_v42  ;;  %v14871_v43 = vadd.f32 %v11696_v46, %v14772_v63  ;;  %v6807_v13 = vpop.f32.mrf.mxu0 }
 0x445   : > { %15630 = vst [vmem:[#allocation64_spill] sm:$0xff] %v14868_v27  ;;  %v14874_v15 = vadd.f32 %v6807_v13, %v14650_v32  ;;  %v7021_v34 = vpop.f32.mrf.mxu1 }
 0x446   : > { %15631 = vst [vmem:[#allocation33_spill] sm:$0xff] %v14871_v43  ;;  %v14877_v9 = vadd.f32 %v7021_v34, %v14777_v19  ;;  %v11659_v57 = vpop.f32.mrf.mxu0 }
 0x447   : > { %15632 = vst [vmem:[#allocation72_spill] sm:$0xff] %v14874_v15  ;;  %v14880_v12 = vadd.f32 %v11659_v57, %v14660_v44  ;;  %v11751_v59 = vpop.f32.mrf.mxu1 }
 0x448   : > { %15633 = vst [vmem:[#allocation73_spill] sm:$0xff] %v14877_v9  ;;  %v6820_v1 = vpop.f32.mrf.mxu0 }
 0x449   : > { %15634 = vst [vmem:[#allocation34_spill] sm:$0xff] %v14880_v12  ;;  %v14883_v26 = vadd.f32 %v6820_v1, %v14663_v20  ;;  %v7431_v2 = vpop.f32.mrf.mxu1 }
 0x44a   : > { %v11660_v63 = vpop.f32.mrf.mxu0 }
 0x44b   : > { %15635 = vst [vmem:[#allocation74_spill] sm:$0xff] %v14883_v26  ;;  %v14886_v55 = vadd.f32 %v11660_v63, %v14669_v41  ;;  %v11752_v32 = vpop.f32.mrf.mxu1 }
 0x44c   : > { %v6823_v36 = vpop.f32.mrf.mxu0 }
 0x44d   : > { %15636 = vst [vmem:[#allocation75_spill] sm:$0xff] %v14886_v55  ;;  %v14889_v51 = vadd.f32 %v6823_v36, %v14672_v10  ;;  %v7434_v19 = vpop.f32.mrf.mxu1 }
 0x44e   : > { %v11715_v24 = vpop.f32.mrf.mxu0 }
 0x44f   : > { %15637 = vst [vmem:[#allocation36_spill] sm:$0xff] %v14889_v51  ;;  %v11755_v33 = vpop.f32.mrf.mxu1 }
 0x450   : > { %v7233_v44 = vpop.f32.mrf.mxu0 }
 0x451   : > { %v14891_v30 = vpop.f32.mrf.mxu1 }
 0x452   : > { %v11716_v16 = vpop.f32.mrf.mxu0 }
 0x453   : > { %v14893_v56 = vpop.f32.mrf.mxu1 }
 0x454   : > { %v7236_v20 = vpop.f32.mrf.mxu0 }
 0x455   : > { %v14895_v29 = vpop.f32.mrf.mxu1 }
 0x456   : > { %v11719_v60 = vpop.f32.mrf.mxu0 }
 0x457   : > { %v14897_v41 = vpop.f32.mrf.mxu1 }
 0x458   : > { %v14899_v3 = vpop.f32.mrf.mxu0 }
 0x459   : > { %v14901_v46 = vpop.f32.mrf.mxu1 }
 0x45a   : > { %v14903_v10 = vpop.f32.mrf.mxu0 }
 0x45b   : > { %v14905_v13 = vpop.f32.mrf.mxu1 }
 0x45c   : > { %v14907_v34 = vpop.f32.mrf.mxu0 }
 0x45d   : > { %v14909_v57 = vpop.f32.mrf.mxu1 }
 0x45e   : > { %v14911_v1 = vpop.f32.mrf.mxu0 }
 0x45f   : > { %v14913_v63 = vpop.f32.mrf.mxu1 }
 0x460   : > { %15638 = vst [vmem:[#allocation35_spill] sm:$0xff] %v14913_v63  ;;  %v14915_v36 = vpop.f32.mrf.mxu0 }
 0x461   : > { %v14917_v37 = vpop.f32.mrf.mxu1 }
 0x462   : > { %15639 = vst [vmem:[#allocation5_spill] sm:$0xff] %v14917_v37  ;;  %v14919_v51 = vpop.f32.mrf.mxu0 }
 0x463   : > { %v14921_v9 = vpop.f32.mrf.mxu1 }
 0x464   : > { %15640 = vst [vmem:[#allocation38_spill] sm:$0xff] %v14921_v9  ;;  %v14923_v55 = vpop.f32.mrf.mxu0 }
 0x465   : > { %15641 = vst [vmem:[#allocation37_spill] sm:$0xff] %v14923_v55  ;;  %v14925_v43 = vpop.f32.mrf.mxu1 }
 0x466   : > { %15642 = vst [vmem:[#allocation65_spill] sm:$0xff] %v14925_v43  ;;  %v14927_v26 = vpop.f32.mrf.mxu0 }
 0x467   : > { %15643 = vst [vmem:[#allocation87_spill] sm:$0xff] %v14927_v26  ;;  %v14929_v42 = vpop.f32.mrf.mxu1 }
 0x468   : > { %15644 = vst [vmem:[#allocation76_spill] sm:$0xff] %v14929_v42  ;;  %v14931_v12 = vpop.f32.mrf.mxu0 }
 0x469   : > { %15645 = vst [vmem:[#allocation77_spill] sm:$0xff] %v14931_v12  ;;  %v14933_v49 = vpop.f32.mrf.mxu1 }
 0x46a   : > { %15646 = vst [vmem:[#allocation78_spill] sm:$0xff] %v14933_v49  ;;  %v14935_v15 = vpop.f32.mrf.mxu0  ;;  %v7512_v49 = vadd.f32 %v11751_v59, %v14765_v17 }
 0x46b   : > { %15647 = vst [vmem:[#allocation79_spill] sm:$0xff] %v14935_v15  ;;  %v14937_v62 = vpop.f32.mrf.mxu1  ;;  %v7314_v15 = vadd.f32 %v11715_v24, %v14783_v22  ;;  %v7511_v22 = vadd.f32 %v7434_v19, %v14780_v4  ;;  %v7313_v24 = vadd.f32 %v7236_v20, %v14802_v0  ;;  %v7514_v0 = vadd.f32 %v14891_v30, %v14792_v38 }
 0x46c   : > { %15648 = vst [vmem:[#allocation6_spill] sm:$0xff] %v14937_v62  ;;  %v14939_v27 = vpop.f32.mrf.mxu0  ;;  %v7520_v20 = vadd.f32 %v14897_v41, %v14811_v8 }
 0x46d   : > { %15649 = vst [vmem:[#allocation82_spill] sm:$0xff] %v14939_v27  ;;  %v14941_v40 = vpop.f32.mrf.mxu1  ;;  %v7510_v27 = vadd.f32 %v7431_v2, %v14770_v47 }
 0x46e   : > { %15650 = vst [vmem:[#allocation39_spill] sm:$0xff] %v14941_v40  ;;  %v14943_v9 = vpop.f32.mrf.mxu0  ;;  %v7312_v40 = vadd.f32 %v7233_v44, %v14789_v28 }
 0x46f   : > { %15651 = vst [vmem:[#allocation83_spill] sm:$0xff] %v14943_v9  ;;  %v11823_v31 = vpop.f32.mrf.mxu1 }
 0x470   : > { %v14945_v43 = vpop.f32.mrf.mxu0  ;;  %v7989_v9 = vadd.f32 %v11823_v31, %v7512_v49  ;;  %v7516_v31 = vadd.f32 %v11755_v33, %v14786_v21  ;;  %v7316_v21 = vadd.f32 %v14899_v3, %v14814_v39  ;;  %v7515_v39 = vadd.f32 %v14895_v29, %v14805_v58 }
 0x471   : > { %15652 = vst [vmem:[#allocation80_spill] sm:$0xff] %v14945_v43  ;;  %v7908_v37 = vpop.f32.mrf.mxu1  ;;  %v7513_v43 = vadd.f32 %v11752_v32, %v14775_v6  ;;  %v7318_v6 = vadd.f32 %v11719_v60, %v14808_v53  ;;  %v7317_v33 = vadd.f32 %v14907_v34, %v14826_v50  ;;  %v7322_v60 = vadd.f32 %v14911_v1, %v14832_v61 }
 0x472   : > { %v14947_v14 = vpop.f32.mrf.mxu0  ;;  %v7987_v55 = vadd.f32 %v7908_v37, %v7510_v27  ;;  %v14964_v37 = vld [vmem:[%s15234_s6] ss:$0 sm:$0xff]  ;;  %v7319_v27 = vadd.f32 %v14903_v10, %v14820_v48  ;;  %v7521_v1 = vadd.f32 %v14905_v13, %v14823_v23 }
 0x473   : > { %15653 = vst [vmem:[#allocation81_spill] sm:$0xff] %v14947_v14  ;;  %v11824_v42 = vpop.f32.mrf.mxu1  ;;  %v7315_v14 = vadd.f32 %v11716_v16, %v14797_v5 }
 0x474   : > { %v14949_v12 = vpop.f32.mrf.mxu0  ;;  %v7990_v47 = vadd.f32 %v11824_v42, %v7513_v43  ;;  %v7517_v42 = vadd.f32 %v14893_v56, %v14800_v45 }
 0x475   : > { %15654 = vst [vmem:[#allocation84_spill] sm:$0xff] %v14949_v12  ;;  %v7911_v62 = vpop.f32.mrf.mxu1 }
 0x476   : > { %v11787_v26 = vpop.f32.mrf.mxu0 }
 0x477   : > { %v7791_v18 = vadd.f32 %v11787_v26, %v7314_v15  ;;  %v11827_v63 = vpop.f32.mrf.mxu1  ;;  %v7988_v26 = vadd.f32 %v7911_v62, %v7511_v22  ;;  %v7518_v22 = vadd.f32 %v14901_v46, %v14817_v54 }
 0x478   : > { %v7710_v35 = vpop.f32.mrf.mxu0 }
 0x479   : > { %v8009_v12 = vmax.f32 %v7791_v18, %v7989_v9  ;;  %v7789_v25 = vadd.f32 %v7710_v35, %v7312_v40  ;;  %v7924_v17 = vpop.f32.mrf.mxu1 }
 0x47a   : > { %v11788_v59 = vpop.f32.mrf.mxu0 }
 0x47b   : > { %v8007_v2 = vmax.f32 %v7789_v25, %v7987_v55  ;;  %v7792_v28 = vadd.f32 %v11788_v59, %v7315_v14  ;;  %v11828_v49 = vpop.f32.mrf.mxu1  ;;  %v7993_v25 = vadd.f32 %v11827_v63, %v7516_v31  ;;  %v7320_v59 = vadd.f32 %v14915_v36, %v14838_v11 }
 0x47c   : > { %v7713_v15 = vpop.f32.mrf.mxu0  ;;  %v7994_v30 = vadd.f32 %v11828_v49, %v7517_v42 }
 0x47d   : > { %v8027_v5 = vmax.f32 %v8007_v2, %v8009_v12  ;;  %v8010_v4 = vmax.f32 %v7792_v28, %v7990_v47  ;;  %v7790_v35 = vadd.f32 %v7713_v15, %v7313_v24  ;;  %v7927_v40 = vpop.f32.mrf.mxu1  ;;  %v7991_v12 = vadd.f32 %v7924_v17, %v7514_v0  ;;  %v15657_v0 = vld [vmem:[#allocation66_spill] sm:$0xff] }
 0x47e   : > { %v11791_v14 = vpop.f32.mrf.mxu0  ;;  %v7992_v10 = vadd.f32 %v7927_v40, %v7515_v39  ;;  %v7323_v28 = vadd.f32 %v14919_v51, %v14844_v52  ;;  %v7519_v15 = vadd.f32 %v14909_v57, %v14829_v7  ;;  %v15664_v39 = vld [vmem:[#allocation77_spill] sm:$0xff] }
 0x47f   : > { %v8008_v53 = vmax.f32 %v7790_v35, %v7988_v26  ;;  %v7795_v18 = vadd.f32 %v11791_v14, %v7318_v6  ;;  %v11831_v62 = vpop.f32.mrf.mxu1  ;;  %v8044_v43 = vadd.f32 %v14964_v37, %v8027_v5  ;;  %v15655_v26 = vld [vmem:[#allocation68_spill] sm:$0xff]  ;;  %v15656_v5 = vld [vmem:[#allocation37_spill] sm:$0xff]  ;;  %v15658_v14 = vld [vmem:[#allocation35_spill] sm:$0xff] }
 0x480   : > { %v7726_v9 = vpop.f32.mrf.mxu0  ;;  %v7997_v8 = vadd.f32 %v11831_v62, %v7520_v20  ;;  %v12373_v20 = vld [vmem:[%s15235_s7 + $0xf8] sm:$0xff]  }
 0x481   : > { %v8028_v55 = vmax.f32 %v8008_v53, %v8010_v4  ;;  %v8013_v38 = vmax.f32 %v7795_v18, %v7993_v25  ;;  %v7793_v32 = vadd.f32 %v7726_v9, %v7316_v21  ;;  %v7940_v19 = vpop.f32.mrf.mxu1  ;;  %v8054_v3 = vmax.f32 %v8044_v43, 0.0  ;;  %v15659_v25 = vld [vmem:[#allocation32_spill] sm:$0xff]  ;;  %v15660_v53 = vld [vmem:[#allocation87_spill] sm:$0xff] }
 0x482   : > { %v11792_v44 = vpop.f32.mrf.mxu0  ;;  %v7995_v54 = vadd.f32 %v7940_v19, %v7518_v22  ;;  %v7321_v4 = vadd.f32 %v15656_v5, %v15655_v26  ;;  %v7524_v21 = vadd.f32 %v15658_v14, %v15657_v0  ;;  %v7326_v18 = vadd.f32 %v15660_v53, %v15659_v25  ;;  %v15663_v19 = vld [vmem:[#allocation70_spill] sm:$0xff]  ;;  %v15674_v26 = vld [vmem:[#allocation63_spill] sm:$0xff]  ;;  %v15675_v5 = vld [vmem:[#allocation76_spill] sm:$0xff] }
 0x483   : > { %v8045_v45 = vadd.f32 %v14964_v37, %v8028_v55  ;;  %v8011_v16 = vmax.f32 %v7793_v32, %v7991_v12  ;;  %v7796_v48 = vadd.f32 %v11792_v44, %v7319_v27  ;;  %v11832_v56 = vpop.f32.mrf.mxu1  ;;  %v15661_v55 = vld [vmem:[#allocation67_spill] sm:$0xff] }
 0x484   : > { %v7729_v63 = vpop.f32.mrf.mxu0  ;;  %v7998_v23 = vadd.f32 %v11832_v56, %v7521_v1  ;;  %v15671_v1 = vld [vmem:[#allocation72_spill] sm:$0xff] }
 0x485   : > { %v8055_v58 = vmax.f32 %v8045_v45, 0.0  ;;  %v8029_v29 = vmax.f32 %v8011_v16, %v8013_v38  ;;  %v8014_v17 = vmax.f32 %v7796_v48, %v7994_v30  ;;  %v7794_v50 = vadd.f32 %v7729_v63, %v7317_v33  ;;  %v7943_v34 = vpop.f32.mrf.mxu1  ;;  %v15662_v38 = vld [vmem:[#allocation5_spill] sm:$0xff]  ;;  %v15667_v63 = vld [vmem:[#allocation64_spill] sm:$0xff] }
 0x486   : > { %v11795_v24 = vpop.f32.mrf.mxu0  ;;  %v7996_v42 = vadd.f32 %v7943_v34, %v7519_v15  ;;  %v7522_v32 = vadd.f32 %v15662_v38, %v15661_v55  ;;  %v7324_v33 = vadd.f32 %v15664_v39, %v15663_v19  ;;  %v15673_v15 = vmov 0.0   ;;  %v12378_v19 = vld [vmem:[%s15235_s7 + $0xe8] sm:$0xff]   ;;  %v15682_v39 = vld [vmem:[#allocation33_spill] sm:$0xff] }
 0x487   : > { %v10119_v47 = vpack.c.bf16 %v8055_v58, %v8054_v3  ;;  %v8012_v41 = vmax.f32 %v7794_v50, %v7992_v10  ;;  %v7799_v2 = vadd.f32 %v11795_v24, %v7322_v60  ;;  %v11835_v61 = vpop.f32.mrf.mxu1  ;;  %v8046_v49 = vadd.f32 %v14964_v37, %v8029_v29  ;;  %v15665_v60 = vld [vmem:[#allocation62_spill] sm:$0xff]  ;;  %v15668_v58 = vld [vmem:[#allocation79_spill] sm:$0xff] }
 0x488   : > { %v7742_v31 = vpop.f32.mrf.mxu0  ;;  %v8001_v45 = vadd.f32 %v11835_v61, %v7524_v21  ;;  %v15666_v3 = vld [vmem:[#allocation38_spill] sm:$0xff]  ;;  %v7327_v29 = vadd.f32 %v15668_v58, %v15667_v63 }
 0x489   : > { %10120 = vst [vmem:[#allocation3] sm:$0xff] %v10119_v47   ;;  %v8030_v46 = vmax.f32 %v8012_v41, %v8014_v17  ;;  %v8017_v6 = vmax.f32 %v7799_v2, %v7997_v8  ;;  %v7797_v11 = vadd.f32 %v7742_v31, %v7320_v59  ;;  %v7956_v36 = vpop.f32.mrf.mxu1  ;;  %v8056_v62 = vmax.f32 %v8046_v49, 0.0  ;;  %v15669_v41 = vld [vmem:[#allocation69_spill] sm:$0xff] }
 0x48a   : > { %v11796_v35 = vpop.f32.mrf.mxu0  ;;  %v7525_v10 = vadd.f32 %v15666_v3, %v15665_v60  ;;  %v7999_v22 = vadd.f32 %v7956_v36, %v7522_v32  ;;  %v15670_v2 = vld [vmem:[#allocation65_spill] sm:$0xff]  ;;  %v12375_v36 = vld [vmem:[%s15235_s7 + $0xf0] sm:$0xff]  }
 0x48b   : > { %v8047_v13 = vadd.f32 %v14964_v37, %v8030_v46  ;;  %v8015_v52 = vmax.f32 %v7797_v11, %v7995_v54  ;;  %v7800_v51 = vadd.f32 %v11796_v35, %v7323_v28  ;;  %v11836_v40 = vpop.f32.mrf.mxu1  ;;  %v7523_v61 = vadd.f32 %v15670_v2, %v15669_v41  ;;  %v15672_v28 = vld [vmem:[#allocation82_spill] sm:$0xff] }
 0x48c   : > { %v7745_v27 = vpop.f32.mrf.mxu0  ;;  %v7325_v49 = vadd.f32 %v15672_v28, %v15671_v1  ;;  %v8002_v31 = vadd.f32 %v11836_v40, %v7525_v10  ;;  %v15676_v35 = vld [vmem:[#allocation34_spill] sm:$0xff] }
 0x48d   : > { %v8057_v7 = vmax.f32 %v8047_v13, 0.0  ;;  %v8031_v57 = vmax.f32 %v8015_v52, %v8017_v6  ;;  %v8018_v43 = vmax.f32 %v7800_v51, %v7998_v23  ;;  %v7798_v9 = vadd.f32 %v7745_v27, %v7321_v4  ;;  %v7959_v12 = vpop.f32.mrf.mxu1  ;;  %v15677_v23 = vld [vmem:[#allocation83_spill] sm:$0xff]  ;;  %v15680_v27 = vld [vmem:[#allocation74_spill] sm:$0xff] }
 0x48e   : > { %v11799_v44 = vpop.f32.mrf.mxu0  ;;  %v7528_v4 = vadd.f32 %v15675_v5, %v15674_v26  ;;  %v7330_v13 = vadd.f32 %v15677_v23, %v15676_v35  ;;  %v8000_v51 = vadd.f32 %v7959_v12, %v7523_v61  ;;  %v12377_v12 = vld [vmem:[%s15235_s7 + $0xb8] sm:$0xff]   ;;  %v12380_v1 = vld [vmem:[%s15235_s7 + $0xe0] sm:$0xff]   ;;  %v12381_v5 = vld [vmem:[%s15235_s7 + $0xa8] sm:$0xff]  }
 0x48f   : > { %v10124_v30 = vpack.c.bf16 %v8057_v7, %v8056_v62  ;;  %v8016_v16 = vmax.f32 %v7798_v9, %v7996_v42  ;;  %v7803_v48 = vadd.f32 %v11799_v44, %v7326_v18  ;;  %v11839_v56 = vpop.f32.mrf.mxu1  ;;  %v8048_v17 = vadd.f32 %v14964_v37, %v8031_v57  ;;  %v15678_v18 = vld [vmem:[#allocation71_spill] sm:$0xff]  ;;  %v15679_v62 = vld [vmem:[#allocation78_spill] sm:$0xff]  ;;  %v15681_v7 = vld [vmem:[#allocation80_spill] sm:$0xff] }
 0x490   : > { %v7758_v50 = vpop.f32.mrf.mxu0  ;;  %v12372_v34 = vld [vmem:[#allocation3] sm:$0xff]   ;;  %v7526_v42 = vadd.f32 %v15679_v62, %v15678_v18  ;;  %v7328_v57 = vadd.f32 %v15681_v7, %v15680_v27  ;;  %v8005_v55 = vadd.f32 %v11839_v56, %v7528_v4  ;;  %v12382_v4 = vld [vmem:[%s15235_s7 + $0xd8] sm:$0xff]   ;;  %v12390_v18 = vld [vmem:[%s15235_s7 + $0x88] sm:$0xff]  }
 0x491   : > { %10154 = vst [vmem:[#allocation3 + $0x8] sm:$0xff] %v10124_v30   ;;  %v8032_v59 = vmax.f32 %v8016_v16, %v8018_v43  ;;  %v8021_v24 = vmax.f32 %v7803_v48, %v8001_v45  ;;  %v7801_v47 = vadd.f32 %v7758_v50, %v7324_v33  ;;  %v7972_v8 = vpop.f32.mrf.mxu1  ;;  %11878 = vmatmul.mubr.bf16.vlgmr.msra.gmra.mxu1 %v12372_v34  ;;  %v8058_v52 = vmax.f32 %v8048_v17, 0.0  ;;  %v15683_v33 = vld [vmem:[#allocation6_spill] sm:$0xff]  ;;  %v15684_v30 = vld [vmem:[#allocation75_spill] sm:$0xff]  ;;  %v15685_v45 = vld [vmem:[#allocation81_spill] sm:$0xff] }
 0x492   : > { %v11800_v54 = vpop.f32.mrf.mxu0  ;;  %11902 = vmatpush3.bf16.msra.mxu1 %v12373_v20  ;;  %11917 = vmatprep.mubr.msk.bf16.mxu1 %vm12444_vm0, %v15673_v15  ;;  %v7529_v44 = vadd.f32 %v15683_v33, %v15682_v39  ;;  %v7331_v16 = vadd.f32 %v15685_v45, %v15684_v30  ;;  %v8003_v60 = vadd.f32 %v7972_v8, %v7526_v42  ;;  %v15687_v17 = vld [vmem:[#allocation39_spill] sm:$0xff]  ;;  %v15688_v34 = vld [vmem:[#allocation36_spill] sm:$0xff]  ;;  %v12391_v42 = vld [vmem:[%s15235_s7 + $0x80] sm:$0xff]  }
 0x493   : > { %v8049_v46 = vadd.f32 %v14964_v37, %v8032_v59  ;;  %v8019_v6 = vmax.f32 %v7801_v47, %v7999_v22  ;;  %v7804_v11 = vadd.f32 %v11800_v54, %v7327_v29  ;;  %11903 = vmatprep.subr.bf16.mxu1 %v15673_v15  ;;  %v11840_v25 = vpop.f32.mrf.mxu1  ;;  %v15686_v29 = vld [vmem:[#allocation73_spill] sm:$0xff]  ;;  %v15689_v22 = vld [vmem:[#allocation84_spill] sm:$0xff]  ;;  %v12405_v30 = vld [vmem:[%s15237_s9 + $0x20] sm:$0xff]  }
 0x494   : > { %v7761_v40 = vpop.f32.mrf.mxu0  ;;  %v7527_v50 = vadd.f32 %v15687_v17, %v15686_v29  ;;  %v7329_v59 = vadd.f32 %v15689_v22, %v15688_v34  ;;  %v12379_v8 = vld [vmem:[%s15235_s7 + $0xb0] sm:$0xff]   ;;  %v12393_v27 = vld [vmem:[%s15235_s7 + $0x138] sm:$0xff]  }
 0x495   : > { %v8059_v0 = vmax.f32 %v8049_v46, 0.0  ;;  %v8033_v14 = vmax.f32 %v8019_v6, %v8021_v24  ;;  %v8022_v21 = vmax.f32 %v7804_v11, %v8002_v31  ;;  %v7802_v53 = vadd.f32 %v7761_v40, %v7325_v49  ;;  %v7975_v10 = vpop.f32.mrf.mxu1  ;;  %v12402_v39 = vld [vmem:[%s15237_s9 + $0x38] sm:$0xff]   ;;  %v12403_v33 = vld [vmem:[%s15237_s9 + $0x30] sm:$0xff]  }
 0x496   : > { %v11803_v43 = vpop.f32.mrf.mxu0  ;;  %11904 = vmatpush3.bf16.msra.mxu1 %v12375_v36  ;;  %v8006_v24 = vadd.f32 %v11840_v25, %v7529_v44  ;;  %v8004_v49 = vadd.f32 %v7975_v10, %v7527_v50  ;;  %v12387_v25 = vld [vmem:[%s15235_s7 + $0x90] sm:$0xff]   ;;  %v12404_v44 = vld [vmem:[%s15237_s9 + $0x28] sm:$0xff]   ;;  %v12406_v45 = vld [vmem:[%s15237_s9 + $0x18] sm:$0xff]  }
 0x497   : > { %v10129_v9 = vpack.c.bf16 %v8059_v0, %v8058_v52  ;;  %v8020_v38 = vmax.f32 %v7802_v53, %v8000_v51  ;;  %v7807_v32 = vadd.f32 %v11803_v43, %v7330_v13  ;;  %v8050_v48 = vadd.f32 %v14964_v37, %v8033_v14  ;;  %11905 = vmatprep.subr.bf16.mxu1 %v15673_v15  ;;  %v12383_v52 = vld [vmem:[%s15235_s7 + $0xa0] sm:$0xff]   ;;  %v12384_v51 = vld [vmem:[%s15235_s7 + $0xd0] sm:$0xff]   ;;  %v12395_v43 = vld [vmem:[%s15235_s7 + $0x128] sm:$0xff]  }
 0x498   : > { %v7774_v56 = vpop.f32.mrf.mxu0  ;;  %v12376_v20 = vld [vmem:[#allocation3 + $0x8] sm:$0xff]   ;;  %v12388_v53 = vld [vmem:[%s15235_s7 + $0xc0] sm:$0xff]  }
 0x499   : > { %10155 = vst [vmem:[#allocation3 + $0x10] sm:$0xff] %v10129_v9   ;;  %v8034_v3 = vmax.f32 %v8020_v38, %v8022_v21  ;;  %v8025_v63 = vmax.f32 %v7807_v32, %v8005_v55  ;;  %v7805_v58 = vadd.f32 %v7774_v56, %v7328_v57  ;;  %11858 = vmatmul.mubr.bf16.vlgmr.msra.gmra.mxu0 %v12376_v20  ;;  %v8060_v28 = vmax.f32 %v8050_v48, 0.0  ;;  %v12386_v21 = vld [vmem:[%s15235_s7 + $0xc8] sm:$0xff]   ;;  %v12394_v57 = vld [vmem:[%s15235_s7 + $0x130] sm:$0xff]   ;;  %v12396_v9 = vld [vmem:[%s15235_s7 + $0x120] sm:$0xff]  }
 0x49a   : > { %v11804_v47 = vpop.f32.mrf.mxu0  ;;  %11882 = vmatpush3.bf16.msra.mxu0 %v12377_v12  ;;  %11906 = vmatpush3.bf16.msra.mxu1 %v12378_v19  ;;  %v12397_v55 = vld [vmem:[%s15235_s7 + $0x118] sm:$0xff]   ;;  %v12398_v38 = vld [vmem:[%s15235_s7 + $0x110] sm:$0xff]   ;;  %v12399_v32 = vld [vmem:[%s15235_s7 + $0x108] sm:$0xff]  }
 0x49b   : > { %v8051_v41 = vadd.f32 %v14964_v37, %v8034_v3  ;;  %v8023_v2 = vmax.f32 %v7805_v58, %v8003_v60  ;;  %v7808_v61 = vadd.f32 %v11804_v47, %v7331_v16  ;;  %11883 = vmatprep.subr.bf16.mxu0 %v15673_v15  ;;  %11907 = vmatprep.subr.bf16.mxu1 %v15673_v15  ;;  %v12400_v12 = vld [vmem:[%s15235_s7 + $0x100] sm:$0xff]   ;;  %v12407_v16 = vld [vmem:[%s15237_s9 + $0x10] sm:$0xff]   ;;  %v12408_v48 = vld [vmem:[%s15237_s9 + $0x8] sm:$0xff]  }
 0x49c   : > { %v7777_v31 = vpop.f32.mrf.mxu0  ;;  %11897 = vmatprep.mubr.msk.bf16.mxu0 %vm12444_vm0, %v15673_v15  ;;  %v12409_v56 = vld [vmem:[%s15237_s9] sm:$0xff]   ;;  %v12410_v20 = vld [vmem:[%s15239_s11 + $0x38] sm:$0xff]   ;;  %v12411_v60 = vld [vmem:[%s15239_s11 + $0x30] sm:$0xff]  }
 0x49d   : > { %v8061_v54 = vmax.f32 %v8051_v41, 0.0  ;;  %v8035_v46 = vmax.f32 %v8023_v2, %v8025_v63  ;;  %v8026_v6 = vmax.f32 %v7808_v61, %v8006_v24  ;;  %v7806_v11 = vadd.f32 %v7777_v31, %v7329_v59  ;;  %v12412_v3 = vld [vmem:[%s15239_s11 + $0x28] sm:$0xff]   ;;  %v12413_v10 = vld [vmem:[%s15239_s11 + $0x20] sm:$0xff]   ;;  %v12414_v63 = vld [vmem:[%s15239_s11 + $0x18] sm:$0xff]  }
 0x49e   : > { %11884 = vmatpush3.bf16.msra.mxu0 %v12379_v8  ;;  %11908 = vmatpush3.bf16.msra.mxu1 %v12380_v1 }
 0x49f   : > { %v10134_v36 = vpack.c.bf16 %v8061_v54, %v8060_v28  ;;  %v8024_v26 = vmax.f32 %v7806_v11, %v8004_v49  ;;  %11885 = vmatprep.subr.bf16.mxu0 %v15673_v15  ;;  %11909 = vmatprep.subr.bf16.mxu1 %v15673_v15  ;;  %v8052_v35 = vadd.f32 %v14964_v37, %v8035_v46 }
 0x4a0   : > { %v12392_v7 = vld [vmem:[#allocation3 + $0x10] sm:$0xff]  }
 0x4a1   : > { %10156 = vst [vmem:[#allocation3 + $0x18] sm:$0xff] %v10134_v36   ;;  %v8036_v23 = vmax.f32 %v8024_v26, %v8026_v6  ;;  %v8062_v40 = vmax.f32 %v8052_v35, 0.0 }
 0x4a2   : > { %11886 = vmatpush3.bf16.msra.mxu0 %v12381_v5  ;;  %11910 = vmatpush3.bf16.msra.mxu1 %v12382_v4  ;;  %v9986_v5 = vld [vmem:[%s15236_s8] ss:$0 sm:$0xff] }
 0x4a3   : > { %v8053_v13 = vadd.f32 %v14964_v37, %v8036_v23  ;;  %11887 = vmatprep.subr.bf16.mxu0 %v15673_v15  ;;  %11911 = vmatprep.subr.bf16.mxu1 %v15673_v15  ;;  %v12385_v37 = vld [vmem:[%s15235_s7 + $0x98] sm:$0xff]  }
 0x4a5   : > { %v8063_v0 = vmax.f32 %v8053_v13, 0.0 }
 0x4a6   : > { %11888 = vmatpush3.bf16.msra.mxu0 %v12383_v52  ;;  %11912 = vmatpush3.bf16.msra.mxu1 %v12384_v51 }
 0x4a7   : > { %v10139_v14 = vpack.c.bf16 %v8063_v0, %v8062_v40  ;;  %11889 = vmatprep.subr.bf16.mxu0 %v15673_v15  ;;  %11913 = vmatprep.subr.bf16.mxu1 %v15673_v15 }
 0x4a8   : > { %v12389_v62 = vld [vmem:[#allocation3 + $0x18] sm:$0xff]  }
 0x4a9   : > { %10157 = vst [vmem:[#allocation3 + $0x20] sm:$0xff] %v10139_v14  }
 0x4aa   : > { %11890 = vmatpush3.bf16.msra.mxu0 %v12385_v37  ;;  %11914 = vmatpush3.bf16.msra.mxu1 %v12386_v21  ;;  %v12415_v21 = vld [vmem:[%s15239_s11 + $0x10] sm:$0xff]  }
 0x4ab   : > { %11891 = vmatprep.subr.bf16.mxu0 %v15673_v15  ;;  %11915 = vmatprep.subr.bf16.mxu1 %v15673_v15 }
 0x4ae   : > { %11892 = vmatpush3.bf16.msra.mxu0 %v12387_v25  ;;  %11916 = vmatpush3.bf16.msra.mxu1 %v12388_v53  ;;  %v12416_v25 = vld [vmem:[%s15239_s11 + $0x8] sm:$0xff]   ;;  %v12417_v53 = vld [vmem:[%s15239_s11] sm:$0xff]  }
 0x4af   : > { %11893 = vmatprep.subr.bf16.mxu0 %v15673_v15  ;;  %11941 = vmatprep.subr.bf16.mxu1 %v15673_v15 }
 0x4b0   : > { %v12401_v19 = vld [vmem:[#allocation3 + $0x20] sm:$0xff]  }
 0x4b1   : > { %11918 = vmatmul.mubr.bf16.vlgmr.msra.gmra.mxu1 %v12389_v62 }
 0x4b2   : > { %11894 = vmatpush3.bf16.msra.mxu0 %v12390_v18  ;;  %11957 = vmatprep.mubr.msk.bf16.mxu1 %vm12444_vm0, %v15673_v15  ;;  %v9987_v18 = vld [vmem:[%s15238_s10] ss:$0 sm:$0xff] }
 0x4b3   : > { %11895 = vmatprep.subr.bf16.mxu0 %v15673_v15  ;;  %11942 = vmatpush3.bf16.msra.mxu1 %v12402_v39 }
 0x4b4   : > { %11943 = vmatprep.subr.bf16.mxu1 %v15673_v15 }
 0x4b6   : > { %11896 = vmatpush3.bf16.msra.mxu0 %v12391_v42 }
 0x4b7   : > { %11921 = vmatprep.subr.bf16.mxu0 %v15673_v15  ;;  %11944 = vmatpush3.bf16.msra.mxu1 %v12403_v33 }
 0x4b8   : > { %11945 = vmatprep.subr.bf16.mxu1 %v15673_v15 }
 0x4b9   : > { %11898 = vmatmul.mubr.bf16.vlgmr.msra.gmra.mxu0 %v12392_v7 }
 0x4ba   : > { %11922 = vmatpush3.bf16.msra.mxu0 %v12393_v27  ;;  %11937 = vmatprep.mubr.msk.bf16.mxu0 %vm12444_vm0, %v15673_v15 }
 0x4bb   : > { %11923 = vmatprep.subr.bf16.mxu0 %v15673_v15  ;;  %11946 = vmatpush3.bf16.msra.mxu1 %v12404_v44 }
 0x4bc   : > { %11947 = vmatprep.subr.bf16.mxu1 %v15673_v15 }
 0x4be   : > { %11924 = vmatpush3.bf16.msra.mxu0 %v12394_v57 }
 0x4bf   : > { %11925 = vmatprep.subr.bf16.mxu0 %v15673_v15  ;;  %11948 = vmatpush3.bf16.msra.mxu1 %v12405_v30 }
 0x4c0   : > { %11949 = vmatprep.subr.bf16.mxu1 %v15673_v15 }
 0x4c2   : > { %11926 = vmatpush3.bf16.msra.mxu0 %v12395_v43 }
 0x4c3   : > { %11927 = vmatprep.subr.bf16.mxu0 %v15673_v15  ;;  %11950 = vmatpush3.bf16.msra.mxu1 %v12406_v45 }
 0x4c4   : > { %11951 = vmatprep.subr.bf16.mxu1 %v15673_v15 }
 0x4c6   : > { %11928 = vmatpush3.bf16.msra.mxu0 %v12396_v9 }
 0x4c7   : > { %11929 = vmatprep.subr.bf16.mxu0 %v15673_v15  ;;  %11952 = vmatpush3.bf16.msra.mxu1 %v12407_v16 }
 0x4c8   : > { %11953 = vmatprep.subr.bf16.mxu1 %v15673_v15 }
 0x4ca   : > { %11930 = vmatpush3.bf16.msra.mxu0 %v12397_v55 }
 0x4cb   : > { %11931 = vmatprep.subr.bf16.mxu0 %v15673_v15  ;;  %11954 = vmatpush3.bf16.msra.mxu1 %v12408_v48 }
 0x4cc   : > { %11955 = vmatprep.subr.bf16.mxu1 %v15673_v15 }
 0x4ce   : > { %11932 = vmatpush3.bf16.msra.mxu0 %v12398_v38 }
 0x4cf   : > { %11933 = vmatprep.subr.bf16.mxu0 %v15673_v15  ;;  %11956 = vmatpush3.bf16.msra.mxu1 %v12409_v56 }
 0x4d2   : > { %11934 = vmatpush3.bf16.msra.mxu0 %v12399_v32 }
 0x4d3   : > { %11935 = vmatprep.subr.bf16.mxu0 %v15673_v15 }
 0x4d6   : > { %11936 = vmatpush3.bf16.msra.mxu0 %v12400_v12 }
 0x4d7   : > { %11961 = vmatprep.subr.bf16.mxu0 %v15673_v15 }
 0x4d9   : > { %11938 = vmatmul.mubr.bf16.vlgmr.msra.gmra.mxu0 %v12401_v19 }
 0x4da   : > { %11977 = vmatprep.mubr.msk.bf16.mxu0 %vm12444_vm0, %v15673_v15  ;;  %11962 = vmatpush3.bf16.msra.mxu0 %v12410_v20 }
 0x4db   : > { %11963 = vmatprep.subr.bf16.mxu0 %v15673_v15 }
 0x4de   : > { %11964 = vmatpush3.bf16.msra.mxu0 %v12411_v60 }
 0x4df   : > { %11965 = vmatprep.subr.bf16.mxu0 %v15673_v15 }
 0x4e2   : > { %11966 = vmatpush3.bf16.msra.mxu0 %v12412_v3 }
 0x4e3   : > { %11967 = vmatprep.subr.bf16.mxu0 %v15673_v15 }
 0x4e6   : > { %11968 = vmatpush3.bf16.msra.mxu0 %v12413_v10 }
 0x4e7   : > { %11969 = vmatprep.subr.bf16.mxu0 %v15673_v15 }
 0x4ea   : > { %11970 = vmatpush3.bf16.msra.mxu0 %v12414_v63 }
 0x4eb   : > { %11971 = vmatprep.subr.bf16.mxu0 %v15673_v15 }
 0x4ee   : > { %11972 = vmatpush3.bf16.msra.mxu0 %v12415_v21 }
 0x4ef   : > { %11973 = vmatprep.subr.bf16.mxu0 %v15673_v15 }
 0x4f2   : > { %11974 = vmatpush3.bf16.msra.mxu0 %v12416_v25 }
 0x4f3   : > { %11975 = vmatprep.subr.bf16.mxu0 %v15673_v15  ;;  %v9996_v15 = vld [vmem:[%s15240_s12] ss:$0 sm:$0xff] }
 0x4f6   : > { %11976 = vmatpush3.bf16.msra.mxu0 %v12417_v53 }
 0x551   : > { %v8335_v58 = vpop.f32.mrf.mxu1 }
 0x553   : > { %v11879_v29 = vpop.f32.mrf.mxu1 }
 0x555   : > { %v8338_v17 = vpop.f32.mrf.mxu1 }
 0x557   : > { %v11880_v50 = vpop.f32.mrf.mxu1 }
 0x559   : > { %v8240_v34 = vpop.f32.mrf.mxu0 }
 0x55a   : > { %v8336_v31 = vadd.f32 %v8335_v58, %v8240_v34 }
 0x55b   : > { %v11859_v22 = vpop.f32.mrf.mxu0 }
 0x55d   : > { %v8243_v59 = vpop.f32.mrf.mxu0 }
 0x55e   : > { %v8339_v46 = vadd.f32 %v8338_v17, %v8243_v59 }
 0x55f   : > { %v11860_v24 = vpop.f32.mrf.mxu0 }
 0x571   : > { %v8567_v47 = vpop.f32.mrf.mxu1 }
 0x573   : > { %v11919_v41 = vpop.f32.mrf.mxu1 }
 0x575   : > { %v8570_v2 = vpop.f32.mrf.mxu1 }
 0x577   : > { %v11920_v61 = vpop.f32.mrf.mxu1 }
 0x579   : > { %v8450_v8 = vpop.f32.mrf.mxu0 }
 0x57a   : > { %v8457_v54 = vadd.f32 %v8450_v8, %v8336_v31 }
 0x57b   : > { %v11899_v1 = vpop.f32.mrf.mxu0 }
 0x57c   : > { %v8574_v11 = vadd.f32 %v8567_v47, %v8457_v54 }
 0x57d   : > { %v8453_v28 = vpop.f32.mrf.mxu0 }
 0x57e   : > { %v8458_v6 = vadd.f32 %v8453_v28, %v8339_v46 }
 0x57f   : > { %v11900_v49 = vpop.f32.mrf.mxu0 }
 0x580   : > { %v8575_v35 = vadd.f32 %v8570_v2, %v8458_v6 }
 0x599   : > { %v8684_v36 = vpop.f32.mrf.mxu0 }
 0x59a   : > { %v8691_v26 = vadd.f32 %v8684_v36, %v8574_v11 }
 0x59b   : > { %v11939_v4 = vpop.f32.mrf.mxu0 }
 0x59c   : > { %v8700_v13 = vadd.f32 %v9986_v5, %v8691_v26 }
 0x59d   : > { %v8687_v23 = vpop.f32.mrf.mxu0 }
 0x59e   : > { %v8692_v52 = vadd.f32 %v8687_v23, %v8575_v35  ;;  %v8702_v0 = vmax.f32 %v8700_v13, 0.0 }
 0x59f   : > { %v11940_v51 = vpop.f32.mrf.mxu0 }
 0x5a0   : > { %v8701_v40 = vadd.f32 %v9986_v5, %v8692_v52 }
 0x5a2   : > { %v8703_v14 = vmax.f32 %v8701_v40, 0.0 }
 0x5a4   : > { %v8704_v37 = vpack.c.bf16 %v8703_v14, %v8702_v0 }
 0x5a6   : > { %11958 = vmatmul.mubr.bf16.vlgmr.msra.gmra.mxu1 %v8704_v37 }
 0x666   : > { %v8810_v62 = vpop.f32.mrf.mxu1 }
 0x667   : > { %v8811_v27 = vadd.f32 %v9987_v18, %v8810_v62 }
 0x668   : > { %v11959_v42 = vpop.f32.mrf.mxu1 }
 0x669   : > { %v8817_v9 = vmax.f32 %v8811_v27, 0.0 }
 0x66a   : > { %v8813_v7 = vpop.f32.mrf.mxu1 }
 0x66b   : > { %v8814_v57 = vadd.f32 %v9987_v18, %v8813_v7 }
 0x66c   : > { %v11960_v43 = vpop.f32.mrf.mxu1 }
 0x66d   : > { %v8818_v55 = vmax.f32 %v8814_v57, 0.0 }
 0x66f   : > { %v8819_v38 = vpack.c.bf16 %v8818_v55, %v8817_v9 }
 0x671   : > { %11978 = vmatmul.mubr.bf16.vlgmr.msra.gmra.mxu0 %v8819_v38 }
 0x731   : > { %v8925_v32 = vpop.f32.mrf.mxu0 }
 0x732   : > { %v8926_v12 = vadd.f32 %v9996_v15, %v8925_v32 }
 0x733   : > { %v11979_v19 = vpop.f32.mrf.mxu0 }
 0x734   : > { %8932 = vst [vmem:[%s737_s21] sm:$0xff] %v8926_v12 }
 0x735   : > { %v8928_v39 = vpop.f32.mrf.mxu0 }
 0x736   : > { %v8929_v33 = vadd.f32 %v9996_v15, %v8928_v39 }
 0x737   : > { %v11980_v44 = vpop.f32.mrf.mxu0 }
 0x738   : > { %8933 = vst [vmem:[%s737_s21 + $0x8] sm:$0xff] %v8929_v33 }
 0x739 PF: > { %p20_p9 = scmp.ge.s32.totalorder %s12532_s29, 4   ;;  %s15690_s25 = smov %s12437_s26 }
 0x73a   : > { %s15691_s26 = smov %s12541_s15  ;;  %s15692_s27 = smov %s12532_s29 }
 0x73b   :  { %22 = sbr.rel (!%p20_p9) target bundleno = 2 (0x2), region = 180 }

</bundles_post_ra>
